<compile_context>
chip_gen: v6e
topology: v6e:2x2x1
jax: 0.10.0
libtpu: 0.0.40
codegen_flags: <defaults>
</compile_context>

<pallas_src>
import jax
import jax.numpy as jnp
from jax.experimental import pallas as pl
from jax.experimental.pallas import tpu as pltpu


_VMEM_LIMIT = 32 * 1024 * 1024   # explicit budget; fits scoped VMEM on all gens
_CONV1_PACK = 4                  # output pixels packed per conv1 matmul row


# ---------------------------------------------------------------------------
# Pallas kernels
# ---------------------------------------------------------------------------

def conv1_leaky_kernel(p_ref, w_ref, b_ref, o_ref):
    # p: (tm, 64)  bf16 4-pixel-packed im2col patches
    # w: (64, 256) bf16 4-block-diagonal conv1 weight
    # o: (tm, 256) bf16 lane-dense store; un-packs to (4*tm, 64) for free.
    z = jnp.dot(p_ref[...], w_ref[...], preferred_element_type=jnp.float32)
    z = z + b_ref[...]
    a = jnp.where(z > 0, z, 0.2 * z)                    # LeakyReLU(0.2)
    o_ref[...] = a.astype(o_ref.dtype)


def make_conv2_stats_kernel(tb, h2, w2):
    """conv2 (4x4 / stride 2 / pad 1) as 4 kernel-row tap matmuls + BN partials."""
    s2 = h2 * w2                 # output pixels per image
    pr = (h2 + 1) * w2           # rows per image in each row-phase input

    def kernel(pe_ref, po_ref, w_ref, b_ref, z_ref, stats_ref):
        bias = b_ref[...]                                   # (1, 128) f32
        s_tot = jnp.zeros((1, 128), jnp.float32)
        q_tot = jnp.zeros((1, 128), jnp.float32)
        for t in range(tb):                                 # unrolled batch tile
            base = t * pr
            # taps: dh=0 (even rows, row offset 0), dh=1 (odd, 0),
            #       dh=2 (even, +1 row == +w2 flat rows), dh=3 (odd, +1 row)
            acc = jnp.dot(pe_ref[base:base + s2, :], w_ref[0],
                          preferred_element_type=jnp.float32)
            acc += jnp.dot(po_ref[base:base + s2, :], w_ref[1],
                           preferred_element_type=jnp.float32)
            acc += jnp.dot(pe_ref[base + w2:base + w2 + s2, :], w_ref[2],
                           preferred_element_type=jnp.float32)
            acc += jnp.dot(po_ref[base + w2:base + w2 + s2, :], w_ref[3],
                           preferred_element_type=jnp.float32)
            z = acc + bias                                  # (s2, 128) f32
            z_ref[t * s2:(t + 1) * s2, :] = z
            s_tot += jnp.sum(z, axis=0, keepdims=True)
            q_tot += jnp.sum(z * z, axis=0, keepdims=True)
        # BN partials: row 0 = sum, row 1 = sum of squares (rows 2..7 unused).
        stats_ref[0:1, :] = s_tot
        stats_ref[1:2, :] = q_tot

    return kernel


def make_final_kernel(tb, s2):
    """BatchNorm affine + LeakyReLU + Linear (NHWC order) + Sigmoid."""

    def kernel(z_ref, scale_ref, shift_ref, w_ref, b_ref, o_ref):
        sc = scale_ref[...]                                 # (1, 128)
        sh = shift_ref[...]                                 # (1, 128)
        w = w_ref[...]                                      # (s2, 128) f32
        b = b_ref[...]                                      # (1, 1)
        for t in range(tb):                                 # unrolled batch tile
            a = z_ref[t * s2:(t + 1) * s2, :] * sc + sh
            a = jnp.where(a > 0, a, 0.2 * a)
            per_chan = jnp.sum(a * w, axis=0, keepdims=True)      # (1, 128)
            logit = jnp.sum(per_chan, axis=1, keepdims=True) + b  # (1, 1)
            o_ref[t:t + 1, :] = jnp.broadcast_to(jax.nn.sigmoid(logit),
                                                 (1, 128))

    return kernel


# ---------------------------------------------------------------------------
# Helpers (JAX glue: layout only)
# ---------------------------------------------------------------------------

def _pick_tile(total, target, multiple):
    """Largest tile <= target dividing `total`, multiple of `multiple`;
    falls back to the full extent (block == array dim)."""
    t = min(target, total)
    t -= t % multiple
    while t >= multiple:
        if total % t == 0:
            return t
        t -= multiple
    return total


def _pick_divisor(n, target):
    """Largest divisor of n that is <= target (>= 1)."""
    t = max(1, min(n, target))
    while n % t:
        t -= 1
    return t


def _pick_final_tb(n):
    for t in (32, 24, 16, 8):
        if n % t == 0:
            return t
    return n        # small / odd batches: whole batch per grid step


def im2col(x_nhwc, k, s, pad):
    x = jnp.pad(x_nhwc, ((0, 0), (pad, pad), (pad, pad), (0, 0)))
    N, H, W, C = x.shape
    Ho = (H - k) // s + 1
    Wo = (W - k) // s + 1
    cols = []
    for dh in range(k):
        for dw in range(k):
            cols.append(x[:, dh:dh + s * Ho:s, dw:dw + s * Wo:s, :])
    p = jnp.stack(cols, axis=3)                      # (N, Ho, Wo, k*k, C)
    return p.reshape(N * Ho * Wo, k * k * C), (Ho, Wo)


# ---------------------------------------------------------------------------
# Layer wrappers
# ---------------------------------------------------------------------------

def _conv1(x_nhwc, w1, b1):
    N = x_nhwc.shape[0]
    p1, (H1, W1) = im2col(x_nhwc, 4, 2, 1)           # (M1, 16) f32
    M1 = p1.shape[0]
    P = _CONV1_PACK
    assert M1 % P == 0, "conv1 packing needs M1 % 4 == 0 (img_size % 4 == 0)"
    # Pack P output pixels per matmul row: K 16->64, output lanes 64->256.
    p1p = p1.reshape(M1 // P, P * 16).astype(jnp.bfloat16)
    w = w1.reshape(16, 64)
    wp = jnp.zeros((P * 16, P * 64), jnp.float32)
    for i in range(P):
        wp = wp.at[i * 16:(i + 1) * 16, i * 64:(i + 1) * 64].set(w)
    wp = wp.astype(jnp.bfloat16)
    bp = jnp.tile(b1, (1, P))                        # (1, 256) f32

    Mh = M1 // P
    tm = _pick_tile(Mh, min(1024, max(8, Mh // 2)), 8)
    out = pl.pallas_call(
        conv1_leaky_kernel,
        out_shape=jax.ShapeDtypeStruct((Mh, P * 64), jnp.bfloat16),
        grid=(Mh // tm,),
        in_specs=[pl.BlockSpec((tm, P * 16), lambda m: (m, 0)),
                  pl.BlockSpec((P * 16, P * 64), lambda m: (0, 0)),
                  pl.BlockSpec((1, P * 64), lambda m: (0, 0))],
        out_specs=pl.BlockSpec((tm, P * 64), lambda m: (m, 0)),
        compiler_params=pltpu.CompilerParams(
            dimension_semantics=("parallel",),
            vmem_limit_bytes=_VMEM_LIMIT),
    )(p1p, wp, bp)
    # (Mh, 256) row-major == (M1, 64) row-major: the un-pack reshape is free.
    return out.reshape(N, H1, W1, 64)                # bf16 activations


def _conv2_stats(a1, w2, b2):
    # a1: (N, H1, W1, 64) bf16
    N, H1, W1, _ = a1.shape
    assert H1 % 2 == 0 and W1 % 2 == 0
    H2, W2 = H1 // 2, W1 // 2
    S2 = H2 * W2
    PR = (H2 + 1) * W2

    # Width-direction im2col only (2x inflation, bf16), split into even/odd
    # input-row phases.  The kernel assembles the 4 height taps from
    # contiguous row slices of these phases, so the full 4x patch matrix is
    # never written to HBM.
    a1p = jnp.pad(a1, ((0, 0), (1, 1), (1, 1), (0, 0)))      # (N, H1+2, W1+2, 64)
    cols = [a1p[:, :, dw:dw + 2 * W2:2, :] for dw in range(4)]
    p_w = jnp.concatenate(cols, axis=-1)                     # (N, H1+2, W2, 256)
    pe = p_w[:, 0::2].reshape(N * PR, 256)                   # even input rows
    po = p_w[:, 1::2].reshape(N * PR, 256)                   # odd input rows
    w_taps = w2.reshape(4, 4 * 64, 128).astype(jnp.bfloat16)  # per kernel row

    aligned = (S2 % 8 == 0) and (PR % 8 == 0)
    if aligned:
        tb_target = max(1, min(max(1, N // 2), max(1, 512 // S2)))
        TB = _pick_divisor(N, tb_target)
    else:
        TB = N        # fall back to one grid step (blocks == full arrays)
    nb = N // TB

    kernel = make_conv2_stats_kernel(TB, H2, W2)
    z, stats = pl.pallas_call(
        kernel,
        out_shape=(jax.ShapeDtypeStruct((N * S2, 128), jnp.float32),
                   jax.ShapeDtypeStruct((nb * 8, 128), jnp.float32)),
        grid=(nb,),
        in_specs=[pl.BlockSpec((TB * PR, 256), lambda b: (b, 0)),
                  pl.BlockSpec((TB * PR, 256), lambda b: (b, 0)),
                  pl.BlockSpec((4, 256, 128), lambda b: (0, 0, 0)),
                  pl.BlockSpec((1, 128), lambda b: (0, 0))],
        out_specs=(pl.BlockSpec((TB * S2, 128), lambda b: (b, 0)),
                   pl.BlockSpec((8, 128), lambda b: (b, 0))),
        compiler_params=pltpu.CompilerParams(
            dimension_semantics=("parallel",),
            vmem_limit_bytes=_VMEM_LIMIT),
    )(pe, po, w_taps, b2)
    return z, stats, (H2, W2)


def _bn_leaky_linear_sigmoid(z, stats, gamma, beta, w_lin, b_lin, N, H2, W2):
    M2 = z.shape[0]
    S2 = H2 * W2
    # BN finalize (tiny per-channel reduction, plain JAX): training-mode
    # biased batch stats.  var = E[z^2] - mean^2 in f32; fine for these
    # post-conv magnitudes (verified against the reference below).
    st = stats.reshape(-1, 8, 128)
    sums = jnp.sum(st[:, 0, :], axis=0)
    sqs = jnp.sum(st[:, 1, :], axis=0)
    mean = sums / M2
    var = sqs / M2 - mean * mean
    inv = jax.lax.rsqrt(var + 1e-5)
    g = gamma.reshape(128)
    scale = (g * inv).reshape(1, 128)
    shift = (beta.reshape(128) - mean * g * inv).reshape(1, 128)

    # Permute the Linear weight once into NHWC-flatten order instead of
    # transposing the activation (torch Flatten: idx = c*S2 + h*W2 + w).
    w_nhwc = w_lin.reshape(128, H2, W2).transpose(1, 2, 0).reshape(S2, 128)

    TB = _pick_final_tb(N)
    nb = N // TB
    kernel = make_final_kernel(TB, S2)
    out = pl.pallas_call(
        kernel,
        out_shape=jax.ShapeDtypeStruct((N, 128), jnp.float32),
        grid=(nb,),
        in_specs=[pl.BlockSpec((TB * S2, 128), lambda n: (n, 0)),
                  pl.BlockSpec((1, 128), lambda n: (0, 0)),
                  pl.BlockSpec((1, 128), lambda n: (0, 0)),
                  pl.BlockSpec((S2, 128), lambda n: (0, 0)),
                  pl.BlockSpec((1, 1), lambda n: (0, 0))],
        out_specs=pl.BlockSpec((TB, 128), lambda n: (n, 0)),
        compiler_params=pltpu.CompilerParams(
            dimension_semantics=("parallel",),
            vmem_limit_bytes=_VMEM_LIMIT),
    )(z, scale, shift, w_nhwc, b_lin)
    return out[:, :1]                                # (N, 1)


@jax.jit
def discriminator_forward(img_nchw, params):
    N = img_nchw.shape[0]
    x = jnp.transpose(img_nchw, (0, 2, 3, 1))        # NCHW -> NHWC
    a1 = _conv1(x, params["w1"], params["b1"])       # bf16
    z, stats, (H2, W2) = _conv2_stats(a1, params["w2"], params["b2"])
    return _bn_leaky_linear_sigmoid(z, stats, params["gamma"], params["beta"],
                                    params["w_lin"], params["b_lin"],
                                    N, H2, W2)


# ---------------------------------------------------------------------------
# Deterministic synthetic parameters + pure-JAX reference (same bf16 numerics)
# ---------------------------------------------------------------------------

def init_params(key, img_size):
    ks = jax.random.split(key, 6)
    F = 128 * (img_size // 4) * (img_size // 4)
    return {
        # conv weights in HWIO layout (kh, kw, Cin, Cout)
        "w1": 0.05 * jax.random.normal(ks[0], (4, 4, 1, 64), jnp.float32),
        "b1": 0.01 * jax.random.normal(ks[1], (1, 64), jnp.float32),
        "w2": 0.05 * jax.random.normal(ks[2], (4, 4, 64, 128), jnp.float32),
        "b2": 0.01 * jax.random.normal(ks[3], (1, 128), jnp.float32),
        "gamma": jnp.ones((1, 128), jnp.float32),
        "beta": jnp.zeros((1, 128), jnp.float32),
        "w_lin": 0.02 * jax.random.normal(ks[4], (F, 1), jnp.float32),
        "b_lin": 0.01 * jax.random.normal(ks[5], (1, 1), jnp.float32),
    }


def reference_forward(img_nchw, params):
    bf = jnp.bfloat16
    N = img_nchw.shape[0]
    x = jnp.transpose(img_nchw, (0, 2, 3, 1))
    p1, (H1, W1) = im2col(x, 4, 2, 1)
    z1 = jnp.dot(p1.astype(bf), params["w1"].reshape(16, 64).astype(bf),
                 preferred_element_type=jnp.float32) + params["b1"]
    a1 = jnp.where(z1 > 0, z1, 0.2 * z1).reshape(N, H1, W1, 64)
    p2, (H2, W2) = im2col(a1, 4, 2, 1)
    z2 = jnp.dot(p2.astype(bf), params["w2"].reshape(1024, 128).astype(bf),
                 preferred_element_type=jnp.float32) + params["b2"]
    m = jnp.mean(z2, axis=0, keepdims=True)
    v = jnp.mean((z2 - m) ** 2, axis=0, keepdims=True)
    y = (z2 - m) * jax.lax.rsqrt(v + 1e-5) * params["gamma"] + params["beta"]
    a2 = jnp.where(y > 0, y, 0.2 * y).reshape(N, H2, W2, 128)
    flat = jnp.transpose(a2, (0, 3, 1, 2)).reshape(N, -1)
    logits = jnp.dot(flat, params["w_lin"],
                     precision=jax.lax.Precision.HIGHEST) + params["b_lin"]
    return jax.nn.sigmoid(logits)


if __name__ == "__main__":
    img_channels = 1
    img_size = 32          # must be divisible by 4 (two stride-2 convs + Linear)
    batch = 8

    key = jax.random.PRNGKey(0)
    k_img, k_par = jax.random.split(key)
    img = jax.random.normal(k_img, (batch, img_channels, img_size, img_size),
                            jnp.float32)
    params = init_params(k_par, img_size)

    out = discriminator_forward(img, params)
    out = jax.block_until_ready(out)
    assert out.shape == (batch, 1)

    ref = reference_forward(img, params)
    assert jnp.allclose(out, ref, atol=5e-3, rtol=5e-3), (out, ref)

    print("KERNEL_OK")
</pallas_src>

<mosaic_0001>
module attributes {stable_mosaic.version = 11 : i64} {
  func.func @conv1_leaky_kernel(%arg0: i32, %arg1: memref<256x64xbf16, #tpu.memory_space<vmem>>, %arg2: memref<64x256xbf16, #tpu.memory_space<vmem>>, %arg3: memref<1x256xf32, #tpu.memory_space<vmem>>, %arg4: memref<256x256xbf16, #tpu.memory_space<vmem>>) attributes {dimension_semantics = [#tpu.dimension_semantics<parallel>], iteration_bounds = array<i64: 2>, scalar_prefetch = 0 : i64, scratch_operands = 0 : i64, tpu.core_type = #tpu.core_type<tc>, window_params = [{transform_indices = @transform_0, window_bounds = array<i64: 256, 64>}, {pipeline_mode = #tpu.pipeline_mode<synchronous>, transform_indices = @transform_1, window_bounds = array<i64: 64, 256>}, {pipeline_mode = #tpu.pipeline_mode<synchronous>, transform_indices = @transform_2, window_bounds = array<i64: 1, 256>}, {transform_indices = @transform_3, window_bounds = array<i64: 256, 256>}]} {
    %c0 = arith.constant 0 : index
    %c0_0 = arith.constant 0 : index
    %0 = vector.load %arg1[%c0, %c0_0] : memref<256x64xbf16, #tpu.memory_space<vmem>>, vector<256x64xbf16>
    %c0_1 = arith.constant 0 : index
    %c0_2 = arith.constant 0 : index
    %1 = vector.load %arg2[%c0_1, %c0_2] : memref<64x256xbf16, #tpu.memory_space<vmem>>, vector<64x256xbf16>
    %cst = arith.constant dense<0.000000e+00> : vector<256x256xf32>
    %2 = tpu.matmul %0, %1, %cst {dimension_numbers = #tpu.dot_dimension_numbers<[1], [0], [0], [1], [0, 0, 1, 1], [], []>} : vector<256x64xbf16>, vector<64x256xbf16>, vector<256x256xf32> -> vector<256x256xf32>
    %c0_3 = arith.constant 0 : index
    %c0_4 = arith.constant 0 : index
    %3 = vector.load %arg3[%c0_3, %c0_4] : memref<1x256xf32, #tpu.memory_space<vmem>>, vector<1x256xf32>
    %4 = vector.broadcast %3 : vector<1x256xf32> to vector<256x256xf32>
    %5 = arith.addf %2, %4 : vector<256x256xf32>
    %cst_5 = arith.constant 0.000000e+00 : f32
    %6 = vector.broadcast %cst_5 : f32 to vector<256x256xf32>
    %7 = arith.cmpf ogt, %5, %6 : vector<256x256xf32>
    %cst_6 = arith.constant 2.000000e-01 : f32
    %8 = vector.broadcast %cst_6 : f32 to vector<256x256xf32>
    %9 = arith.mulf %8, %5 : vector<256x256xf32>
    %10 = arith.select %7, %5, %9 : vector<256x256xi1>, vector<256x256xf32>
    %11 = arith.truncf %10 : vector<256x256xf32> to vector<256x256xbf16>
    %c0_7 = arith.constant 0 : index
    %c0_8 = arith.constant 0 : index
    %12 = vector.load %arg4[%c0_7, %c0_8] : memref<256x256xbf16, #tpu.memory_space<vmem>>, vector<256x256xbf16>
    tpu.vector_store %arg4[%c0_7, %c0_8], %11 {strides = array<i32>} : memref<256x256xbf16, #tpu.memory_space<vmem>>, vector<256x256xbf16>,
    return
  }
  func.func @transform_0(%arg0: i32) -> (i32, i32) {
    %c0_i32 = arith.constant 0 : i32
    %c0_i32_0 = arith.constant 0 : i32
    return %arg0, %c0_i32 : i32, i32
  }
  func.func @transform_1(%arg0: i32) -> (i32, i32) {
    %c0_i32 = arith.constant 0 : i32
    %c0_i32_0 = arith.constant 0 : i32
    %c0_i32_1 = arith.constant 0 : i32
    return %c0_i32, %c0_i32_0 : i32, i32
  }
  func.func @transform_2(%arg0: i32) -> (i32, i32) {
    %c0_i32 = arith.constant 0 : i32
    %c0_i32_0 = arith.constant 0 : i32
    %c0_i32_1 = arith.constant 0 : i32
    return %c0_i32, %c0_i32_0 : i32, i32
  }
  func.func @transform_3(%arg0: i32) -> (i32, i32) {
    %c0_i32 = arith.constant 0 : i32
    %c0_i32_0 = arith.constant 0 : i32
    return %arg0, %c0_i32 : i32, i32
  }
}

module attributes {stable_mosaic.version = 11 : i64} {
  func.func @kernel(%arg0: i32, %arg1: memref<288x256xbf16, #tpu.memory_space<vmem>>, %arg2: memref<288x256xbf16, #tpu.memory_space<vmem>>, %arg3: memref<4x256x128xbf16, #tpu.memory_space<vmem>>, %arg4: memref<1x128xf32, #tpu.memory_space<vmem>>, %arg5: memref<256x128xf32, #tpu.memory_space<vmem>>, %arg6: memref<8x128xf32, #tpu.memory_space<vmem>>) attributes {dimension_semantics = [#tpu.dimension_semantics<parallel>], iteration_bounds = array<i64: 2>, scalar_prefetch = 0 : i64, scratch_operands = 0 : i64, tpu.core_type = #tpu.core_type<tc>, window_params = [{transform_indices = @transform_0, window_bounds = array<i64: 288, 256>}, {transform_indices = @transform_1, window_bounds = array<i64: 288, 256>}, {pipeline_mode = #tpu.pipeline_mode<synchronous>, transform_indices = @transform_2, window_bounds = array<i64: 4, 256, 128>}, {pipeline_mode = #tpu.pipeline_mode<synchronous>, transform_indices = @transform_3, window_bounds = array<i64: 1, 128>}, {transform_indices = @transform_4, window_bounds = array<i64: 256, 128>}, {transform_indices = @transform_5, window_bounds = array<i64: 8, 128>}]} {
    %c0 = arith.constant 0 : index
    %c0_0 = arith.constant 0 : index
    %0 = vector.load %arg4[%c0, %c0_0] : memref<1x128xf32, #tpu.memory_space<vmem>>, vector<1x128xf32>
    %cst = arith.constant 0.000000e+00 : f32
    %1 = vector.broadcast %cst : f32 to vector<1x128xf32>
    %cst_1 = arith.constant 0.000000e+00 : f32
    %2 = vector.broadcast %cst_1 : f32 to vector<1x128xf32>
    %c0_2 = arith.constant 0 : index
    %c0_3 = arith.constant 0 : index
    %3 = vector.load %arg1[%c0_2, %c0_3] : memref<288x256xbf16, #tpu.memory_space<vmem>>, vector<64x256xbf16>
    %c0_4 = arith.constant 0 : index
    %c0_5 = arith.constant 0 : index
    %c0_6 = arith.constant 0 : index
    %4 = vector.load %arg3[%c0_4, %c0_5, %c0_6] : memref<4x256x128xbf16, #tpu.memory_space<vmem>>, vector<1x256x128xbf16>
    %5 = vector.shape_cast %4 : vector<1x256x128xbf16> to vector<256x128xbf16>
    %cst_7 = arith.constant dense<0.000000e+00> : vector<64x128xf32>
    %6 = tpu.matmul %3, %5, %cst_7 {dimension_numbers = #tpu.dot_dimension_numbers<[1], [0], [0], [1], [0, 0, 1, 1], [], []>} : vector<64x256xbf16>, vector<256x128xbf16>, vector<64x128xf32> -> vector<64x128xf32>
    %c0_8 = arith.constant 0 : index
    %c0_9 = arith.constant 0 : index
    %7 = vector.load %arg2[%c0_8, %c0_9] : memref<288x256xbf16, #tpu.memory_space<vmem>>, vector<64x256xbf16>
    %c1 = arith.constant 1 : index
    %c0_10 = arith.constant 0 : index
    %c0_11 = arith.constant 0 : index
    %8 = vector.load %arg3[%c1, %c0_10, %c0_11] : memref<4x256x128xbf16, #tpu.memory_space<vmem>>, vector<1x256x128xbf16>
    %9 = vector.shape_cast %8 : vector<1x256x128xbf16> to vector<256x128xbf16>
    %cst_12 = arith.constant dense<0.000000e+00> : vector<64x128xf32>
    %10 = tpu.matmul %7, %9, %cst_12 {dimension_numbers = #tpu.dot_dimension_numbers<[1], [0], [0], [1], [0, 0, 1, 1], [], []>} : vector<64x256xbf16>, vector<256x128xbf16>, vector<64x128xf32> -> vector<64x128xf32>
    %11 = arith.addf %6, %10 : vector<64x128xf32>
    %c8 = arith.constant 8 : index
    %c0_13 = arith.constant 0 : index
    %12 = vector.load %arg1[%c8, %c0_13] : memref<288x256xbf16, #tpu.memory_space<vmem>>, vector<64x256xbf16>
    %c2 = arith.constant 2 : index
    %c0_14 = arith.constant 0 : index
    %c0_15 = arith.constant 0 : index
    %13 = vector.load %arg3[%c2, %c0_14, %c0_15] : memref<4x256x128xbf16, #tpu.memory_space<vmem>>, vector<1x256x128xbf16>
    %14 = vector.shape_cast %13 : vector<1x256x128xbf16> to vector<256x128xbf16>
    %cst_16 = arith.constant dense<0.000000e+00> : vector<64x128xf32>
    %15 = tpu.matmul %12, %14, %cst_16 {dimension_numbers = #tpu.dot_dimension_numbers<[1], [0], [0], [1], [0, 0, 1, 1], [], []>} : vector<64x256xbf16>, vector<256x128xbf16>, vector<64x128xf32> -> vector<64x128xf32>
    %16 = arith.addf %11, %15 : vector<64x128xf32>
    %c8_17 = arith.constant 8 : index
    %c0_18 = arith.constant 0 : index
    %17 = vector.load %arg2[%c8_17, %c0_18] : memref<288x256xbf16, #tpu.memory_space<vmem>>, vector<64x256xbf16>
    %c3 = arith.constant 3 : index
    %c0_19 = arith.constant 0 : index
    %c0_20 = arith.constant 0 : index
    %18 = vector.load %arg3[%c3, %c0_19, %c0_20] : memref<4x256x128xbf16, #tpu.memory_space<vmem>>, vector<1x256x128xbf16>
    %19 = vector.shape_cast %18 : vector<1x256x128xbf16> to vector<256x128xbf16>
    %cst_21 = arith.constant dense<0.000000e+00> : vector<64x128xf32>
    %20 = tpu.matmul %17, %19, %cst_21 {dimension_numbers = #tpu.dot_dimension_numbers<[1], [0], [0], [1], [0, 0, 1, 1], [], []>} : vector<64x256xbf16>, vector<256x128xbf16>, vector<64x128xf32> -> vector<64x128xf32>
    %21 = arith.addf %16, %20 : vector<64x128xf32>
    %22 = vector.broadcast %0 : vector<1x128xf32> to vector<64x128xf32>
    %23 = arith.addf %21, %22 : vector<64x128xf32>
    %c0_22 = arith.constant 0 : index
    %c0_23 = arith.constant 0 : index
    %24 = vector.load %arg5[%c0_22, %c0_23] : memref<256x128xf32, #tpu.memory_space<vmem>>, vector<64x128xf32>
    tpu.vector_store %arg5[%c0_22, %c0_23], %23 {strides = array<i32>} : memref<256x128xf32, #tpu.memory_space<vmem>>, vector<64x128xf32>,
    %cst_24 = arith.constant dense<0.000000e+00> : vector<128xf32>
    %25 = vector.multi_reduction <add>, %23, %cst_24 [0] : vector<64x128xf32> to vector<128xf32>
    %26 = vector.shape_cast %25 : vector<128xf32> to vector<1x128xf32>
    %27 = arith.addf %1, %26 : vector<1x128xf32>
    %28 = arith.mulf %23, %23 : vector<64x128xf32>
    %cst_25 = arith.constant dense<0.000000e+00> : vector<128xf32>
    %29 = vector.multi_reduction <add>, %28, %cst_25 [0] : vector<64x128xf32> to vector<128xf32>
    %30 = vector.shape_cast %29 : vector<128xf32> to vector<1x128xf32>
    %31 = arith.addf %2, %30 : vector<1x128xf32>
    %c72 = arith.constant 72 : index
    %c0_26 = arith.constant 0 : index
    %32 = vector.load %arg1[%c72, %c0_26] : memref<288x256xbf16, #tpu.memory_space<vmem>>, vector<64x256xbf16>
    %c0_27 = arith.constant 0 : index
    %c0_28 = arith.constant 0 : index
    %c0_29 = arith.constant 0 : index
    %33 = vector.load %arg3[%c0_27, %c0_28, %c0_29] : memref<4x256x128xbf16, #tpu.memory_space<vmem>>, vector<1x256x128xbf16>
    %34 = vector.shape_cast %33 : vector<1x256x128xbf16> to vector<256x128xbf16>
    %cst_30 = arith.constant dense<0.000000e+00> : vector<64x128xf32>
    %35 = tpu.matmul %32, %34, %cst_30 {dimension_numbers = #tpu.dot_dimension_numbers<[1], [0], [0], [1], [0, 0, 1, 1], [], []>} : vector<64x256xbf16>, vector<256x128xbf16>, vector<64x128xf32> -> vector<64x128xf32>
    %c72_31 = arith.constant 72 : index
    %c0_32 = arith.constant 0 : index
    %36 = vector.load %arg2[%c72_31, %c0_32] : memref<288x256xbf16, #tpu.memory_space<vmem>>, vector<64x256xbf16>
    %c1_33 = arith.constant 1 : index
    %c0_34 = arith.constant 0 : index
    %c0_35 = arith.constant 0 : index
    %37 = vector.load %arg3[%c1_33, %c0_34, %c0_35] : memref<4x256x128xbf16, #tpu.memory_space<vmem>>, vector<1x256x128xbf16>
    %38 = vector.shape_cast %37 : vector<1x256x128xbf16> to vector<256x128xbf16>
    %cst_36 = arith.constant dense<0.000000e+00> : vector<64x128xf32>
    %39 = tpu.matmul %36, %38, %cst_36 {dimension_numbers = #tpu.dot_dimension_numbers<[1], [0], [0], [1], [0, 0, 1, 1], [], []>} : vector<64x256xbf16>, vector<256x128xbf16>, vector<64x128xf32> -> vector<64x128xf32>
    %40 = arith.addf %35, %39 : vector<64x128xf32>
    %c80 = arith.constant 80 : index
    %c0_37 = arith.constant 0 : index
    %41 = vector.load %arg1[%c80, %c0_37] : memref<288x256xbf16, #tpu.memory_space<vmem>>, vector<64x256xbf16>
    %c2_38 = arith.constant 2 : index
    %c0_39 = arith.constant 0 : index
    %c0_40 = arith.constant 0 : index
    %42 = vector.load %arg3[%c2_38, %c0_39, %c0_40] : memref<4x256x128xbf16, #tpu.memory_space<vmem>>, vector<1x256x128xbf16>
    %43 = vector.shape_cast %42 : vector<1x256x128xbf16> to vector<256x128xbf16>
    %cst_41 = arith.constant dense<0.000000e+00> : vector<64x128xf32>
    %44 = tpu.matmul %41, %43, %cst_41 {dimension_numbers = #tpu.dot_dimension_numbers<[1], [0], [0], [1], [0, 0, 1, 1], [], []>} : vector<64x256xbf16>, vector<256x128xbf16>, vector<64x128xf32> -> vector<64x128xf32>
    %45 = arith.addf %40, %44 : vector<64x128xf32>
    %c80_42 = arith.constant 80 : index
    %c0_43 = arith.constant 0 : index
    %46 = vector.load %arg2[%c80_42, %c0_43] : memref<288x256xbf16, #tpu.memory_space<vmem>>, vector<64x256xbf16>
    %c3_44 = arith.constant 3 : index
    %c0_45 = arith.constant 0 : index
    %c0_46 = arith.constant 0 : index
    %47 = vector.load %arg3[%c3_44, %c0_45, %c0_46] : memref<4x256x128xbf16, #tpu.memory_space<vmem>>, vector<1x256x128xbf16>
    %48 = vector.shape_cast %47 : vector<1x256x128xbf16> to vector<256x128xbf16>
    %cst_47 = arith.constant dense<0.000000e+00> : vector<64x128xf32>
    %49 = tpu.matmul %46, %48, %cst_47 {dimension_numbers = #tpu.dot_dimension_numbers<[1], [0], [0], [1], [0, 0, 1, 1], [], []>} : vector<64x256xbf16>, vector<256x128xbf16>, vector<64x128xf32> -> vector<64x128xf32>
    %50 = arith.addf %45, %49 : vector<64x128xf32>
    %51 = vector.broadcast %0 : vector<1x128xf32> to vector<64x128xf32>
    %52 = arith.addf %50, %51 : vector<64x128xf32>
    %c64 = arith.constant 64 : index
    %c0_48 = arith.constant 0 : index
    %53 = vector.load %arg5[%c64, %c0_48] : memref<256x128xf32, #tpu.memory_space<vmem>>, vector<64x128xf32>
    tpu.vector_store %arg5[%c64, %c0_48], %52 {strides = array<i32>} : memref<256x128xf32, #tpu.memory_space<vmem>>, vector<64x128xf32>,
    %cst_49 = arith.constant dense<0.000000e+00> : vector<128xf32>
    %54 = vector.multi_reduction <add>, %52, %cst_49 [0] : vector<64x128xf32> to vector<128xf32>
    %55 = vector.shape_cast %54 : vector<128xf32> to vector<1x128xf32>
    %56 = arith.addf %27, %55 : vector<1x128xf32>
    %57 = arith.mulf %52, %52 : vector<64x128xf32>
    %cst_50 = arith.constant dense<0.000000e+00> : vector<128xf32>
    %58 = vector.multi_reduction <add>, %57, %cst_50 [0] : vector<64x128xf32> to vector<128xf32>
    %59 = vector.shape_cast %58 : vector<128xf32> to vector<1x128xf32>
    %60 = arith.addf %31, %59 : vector<1x128xf32>
    %c144 = arith.constant 144 : index
    %c0_51 = arith.constant 0 : index
    %61 = vector.load %arg1[%c144, %c0_51] : memref<288x256xbf16, #tpu.memory_space<vmem>>, vector<64x256xbf16>
    %c0_52 = arith.constant 0 : index
    %c0_53 = arith.constant 0 : index
    %c0_54 = arith.constant 0 : index
    %62 = vector.load %arg3[%c0_52, %c0_53, %c0_54] : memref<4x256x128xbf16, #tpu.memory_space<vmem>>, vector<1x256x128xbf16>
    %63 = vector.shape_cast %62 : vector<1x256x128xbf16> to vector<256x128xbf16>
    %cst_55 = arith.constant dense<0.000000e+00> : vector<64x128xf32>
    %64 = tpu.matmul %61, %63, %cst_55 {dimension_numbers = #tpu.dot_dimension_numbers<[1], [0], [0], [1], [0, 0, 1, 1], [], []>} : vector<64x256xbf16>, vector<256x128xbf16>, vector<64x128xf32> -> vector<64x128xf32>
    %c144_56 = arith.constant 144 : index
    %c0_57 = arith.constant 0 : index
    %65 = vector.load %arg2[%c144_56, %c0_57] : memref<288x256xbf16, #tpu.memory_space<vmem>>, vector<64x256xbf16>
    %c1_58 = arith.constant 1 : index
    %c0_59 = arith.constant 0 : index
    %c0_60 = arith.constant 0 : index
    %66 = vector.load %arg3[%c1_58, %c0_59, %c0_60] : memref<4x256x128xbf16, #tpu.memory_space<vmem>>, vector<1x256x128xbf16>
    %67 = vector.shape_cast %66 : vector<1x256x128xbf16> to vector<256x128xbf16>
    %cst_61 = arith.constant dense<0.000000e+00> : vector<64x128xf32>
    %68 = tpu.matmul %65, %67, %cst_61 {dimension_numbers = #tpu.dot_dimension_numbers<[1], [0], [0], [1], [0, 0, 1, 1], [], []>} : vector<64x256xbf16>, vector<256x128xbf16>, vector<64x128xf32> -> vector<64x128xf32>
    %69 = arith.addf %64, %68 : vector<64x128xf32>
    %c152 = arith.constant 152 : index
    %c0_62 = arith.constant 0 : index
    %70 = vector.load %arg1[%c152, %c0_62] : memref<288x256xbf16, #tpu.memory_space<vmem>>, vector<64x256xbf16>
    %c2_63 = arith.constant 2 : index
    %c0_64 = arith.constant 0 : index
    %c0_65 = arith.constant 0 : index
    %71 = vector.load %arg3[%c2_63, %c0_64, %c0_65] : memref<4x256x128xbf16, #tpu.memory_space<vmem>>, vector<1x256x128xbf16>
    %72 = vector.shape_cast %71 : vector<1x256x128xbf16> to vector<256x128xbf16>
    %cst_66 = arith.constant dense<0.000000e+00> : vector<64x128xf32>
    %73 = tpu.matmul %70, %72, %cst_66 {dimension_numbers = #tpu.dot_dimension_numbers<[1], [0], [0], [1], [0, 0, 1, 1], [], []>} : vector<64x256xbf16>, vector<256x128xbf16>, vector<64x128xf32> -> vector<64x128xf32>
    %74 = arith.addf %69, %73 : vector<64x128xf32>
    %c152_67 = arith.constant 152 : index
    %c0_68 = arith.constant 0 : index
    %75 = vector.load %arg2[%c152_67, %c0_68] : memref<288x256xbf16, #tpu.memory_space<vmem>>, vector<64x256xbf16>
    %c3_69 = arith.constant 3 : index
    %c0_70 = arith.constant 0 : index
    %c0_71 = arith.constant 0 : index
    %76 = vector.load %arg3[%c3_69, %c0_70, %c0_71] : memref<4x256x128xbf16, #tpu.memory_space<vmem>>, vector<1x256x128xbf16>
    %77 = vector.shape_cast %76 : vector<1x256x128xbf16> to vector<256x128xbf16>
    %cst_72 = arith.constant dense<0.000000e+00> : vector<64x128xf32>
    %78 = tpu.matmul %75, %77, %cst_72 {dimension_numbers = #tpu.dot_dimension_numbers<[1], [0], [0], [1], [0, 0, 1, 1], [], []>} : vector<64x256xbf16>, vector<256x128xbf16>, vector<64x128xf32> -> vector<64x128xf32>
    %79 = arith.addf %74, %78 : vector<64x128xf32>
    %80 = vector.broadcast %0 : vector<1x128xf32> to vector<64x128xf32>
    %81 = arith.addf %79, %80 : vector<64x128xf32>
    %c128 = arith.constant 128 : index
    %c0_73 = arith.constant 0 : index
    %82 = vector.load %arg5[%c128, %c0_73] : memref<256x128xf32, #tpu.memory_space<vmem>>, vector<64x128xf32>
    tpu.vector_store %arg5[%c128, %c0_73], %81 {strides = array<i32>} : memref<256x128xf32, #tpu.memory_space<vmem>>, vector<64x128xf32>,
    %cst_74 = arith.constant dense<0.000000e+00> : vector<128xf32>
    %83 = vector.multi_reduction <add>, %81, %cst_74 [0] : vector<64x128xf32> to vector<128xf32>
    %84 = vector.shape_cast %83 : vector<128xf32> to vector<1x128xf32>
    %85 = arith.addf %56, %84 : vector<1x128xf32>
    %86 = arith.mulf %81, %81 : vector<64x128xf32>
    %cst_75 = arith.constant dense<0.000000e+00> : vector<128xf32>
    %87 = vector.multi_reduction <add>, %86, %cst_75 [0] : vector<64x128xf32> to vector<128xf32>
    %88 = vector.shape_cast %87 : vector<128xf32> to vector<1x128xf32>
    %89 = arith.addf %60, %88 : vector<1x128xf32>
    %c216 = arith.constant 216 : index
    %c0_76 = arith.constant 0 : index
    %90 = vector.load %arg1[%c216, %c0_76] : memref<288x256xbf16, #tpu.memory_space<vmem>>, vector<64x256xbf16>
    %c0_77 = arith.constant 0 : index
    %c0_78 = arith.constant 0 : index
    %c0_79 = arith.constant 0 : index
    %91 = vector.load %arg3[%c0_77, %c0_78, %c0_79] : memref<4x256x128xbf16, #tpu.memory_space<vmem>>, vector<1x256x128xbf16>
    %92 = vector.shape_cast %91 : vector<1x256x128xbf16> to vector<256x128xbf16>
    %cst_80 = arith.constant dense<0.000000e+00> : vector<64x128xf32>
    %93 = tpu.matmul %90, %92, %cst_80 {dimension_numbers = #tpu.dot_dimension_numbers<[1], [0], [0], [1], [0, 0, 1, 1], [], []>} : vector<64x256xbf16>, vector<256x128xbf16>, vector<64x128xf32> -> vector<64x128xf32>
    %c216_81 = arith.constant 216 : index
    %c0_82 = arith.constant 0 : index
    %94 = vector.load %arg2[%c216_81, %c0_82] : memref<288x256xbf16, #tpu.memory_space<vmem>>, vector<64x256xbf16>
    %c1_83 = arith.constant 1 : index
    %c0_84 = arith.constant 0 : index
    %c0_85 = arith.constant 0 : index
    %95 = vector.load %arg3[%c1_83, %c0_84, %c0_85] : memref<4x256x128xbf16, #tpu.memory_space<vmem>>, vector<1x256x128xbf16>
    %96 = vector.shape_cast %95 : vector<1x256x128xbf16> to vector<256x128xbf16>
    %cst_86 = arith.constant dense<0.000000e+00> : vector<64x128xf32>
    %97 = tpu.matmul %94, %96, %cst_86 {dimension_numbers = #tpu.dot_dimension_numbers<[1], [0], [0], [1], [0, 0, 1, 1], [], []>} : vector<64x256xbf16>, vector<256x128xbf16>, vector<64x128xf32> -> vector<64x128xf32>
    %98 = arith.addf %93, %97 : vector<64x128xf32>
    %c224 = arith.constant 224 : index
    %c0_87 = arith.constant 0 : index
    %99 = vector.load %arg1[%c224, %c0_87] : memref<288x256xbf16, #tpu.memory_space<vmem>>, vector<64x256xbf16>
    %c2_88 = arith.constant 2 : index
    %c0_89 = arith.constant 0 : index
    %c0_90 = arith.constant 0 : index
    %100 = vector.load %arg3[%c2_88, %c0_89, %c0_90] : memref<4x256x128xbf16, #tpu.memory_space<vmem>>, vector<1x256x128xbf16>
    %101 = vector.shape_cast %100 : vector<1x256x128xbf16> to vector<256x128xbf16>
    %cst_91 = arith.constant dense<0.000000e+00> : vector<64x128xf32>
    %102 = tpu.matmul %99, %101, %cst_91 {dimension_numbers = #tpu.dot_dimension_numbers<[1], [0], [0], [1], [0, 0, 1, 1], [], []>} : vector<64x256xbf16>, vector<256x128xbf16>, vector<64x128xf32> -> vector<64x128xf32>
    %103 = arith.addf %98, %102 : vector<64x128xf32>
    %c224_92 = arith.constant 224 : index
    %c0_93 = arith.constant 0 : index
    %104 = vector.load %arg2[%c224_92, %c0_93] : memref<288x256xbf16, #tpu.memory_space<vmem>>, vector<64x256xbf16>
    %c3_94 = arith.constant 3 : index
    %c0_95 = arith.constant 0 : index
    %c0_96 = arith.constant 0 : index
    %105 = vector.load %arg3[%c3_94, %c0_95, %c0_96] : memref<4x256x128xbf16, #tpu.memory_space<vmem>>, vector<1x256x128xbf16>
    %106 = vector.shape_cast %105 : vector<1x256x128xbf16> to vector<256x128xbf16>
    %cst_97 = arith.constant dense<0.000000e+00> : vector<64x128xf32>
    %107 = tpu.matmul %104, %106, %cst_97 {dimension_numbers = #tpu.dot_dimension_numbers<[1], [0], [0], [1], [0, 0, 1, 1], [], []>} : vector<64x256xbf16>, vector<256x128xbf16>, vector<64x128xf32> -> vector<64x128xf32>
    %108 = arith.addf %103, %107 : vector<64x128xf32>
    %109 = vector.broadcast %0 : vector<1x128xf32> to vector<64x128xf32>
    %110 = arith.addf %108, %109 : vector<64x128xf32>
    %c192 = arith.constant 192 : index
    %c0_98 = arith.constant 0 : index
    %111 = vector.load %arg5[%c192, %c0_98] : memref<256x128xf32, #tpu.memory_space<vmem>>, vector<64x128xf32>
    tpu.vector_store %arg5[%c192, %c0_98], %110 {strides = array<i32>} : memref<256x128xf32, #tpu.memory_space<vmem>>, vector<64x128xf32>,
    %cst_99 = arith.constant dense<0.000000e+00> : vector<128xf32>
    %112 = vector.multi_reduction <add>, %110, %cst_99 [0] : vector<64x128xf32> to vector<128xf32>
    %113 = vector.shape_cast %112 : vector<128xf32> to vector<1x128xf32>
    %114 = arith.addf %85, %113 : vector<1x128xf32>
    %115 = arith.mulf %110, %110 : vector<64x128xf32>
    %cst_100 = arith.constant dense<0.000000e+00> : vector<128xf32>
    %116 = vector.multi_reduction <add>, %115, %cst_100 [0] : vector<64x128xf32> to vector<128xf32>
    %117 = vector.shape_cast %116 : vector<128xf32> to vector<1x128xf32>
    %118 = arith.addf %89, %117 : vector<1x128xf32>
    %c0_101 = arith.constant 0 : index
    %c0_102 = arith.constant 0 : index
    %119 = vector.load %arg6[%c0_101, %c0_102] : memref<8x128xf32, #tpu.memory_space<vmem>>, vector<1x128xf32>
    tpu.vector_store %arg6[%c0_101, %c0_102], %114 {strides = array<i32>} : memref<8x128xf32, #tpu.memory_space<vmem>>, vector<1x128xf32>,
    %c1_103 = arith.constant 1 : index
    %c0_104 = arith.constant 0 : index
    %120 = vector.load %arg6[%c1_103, %c0_104] : memref<8x128xf32, #tpu.memory_space<vmem>>, vector<1x128xf32>
    tpu.vector_store %arg6[%c1_103, %c0_104], %118 {strides = array<i32>} : memref<8x128xf32, #tpu.memory_space<vmem>>, vector<1x128xf32>,
    return
  }
  func.func @transform_0(%arg0: i32) -> (i32, i32) {
    %c0_i32 = arith.constant 0 : i32
    %c0_i32_0 = arith.constant 0 : i32
    return %arg0, %c0_i32 : i32, i32
  }
  func.func @transform_1(%arg0: i32) -> (i32, i32) {
    %c0_i32 = arith.constant 0 : i32
    %c0_i32_0 = arith.constant 0 : i32
    return %arg0, %c0_i32 : i32, i32
  }
  func.func @transform_2(%arg0: i32) -> (i32, i32, i32) {
    %c0_i32 = arith.constant 0 : i32
    %c0_i32_0 = arith.constant 0 : i32
    %c0_i32_1 = arith.constant 0 : i32
    %c0_i32_2 = arith.constant 0 : i32
    return %c0_i32, %c0_i32_0, %c0_i32_1 : i32, i32, i32
  }
  func.func @transform_3(%arg0: i32) -> (i32, i32) {
    %c0_i32 = arith.constant 0 : i32
    %c0_i32_0 = arith.constant 0 : i32
    %c0_i32_1 = arith.constant 0 : i32
    return %c0_i32, %c0_i32_0 : i32, i32
  }
  func.func @transform_4(%arg0: i32) -> (i32, i32) {
    %c0_i32 = arith.constant 0 : i32
    %c0_i32_0 = arith.constant 0 : i32
    return %arg0, %c0_i32 : i32, i32
  }
  func.func @transform_5(%arg0: i32) -> (i32, i32) {
    %c0_i32 = arith.constant 0 : i32
    %c0_i32_0 = arith.constant 0 : i32
    return %arg0, %c0_i32 : i32, i32
  }
}

module attributes {stable_mosaic.version = 11 : i64} {
  func.func @kernel(%arg0: i32, %arg1: memref<512x128xf32, #tpu.memory_space<vmem>>, %arg2: memref<1x128xf32, #tpu.memory_space<vmem>>, %arg3: memref<1x128xf32, #tpu.memory_space<vmem>>, %arg4: memref<64x128xf32, #tpu.memory_space<vmem>>, %arg5: memref<1x1xf32, #tpu.memory_space<vmem>>, %arg6: memref<8x128xf32, #tpu.memory_space<vmem>>) attributes {dimension_semantics = [#tpu.dimension_semantics<parallel>], iteration_bounds = array<i64: 1>, scalar_prefetch = 0 : i64, scratch_operands = 0 : i64, tpu.core_type = #tpu.core_type<tc>, window_params = [{transform_indices = @transform_0, window_bounds = array<i64: 512, 128>}, {pipeline_mode = #tpu.pipeline_mode<synchronous>, transform_indices = @transform_1, window_bounds = array<i64: 1, 128>}, {pipeline_mode = #tpu.pipeline_mode<synchronous>, transform_indices = @transform_2, window_bounds = array<i64: 1, 128>}, {pipeline_mode = #tpu.pipeline_mode<synchronous>, transform_indices = @transform_3, window_bounds = array<i64: 64, 128>}, {pipeline_mode = #tpu.pipeline_mode<synchronous>, transform_indices = @transform_4, window_bounds = array<i64: 1, 1>}, {transform_indices = @transform_5, window_bounds = array<i64: 8, 128>}]} {
    %c0 = arith.constant 0 : index
    %c0_0 = arith.constant 0 : index
    %0 = vector.load %arg2[%c0, %c0_0] : memref<1x128xf32, #tpu.memory_space<vmem>>, vector<1x128xf32>
    %c0_1 = arith.constant 0 : index
    %c0_2 = arith.constant 0 : index
    %1 = vector.load %arg3[%c0_1, %c0_2] : memref<1x128xf32, #tpu.memory_space<vmem>>, vector<1x128xf32>
    %c0_3 = arith.constant 0 : index
    %c0_4 = arith.constant 0 : index
    %2 = vector.load %arg4[%c0_3, %c0_4] : memref<64x128xf32, #tpu.memory_space<vmem>>, vector<64x128xf32>
    %c0_5 = arith.constant 0 : index
    %c0_6 = arith.constant 0 : index
    %3 = vector.load %arg5[%c0_5, %c0_6] : memref<1x1xf32, #tpu.memory_space<vmem>>, vector<1x1xf32>
    %c0_7 = arith.constant 0 : index
    %c0_8 = arith.constant 0 : index
    %4 = vector.load %arg1[%c0_7, %c0_8] : memref<512x128xf32, #tpu.memory_space<vmem>>, vector<64x128xf32>
    %5 = vector.broadcast %0 : vector<1x128xf32> to vector<64x128xf32>
    %6 = arith.mulf %4, %5 : vector<64x128xf32>
    %7 = vector.broadcast %1 : vector<1x128xf32> to vector<64x128xf32>
    %8 = arith.addf %6, %7 : vector<64x128xf32>
    %cst = arith.constant 0.000000e+00 : f32
    %9 = vector.broadcast %cst : f32 to vector<64x128xf32>
    %10 = arith.cmpf ogt, %8, %9 : vector<64x128xf32>
    %cst_9 = arith.constant 2.000000e-01 : f32
    %11 = vector.broadcast %cst_9 : f32 to vector<64x128xf32>
    %12 = arith.mulf %11, %8 : vector<64x128xf32>
    %13 = arith.select %10, %8, %12 : vector<64x128xi1>, vector<64x128xf32>
    %14 = arith.mulf %13, %2 : vector<64x128xf32>
    %cst_10 = arith.constant dense<0.000000e+00> : vector<128xf32>
    %15 = vector.multi_reduction <add>, %14, %cst_10 [0] : vector<64x128xf32> to vector<128xf32>
    %16 = vector.shape_cast %15 : vector<128xf32> to vector<1x128xf32>
    %cst_11 = arith.constant dense<0.000000e+00> : vector<1xf32>
    %17 = vector.multi_reduction <add>, %16, %cst_11 [1] : vector<1x128xf32> to vector<1xf32>
    %18 = vector.shape_cast %17 : vector<1xf32> to vector<1x1xf32>
    %19 = arith.addf %18, %3 : vector<1x1xf32>
    %20 = arith.negf %19 : vector<1x1xf32>
    %21 = math.exp %20 : vector<1x1xf32>
    %cst_12 = arith.constant 1.000000e+00 : f32
    %22 = vector.broadcast %cst_12 : f32 to vector<1x1xf32>
    %23 = arith.addf %22, %21 : vector<1x1xf32>
    %24 = arith.divf %22, %23 : vector<1x1xf32>
    %25 = vector.shape_cast %24 : vector<1x1xf32> to vector<1x1xf32>
    %26 = vector.broadcast %25 : vector<1x1xf32> to vector<1x128xf32>
    %c0_13 = arith.constant 0 : index
    %c0_14 = arith.constant 0 : index
    %27 = vector.load %arg6[%c0_13, %c0_14] : memref<8x128xf32, #tpu.memory_space<vmem>>, vector<1x128xf32>
    tpu.vector_store %arg6[%c0_13, %c0_14], %26 {strides = array<i32>} : memref<8x128xf32, #tpu.memory_space<vmem>>, vector<1x128xf32>,
    %c64 = arith.constant 64 : index
    %c0_15 = arith.constant 0 : index
    %28 = vector.load %arg1[%c64, %c0_15] : memref<512x128xf32, #tpu.memory_space<vmem>>, vector<64x128xf32>
    %29 = vector.broadcast %0 : vector<1x128xf32> to vector<64x128xf32>
    %30 = arith.mulf %28, %29 : vector<64x128xf32>
    %31 = vector.broadcast %1 : vector<1x128xf32> to vector<64x128xf32>
    %32 = arith.addf %30, %31 : vector<64x128xf32>
    %cst_16 = arith.constant 0.000000e+00 : f32
    %33 = vector.broadcast %cst_16 : f32 to vector<64x128xf32>
    %34 = arith.cmpf ogt, %32, %33 : vector<64x128xf32>
    %cst_17 = arith.constant 2.000000e-01 : f32
    %35 = vector.broadcast %cst_17 : f32 to vector<64x128xf32>
    %36 = arith.mulf %35, %32 : vector<64x128xf32>
    %37 = arith.select %34, %32, %36 : vector<64x128xi1>, vector<64x128xf32>
    %38 = arith.mulf %37, %2 : vector<64x128xf32>
    %cst_18 = arith.constant dense<0.000000e+00> : vector<128xf32>
    %39 = vector.multi_reduction <add>, %38, %cst_18 [0] : vector<64x128xf32> to vector<128xf32>
    %40 = vector.shape_cast %39 : vector<128xf32> to vector<1x128xf32>
    %cst_19 = arith.constant dense<0.000000e+00> : vector<1xf32>
    %41 = vector.multi_reduction <add>, %40, %cst_19 [1] : vector<1x128xf32> to vector<1xf32>
    %42 = vector.shape_cast %41 : vector<1xf32> to vector<1x1xf32>
    %43 = arith.addf %42, %3 : vector<1x1xf32>
    %44 = arith.negf %43 : vector<1x1xf32>
    %45 = math.exp %44 : vector<1x1xf32>
    %cst_20 = arith.constant 1.000000e+00 : f32
    %46 = vector.broadcast %cst_20 : f32 to vector<1x1xf32>
    %47 = arith.addf %46, %45 : vector<1x1xf32>
    %48 = arith.divf %46, %47 : vector<1x1xf32>
    %49 = vector.shape_cast %48 : vector<1x1xf32> to vector<1x1xf32>
    %50 = vector.broadcast %49 : vector<1x1xf32> to vector<1x128xf32>
    %c1 = arith.constant 1 : index
    %c0_21 = arith.constant 0 : index
    %51 = vector.load %arg6[%c1, %c0_21] : memref<8x128xf32, #tpu.memory_space<vmem>>, vector<1x128xf32>
    tpu.vector_store %arg6[%c1, %c0_21], %50 {strides = array<i32>} : memref<8x128xf32, #tpu.memory_space<vmem>>, vector<1x128xf32>,
    %c128 = arith.constant 128 : index
    %c0_22 = arith.constant 0 : index
    %52 = vector.load %arg1[%c128, %c0_22] : memref<512x128xf32, #tpu.memory_space<vmem>>, vector<64x128xf32>
    %53 = vector.broadcast %0 : vector<1x128xf32> to vector<64x128xf32>
    %54 = arith.mulf %52, %53 : vector<64x128xf32>
    %55 = vector.broadcast %1 : vector<1x128xf32> to vector<64x128xf32>
    %56 = arith.addf %54, %55 : vector<64x128xf32>
    %cst_23 = arith.constant 0.000000e+00 : f32
    %57 = vector.broadcast %cst_23 : f32 to vector<64x128xf32>
    %58 = arith.cmpf ogt, %56, %57 : vector<64x128xf32>
    %cst_24 = arith.constant 2.000000e-01 : f32
    %59 = vector.broadcast %cst_24 : f32 to vector<64x128xf32>
    %60 = arith.mulf %59, %56 : vector<64x128xf32>
    %61 = arith.select %58, %56, %60 : vector<64x128xi1>, vector<64x128xf32>
    %62 = arith.mulf %61, %2 : vector<64x128xf32>
    %cst_25 = arith.constant dense<0.000000e+00> : vector<128xf32>
    %63 = vector.multi_reduction <add>, %62, %cst_25 [0] : vector<64x128xf32> to vector<128xf32>
    %64 = vector.shape_cast %63 : vector<128xf32> to vector<1x128xf32>
    %cst_26 = arith.constant dense<0.000000e+00> : vector<1xf32>
    %65 = vector.multi_reduction <add>, %64, %cst_26 [1] : vector<1x128xf32> to vector<1xf32>
    %66 = vector.shape_cast %65 : vector<1xf32> to vector<1x1xf32>
    %67 = arith.addf %66, %3 : vector<1x1xf32>
    %68 = arith.negf %67 : vector<1x1xf32>
    %69 = math.exp %68 : vector<1x1xf32>
    %cst_27 = arith.constant 1.000000e+00 : f32
    %70 = vector.broadcast %cst_27 : f32 to vector<1x1xf32>
    %71 = arith.addf %70, %69 : vector<1x1xf32>
    %72 = arith.divf %70, %71 : vector<1x1xf32>
    %73 = vector.shape_cast %72 : vector<1x1xf32> to vector<1x1xf32>
    %74 = vector.broadcast %73 : vector<1x1xf32> to vector<1x128xf32>
    %c2 = arith.constant 2 : index
    %c0_28 = arith.constant 0 : index
    %75 = vector.load %arg6[%c2, %c0_28] : memref<8x128xf32, #tpu.memory_space<vmem>>, vector<1x128xf32>
    tpu.vector_store %arg6[%c2, %c0_28], %74 {strides = array<i32>} : memref<8x128xf32, #tpu.memory_space<vmem>>, vector<1x128xf32>,
    %c192 = arith.constant 192 : index
    %c0_29 = arith.constant 0 : index
    %76 = vector.load %arg1[%c192, %c0_29] : memref<512x128xf32, #tpu.memory_space<vmem>>, vector<64x128xf32>
    %77 = vector.broadcast %0 : vector<1x128xf32> to vector<64x128xf32>
    %78 = arith.mulf %76, %77 : vector<64x128xf32>
    %79 = vector.broadcast %1 : vector<1x128xf32> to vector<64x128xf32>
    %80 = arith.addf %78, %79 : vector<64x128xf32>
    %cst_30 = arith.constant 0.000000e+00 : f32
    %81 = vector.broadcast %cst_30 : f32 to vector<64x128xf32>
    %82 = arith.cmpf ogt, %80, %81 : vector<64x128xf32>
    %cst_31 = arith.constant 2.000000e-01 : f32
    %83 = vector.broadcast %cst_31 : f32 to vector<64x128xf32>
    %84 = arith.mulf %83, %80 : vector<64x128xf32>
    %85 = arith.select %82, %80, %84 : vector<64x128xi1>, vector<64x128xf32>
    %86 = arith.mulf %85, %2 : vector<64x128xf32>
    %cst_32 = arith.constant dense<0.000000e+00> : vector<128xf32>
    %87 = vector.multi_reduction <add>, %86, %cst_32 [0] : vector<64x128xf32> to vector<128xf32>
    %88 = vector.shape_cast %87 : vector<128xf32> to vector<1x128xf32>
    %cst_33 = arith.constant dense<0.000000e+00> : vector<1xf32>
    %89 = vector.multi_reduction <add>, %88, %cst_33 [1] : vector<1x128xf32> to vector<1xf32>
    %90 = vector.shape_cast %89 : vector<1xf32> to vector<1x1xf32>
    %91 = arith.addf %90, %3 : vector<1x1xf32>
    %92 = arith.negf %91 : vector<1x1xf32>
    %93 = math.exp %92 : vector<1x1xf32>
    %cst_34 = arith.constant 1.000000e+00 : f32
    %94 = vector.broadcast %cst_34 : f32 to vector<1x1xf32>
    %95 = arith.addf %94, %93 : vector<1x1xf32>
    %96 = arith.divf %94, %95 : vector<1x1xf32>
    %97 = vector.shape_cast %96 : vector<1x1xf32> to vector<1x1xf32>
    %98 = vector.broadcast %97 : vector<1x1xf32> to vector<1x128xf32>
    %c3 = arith.constant 3 : index
    %c0_35 = arith.constant 0 : index
    %99 = vector.load %arg6[%c3, %c0_35] : memref<8x128xf32, #tpu.memory_space<vmem>>, vector<1x128xf32>
    tpu.vector_store %arg6[%c3, %c0_35], %98 {strides = array<i32>} : memref<8x128xf32, #tpu.memory_space<vmem>>, vector<1x128xf32>,
    %c256 = arith.constant 256 : index
    %c0_36 = arith.constant 0 : index
    %100 = vector.load %arg1[%c256, %c0_36] : memref<512x128xf32, #tpu.memory_space<vmem>>, vector<64x128xf32>
    %101 = vector.broadcast %0 : vector<1x128xf32> to vector<64x128xf32>
    %102 = arith.mulf %100, %101 : vector<64x128xf32>
    %103 = vector.broadcast %1 : vector<1x128xf32> to vector<64x128xf32>
    %104 = arith.addf %102, %103 : vector<64x128xf32>
    %cst_37 = arith.constant 0.000000e+00 : f32
    %105 = vector.broadcast %cst_37 : f32 to vector<64x128xf32>
    %106 = arith.cmpf ogt, %104, %105 : vector<64x128xf32>
    %cst_38 = arith.constant 2.000000e-01 : f32
    %107 = vector.broadcast %cst_38 : f32 to vector<64x128xf32>
    %108 = arith.mulf %107, %104 : vector<64x128xf32>
    %109 = arith.select %106, %104, %108 : vector<64x128xi1>, vector<64x128xf32>
    %110 = arith.mulf %109, %2 : vector<64x128xf32>
    %cst_39 = arith.constant dense<0.000000e+00> : vector<128xf32>
    %111 = vector.multi_reduction <add>, %110, %cst_39 [0] : vector<64x128xf32> to vector<128xf32>
    %112 = vector.shape_cast %111 : vector<128xf32> to vector<1x128xf32>
    %cst_40 = arith.constant dense<0.000000e+00> : vector<1xf32>
    %113 = vector.multi_reduction <add>, %112, %cst_40 [1] : vector<1x128xf32> to vector<1xf32>
    %114 = vector.shape_cast %113 : vector<1xf32> to vector<1x1xf32>
    %115 = arith.addf %114, %3 : vector<1x1xf32>
    %116 = arith.negf %115 : vector<1x1xf32>
    %117 = math.exp %116 : vector<1x1xf32>
    %cst_41 = arith.constant 1.000000e+00 : f32
    %118 = vector.broadcast %cst_41 : f32 to vector<1x1xf32>
    %119 = arith.addf %118, %117 : vector<1x1xf32>
    %120 = arith.divf %118, %119 : vector<1x1xf32>
    %121 = vector.shape_cast %120 : vector<1x1xf32> to vector<1x1xf32>
    %122 = vector.broadcast %121 : vector<1x1xf32> to vector<1x128xf32>
    %c4 = arith.constant 4 : index
    %c0_42 = arith.constant 0 : index
    %123 = vector.load %arg6[%c4, %c0_42] : memref<8x128xf32, #tpu.memory_space<vmem>>, vector<1x128xf32>
    tpu.vector_store %arg6[%c4, %c0_42], %122 {strides = array<i32>} : memref<8x128xf32, #tpu.memory_space<vmem>>, vector<1x128xf32>,
    %c320 = arith.constant 320 : index
    %c0_43 = arith.constant 0 : index
    %124 = vector.load %arg1[%c320, %c0_43] : memref<512x128xf32, #tpu.memory_space<vmem>>, vector<64x128xf32>
    %125 = vector.broadcast %0 : vector<1x128xf32> to vector<64x128xf32>
    %126 = arith.mulf %124, %125 : vector<64x128xf32>
    %127 = vector.broadcast %1 : vector<1x128xf32> to vector<64x128xf32>
    %128 = arith.addf %126, %127 : vector<64x128xf32>
    %cst_44 = arith.constant 0.000000e+00 : f32
    %129 = vector.broadcast %cst_44 : f32 to vector<64x128xf32>
    %130 = arith.cmpf ogt, %128, %129 : vector<64x128xf32>
    %cst_45 = arith.constant 2.000000e-01 : f32
    %131 = vector.broadcast %cst_45 : f32 to vector<64x128xf32>
    %132 = arith.mulf %131, %128 : vector<64x128xf32>
    %133 = arith.select %130, %128, %132 : vector<64x128xi1>, vector<64x128xf32>
    %134 = arith.mulf %133, %2 : vector<64x128xf32>
    %cst_46 = arith.constant dense<0.000000e+00> : vector<128xf32>
    %135 = vector.multi_reduction <add>, %134, %cst_46 [0] : vector<64x128xf32> to vector<128xf32>
    %136 = vector.shape_cast %135 : vector<128xf32> to vector<1x128xf32>
    %cst_47 = arith.constant dense<0.000000e+00> : vector<1xf32>
    %137 = vector.multi_reduction <add>, %136, %cst_47 [1] : vector<1x128xf32> to vector<1xf32>
    %138 = vector.shape_cast %137 : vector<1xf32> to vector<1x1xf32>
    %139 = arith.addf %138, %3 : vector<1x1xf32>
    %140 = arith.negf %139 : vector<1x1xf32>
    %141 = math.exp %140 : vector<1x1xf32>
    %cst_48 = arith.constant 1.000000e+00 : f32
    %142 = vector.broadcast %cst_48 : f32 to vector<1x1xf32>
    %143 = arith.addf %142, %141 : vector<1x1xf32>
    %144 = arith.divf %142, %143 : vector<1x1xf32>
    %145 = vector.shape_cast %144 : vector<1x1xf32> to vector<1x1xf32>
    %146 = vector.broadcast %145 : vector<1x1xf32> to vector<1x128xf32>
    %c5 = arith.constant 5 : index
    %c0_49 = arith.constant 0 : index
    %147 = vector.load %arg6[%c5, %c0_49] : memref<8x128xf32, #tpu.memory_space<vmem>>, vector<1x128xf32>
    tpu.vector_store %arg6[%c5, %c0_49], %146 {strides = array<i32>} : memref<8x128xf32, #tpu.memory_space<vmem>>, vector<1x128xf32>,
    %c384 = arith.constant 384 : index
    %c0_50 = arith.constant 0 : index
    %148 = vector.load %arg1[%c384, %c0_50] : memref<512x128xf32, #tpu.memory_space<vmem>>, vector<64x128xf32>
    %149 = vector.broadcast %0 : vector<1x128xf32> to vector<64x128xf32>
    %150 = arith.mulf %148, %149 : vector<64x128xf32>
    %151 = vector.broadcast %1 : vector<1x128xf32> to vector<64x128xf32>
    %152 = arith.addf %150, %151 : vector<64x128xf32>
    %cst_51 = arith.constant 0.000000e+00 : f32
    %153 = vector.broadcast %cst_51 : f32 to vector<64x128xf32>
    %154 = arith.cmpf ogt, %152, %153 : vector<64x128xf32>
    %cst_52 = arith.constant 2.000000e-01 : f32
    %155 = vector.broadcast %cst_52 : f32 to vector<64x128xf32>
    %156 = arith.mulf %155, %152 : vector<64x128xf32>
    %157 = arith.select %154, %152, %156 : vector<64x128xi1>, vector<64x128xf32>
    %158 = arith.mulf %157, %2 : vector<64x128xf32>
    %cst_53 = arith.constant dense<0.000000e+00> : vector<128xf32>
    %159 = vector.multi_reduction <add>, %158, %cst_53 [0] : vector<64x128xf32> to vector<128xf32>
    %160 = vector.shape_cast %159 : vector<128xf32> to vector<1x128xf32>
    %cst_54 = arith.constant dense<0.000000e+00> : vector<1xf32>
    %161 = vector.multi_reduction <add>, %160, %cst_54 [1] : vector<1x128xf32> to vector<1xf32>
    %162 = vector.shape_cast %161 : vector<1xf32> to vector<1x1xf32>
    %163 = arith.addf %162, %3 : vector<1x1xf32>
    %164 = arith.negf %163 : vector<1x1xf32>
    %165 = math.exp %164 : vector<1x1xf32>
    %cst_55 = arith.constant 1.000000e+00 : f32
    %166 = vector.broadcast %cst_55 : f32 to vector<1x1xf32>
    %167 = arith.addf %166, %165 : vector<1x1xf32>
    %168 = arith.divf %166, %167 : vector<1x1xf32>
    %169 = vector.shape_cast %168 : vector<1x1xf32> to vector<1x1xf32>
    %170 = vector.broadcast %169 : vector<1x1xf32> to vector<1x128xf32>
    %c6 = arith.constant 6 : index
    %c0_56 = arith.constant 0 : index
    %171 = vector.load %arg6[%c6, %c0_56] : memref<8x128xf32, #tpu.memory_space<vmem>>, vector<1x128xf32>
    tpu.vector_store %arg6[%c6, %c0_56], %170 {strides = array<i32>} : memref<8x128xf32, #tpu.memory_space<vmem>>, vector<1x128xf32>,
    %c448 = arith.constant 448 : index
    %c0_57 = arith.constant 0 : index
    %172 = vector.load %arg1[%c448, %c0_57] : memref<512x128xf32, #tpu.memory_space<vmem>>, vector<64x128xf32>
    %173 = vector.broadcast %0 : vector<1x128xf32> to vector<64x128xf32>
    %174 = arith.mulf %172, %173 : vector<64x128xf32>
    %175 = vector.broadcast %1 : vector<1x128xf32> to vector<64x128xf32>
    %176 = arith.addf %174, %175 : vector<64x128xf32>
    %cst_58 = arith.constant 0.000000e+00 : f32
    %177 = vector.broadcast %cst_58 : f32 to vector<64x128xf32>
    %178 = arith.cmpf ogt, %176, %177 : vector<64x128xf32>
    %cst_59 = arith.constant 2.000000e-01 : f32
    %179 = vector.broadcast %cst_59 : f32 to vector<64x128xf32>
    %180 = arith.mulf %179, %176 : vector<64x128xf32>
    %181 = arith.select %178, %176, %180 : vector<64x128xi1>, vector<64x128xf32>
    %182 = arith.mulf %181, %2 : vector<64x128xf32>
    %cst_60 = arith.constant dense<0.000000e+00> : vector<128xf32>
    %183 = vector.multi_reduction <add>, %182, %cst_60 [0] : vector<64x128xf32> to vector<128xf32>
    %184 = vector.shape_cast %183 : vector<128xf32> to vector<1x128xf32>
    %cst_61 = arith.constant dense<0.000000e+00> : vector<1xf32>
    %185 = vector.multi_reduction <add>, %184, %cst_61 [1] : vector<1x128xf32> to vector<1xf32>
    %186 = vector.shape_cast %185 : vector<1xf32> to vector<1x1xf32>
    %187 = arith.addf %186, %3 : vector<1x1xf32>
    %188 = arith.negf %187 : vector<1x1xf32>
    %189 = math.exp %188 : vector<1x1xf32>
    %cst_62 = arith.constant 1.000000e+00 : f32
    %190 = vector.broadcast %cst_62 : f32 to vector<1x1xf32>
    %191 = arith.addf %190, %189 : vector<1x1xf32>
    %192 = arith.divf %190, %191 : vector<1x1xf32>
    %193 = vector.shape_cast %192 : vector<1x1xf32> to vector<1x1xf32>
    %194 = vector.broadcast %193 : vector<1x1xf32> to vector<1x128xf32>
    %c7 = arith.constant 7 : index
    %c0_63 = arith.constant 0 : index
    %195 = vector.load %arg6[%c7, %c0_63] : memref<8x128xf32, #tpu.memory_space<vmem>>, vector<1x128xf32>
    tpu.vector_store %arg6[%c7, %c0_63], %194 {strides = array<i32>} : memref<8x128xf32, #tpu.memory_space<vmem>>, vector<1x128xf32>,
    return
  }
  func.func @transform_0(%arg0: i32) -> (i32, i32) {
    %c0_i32 = arith.constant 0 : i32
    %c0_i32_0 = arith.constant 0 : i32
    return %arg0, %c0_i32 : i32, i32
  }
  func.func @transform_1(%arg0: i32) -> (i32, i32) {
    %c0_i32 = arith.constant 0 : i32
    %c0_i32_0 = arith.constant 0 : i32
    %c0_i32_1 = arith.constant 0 : i32
    return %c0_i32, %c0_i32_0 : i32, i32
  }
  func.func @transform_2(%arg0: i32) -> (i32, i32) {
    %c0_i32 = arith.constant 0 : i32
    %c0_i32_0 = arith.constant 0 : i32
    %c0_i32_1 = arith.constant 0 : i32
    return %c0_i32, %c0_i32_0 : i32, i32
  }
  func.func @transform_3(%arg0: i32) -> (i32, i32) {
    %c0_i32 = arith.constant 0 : i32
    %c0_i32_0 = arith.constant 0 : i32
    %c0_i32_1 = arith.constant 0 : i32
    return %c0_i32, %c0_i32_0 : i32, i32
  }
  func.func @transform_4(%arg0: i32) -> (i32, i32) {
    %c0_i32 = arith.constant 0 : i32
    %c0_i32_0 = arith.constant 0 : i32
    %c0_i32_1 = arith.constant 0 : i32
    return %c0_i32, %c0_i32_0 : i32, i32
  }
  func.func @transform_5(%arg0: i32) -> (i32, i32) {
    %c0_i32 = arith.constant 0 : i32
    %c0_i32_0 = arith.constant 0 : i32
    return %arg0, %c0_i32 : i32, i32
  }
}

</mosaic_0001>

<bundles_post_ra>
// kernel: discriminator_forward.3
= control target key start
LH: loop header
LB: loop body
LE: loop exit
PB: predicated region body
PF: predicated region fallthrough
CT: control target
= control target key end

     0   :  { %s1256_s12 = smov 0   ;;  %s1457_s0 = inlined_call_operand.vmem [shape: bf16[512,64], index: 0, kind: input, shape index: {}]   ;;  %s1458_s1 = inlined_call_operand.vmem [shape: bf16[64,256], index: 1, kind: input, shape index: {}]   ;;  %s1459_s2 = inlined_call_operand.vmem [shape: f32[1,256], index: 2, kind: input, shape index: {}]   ;;  %s1460_s3 = inlined_call_operand.vmem [shape: bf16[512,256], index: 3, kind: output, shape index: {}]  }
   0x1 LB: > { %s1065_s13 = sadd.s32 4294967295, %s1233_s12   ;;  %p1069_p0 = scmp.ge.s32.totalorder %s1233_s12, 1  ;;  %s1233_s12 = sphi %s1256_s12, %s13_s12  }
   0x2   : > { %p138_p1 = scmp.lt.s32.totalorder %s1233_s12, 3 }
   0x4   : > { %p139_p2 = pnand %p1069_p0, %p138_p1 }
   0x5   : > { %s1070_s16 = sshll.u32 (!%p139_p2), %s1065_s13, 5 }
   0x6   : > { %142 = sbr.rel (%p139_p2) target bundleno = 300 (0x12c), region = 32  ;;  %p164_p3 = scmp.lt.s32.totalorder (!%p139_p2), %s1070_s16, 63 }
   0xb   : > { %v1199_v0 = vld [vmem:[%s1458_s1 + $0x34] ss:$8 sps:$4 sm:$0xff]   ;;  %v1201_v1 = vld [vmem:[%s1458_s1 + $0x30] ss:$8 sps:$4 sm:$0xff]   ;;  %v1235_v2 = vmov 0   ;;  %s1462_s16 = smov (!%p164_p3, %s1070_s16), 63  ;;  %v219_v25 = vlaneseq }
   0xc   : > { %430 = vmatprep.mubr.bf16.mxu0 %v1235_v2  ;;  %510 = vmatprep.mubr.bf16.mxu1 %v1235_v2  ;;  %v1202_v3 = vld [vmem:[%s1458_s1 + $0x24] ss:$8 sps:$4 sm:$0xff]   ;;  %v1204_v4 = vld [vmem:[%s1458_s1 + $0x20] ss:$8 sps:$4 sm:$0xff]   ;;  %v1205_v5 = vld [vmem:[%s1458_s1 + $0x14] ss:$8 sps:$4 sm:$0xff]  }
   0xd   : > { %406 = vmatprep.subr.bf16.mxu0 %v1199_v0  ;;  %1182 = vmatprep.subr.bf16.mxu1 %v1199_v0  ;;  %s1071_s25 = sshll.u32 %s1462_s16, 2  ;;  %v1207_v6 = vld [vmem:[%s1458_s1 + $0x10] ss:$8 sps:$4 sm:$0xff]   ;;  %v1208_v7 = vld [vmem:[%s1458_s1 + $0x4] ss:$8 sps:$4 sm:$0xff]   ;;  %vm349_vm0 = vcmask 523264  }
   0xe   : > { %407 = vmatpush1.bf16.msra.mxu0 %v1201_v1  ;;  %1186 = vmatpush1.bf16.msra.mxu1 %v1201_v1  ;;  %s1287_s28 = scalar_lea.vmem %s1457_s0, %s1071_s25  ;;  %v1210_v8 = vld [vmem:[%s1458_s1] ss:$8 sps:$4 sm:$0xff]   ;;  %v220_v26 = vshrl.u32 %v219_v25, 7  ;;  %s1149_s10 = sshll.u32 %s1462_s16, 3 }
   0xf   : > { %408 = vmatprep.subr.bf16.mxu0 %v1202_v3  ;;  %1183 = vmatprep.subr.bf16.mxu1 %v1202_v3  ;;  %v1211_v9 = vld [vmem:[%s1287_s28] sm:$0xff]   ;;  %v1213_v11 = vld [vmem:[%s1287_s28 + $0x8] sm:$0xff]   ;;  %v1215_v13 = vld [vmem:[%s1287_s28 + $0x10] sm:$0xff]   ;;  %s1361_s14 = scalar_lea.vmem %s1460_s3, %s1149_s10 }
  0x10   : > { %v1212_v10 = vld [vmem:[%s1287_s28 + $0x40] sm:$0xff]   ;;  %v1214_v12 = vld [vmem:[%s1287_s28 + $0x48] sm:$0xff]   ;;  %v1216_v14 = vld [vmem:[%s1287_s28 + $0x50] sm:$0xff]   ;;  %v221_v27 = vsub.s32 0, %v220_v26  ;;  %v225_v29 = vsub.s32 1, %v220_v26 }
  0x11   : > { %v1217_v15 = vld [vmem:[%s1287_s28 + $0x18] sm:$0xff]   ;;  %v1219_v17 = vld [vmem:[%s1287_s28 + $0x20] sm:$0xff]   ;;  %v1221_v19 = vld [vmem:[%s1287_s28 + $0x28] sm:$0xff]  }
  0x12   : > { %409 = vmatpush1.bf16.msra.mxu0 %v1204_v4  ;;  %1187 = vmatpush1.bf16.msra.mxu1 %v1204_v4  ;;  %v1218_v16 = vld [vmem:[%s1287_s28 + $0x58] sm:$0xff]   ;;  %v1220_v18 = vld [vmem:[%s1287_s28 + $0x60] sm:$0xff]   ;;  %v1222_v20 = vld [vmem:[%s1287_s28 + $0x68] sm:$0xff]  }
  0x13   : > { %410 = vmatprep.subr.bf16.mxu0 %v1205_v5  ;;  %1184 = vmatprep.subr.bf16.mxu1 %v1205_v5  ;;  %v1223_v21 = vld [vmem:[%s1287_s28 + $0x30] sm:$0xff]   ;;  %v1225_v23 = vld [vmem:[%s1287_s28 + $0x38] sm:$0xff]   ;;  %v217_v28 = vld [vmem:[%s1459_s2] sm:$0x3] }
  0x14   : > { %v1224_v22 = vld [vmem:[%s1287_s28 + $0x70] sm:$0xff]   ;;  %v1226_v24 = vld [vmem:[%s1287_s28 + $0x78] sm:$0xff]   ;;  %v1347_v30 = vrot.slane %v217_v28, %v221_v27  ;;  %v1349_v33 = vrot.slane %v217_v28, %v225_v29 }
  0x16   : > { %411 = vmatpush1.bf16.msra.mxu0 %v1207_v6  ;;  %1188 = vmatpush1.bf16.msra.mxu1 %v1207_v6 }
  0x17   : > { %412 = vmatprep.subr.bf16.mxu0 %v1208_v7  ;;  %1185 = vmatprep.subr.bf16.mxu1 %v1208_v7 }
  0x1a   : > { %413 = vmatpush1.bf16.msra.mxu0 %v1210_v8  ;;  %1189 = vmatpush1.bf16.msra.mxu1 %v1210_v8 }
  0x1d   : > { %1099 = vmatmul.mubr.msk.bf16.vlgmr.msra.gmra.mxu0 %vm349_vm0, %v1211_v9  ;;  %1107 = vmatmul.mubr.msk.bf16.vlgmr.msra.gmra.mxu1 %vm349_vm0, %v1212_v10 }
  0x1e   : > { %440 = vmatprep.mubr.bf16.mxu0 %v1235_v2  ;;  %520 = vmatprep.mubr.bf16.mxu1 %v1235_v2 }
  0x25   : > { %1100 = vmatmul.mubr.msk.bf16.gmra.mxu0 %vm349_vm0, %v1213_v11  ;;  %1108 = vmatmul.mubr.msk.bf16.gmra.mxu1 %vm349_vm0, %v1214_v12 }
  0x26   : > { %450 = vmatprep.mubr.bf16.mxu0 %v1235_v2  ;;  %530 = vmatprep.mubr.bf16.mxu1 %v1235_v2 }
  0x2d   : > { %1101 = vmatmul.mubr.msk.bf16.gmra.mxu0 %vm349_vm0, %v1215_v13  ;;  %1109 = vmatmul.mubr.msk.bf16.gmra.mxu1 %vm349_vm0, %v1216_v14 }
  0x2e   : > { %460 = vmatprep.mubr.bf16.mxu0 %v1235_v2  ;;  %540 = vmatprep.mubr.bf16.mxu1 %v1235_v2 }
  0x35   : > { %1102 = vmatmul.mubr.msk.bf16.gmra.mxu0 %vm349_vm0, %v1217_v15  ;;  %1110 = vmatmul.mubr.msk.bf16.gmra.mxu1 %vm349_vm0, %v1218_v16 }
  0x36   : > { %470 = vmatprep.mubr.bf16.mxu0 %v1235_v2  ;;  %550 = vmatprep.mubr.bf16.mxu1 %v1235_v2 }
  0x3d   : > { %1103 = vmatmul.mubr.msk.bf16.gmra.mxu0 %vm349_vm0, %v1219_v17  ;;  %1111 = vmatmul.mubr.msk.bf16.gmra.mxu1 %vm349_vm0, %v1220_v18 }
  0x3e   : > { %480 = vmatprep.mubr.bf16.mxu0 %v1235_v2  ;;  %560 = vmatprep.mubr.bf16.mxu1 %v1235_v2 }
  0x45   : > { %1104 = vmatmul.mubr.msk.bf16.gmra.mxu0 %vm349_vm0, %v1221_v19  ;;  %1112 = vmatmul.mubr.msk.bf16.gmra.mxu1 %vm349_vm0, %v1222_v20 }
  0x46   : > { %490 = vmatprep.mubr.bf16.mxu0 %v1235_v2  ;;  %570 = vmatprep.mubr.bf16.mxu1 %v1235_v2 }
  0x4d   : > { %1105 = vmatmul.mubr.msk.bf16.gmra.mxu0 %vm349_vm0, %v1223_v21  ;;  %1113 = vmatmul.mubr.msk.bf16.gmra.mxu1 %vm349_vm0, %v1224_v22 }
  0x4e   : > { %500 = vmatprep.mubr.bf16.mxu0 %v1235_v2  ;;  %580 = vmatprep.mubr.bf16.mxu1 %v1235_v2 }
  0x55   : > { %1106 = vmatmul.mubr.msk.bf16.gmra.mxu0 %vm349_vm0, %v1225_v23  ;;  %1114 = vmatmul.mubr.msk.bf16.gmra.mxu1 %vm349_vm0, %v1226_v24 }
  0xdd   : > { %v432_v31 = vpop.f32.mrf.mxu0  ;;  %v512_v32 = vpop.f32.mrf.mxu1 }
  0xde   : > { %v433_v34 = vadd.f32 %v432_v31, %v1347_v30  ;;  %v513_v35 = vadd.f32 %v512_v32, %v1347_v30 }
  0xdf   : > { %v434_v36 = vpop.f32.mrf.mxu0  ;;  %v514_v37 = vpop.f32.mrf.mxu1 }
  0xe0   : > { %v655_v38 = vmul.f32 0.2, %v433_v34  ;;  %v687_v39 = vmul.f32 0.2, %v513_v35  ;;  %vm591_vm1 = vcmp.gt.f32.partialorder %v433_v34, 0.0  ;;  %vm623_vm2 = vcmp.gt.f32.partialorder %v513_v35, 0.0 }
  0xe1   : > { %v435_v40 = vadd.f32 %v434_v36, %v1349_v33  ;;  %v515_v41 = vadd.f32 %v514_v37, %v1349_v33  ;;  %v436_v42 = vpop.f32.mrf.mxu0  ;;  %v516_v43 = vpop.f32.mrf.mxu1 }
  0xe2   : > { %v437_v44 = vadd.f32 %v436_v42, %v1347_v30  ;;  %v517_v45 = vadd.f32 %v516_v43, %v1347_v30  ;;  %v719_v50 = vsel %vm591_vm1, %v433_v34, %v655_v38  ;;  %v751_v51 = vsel %vm623_vm2, %v513_v35, %v687_v39 }
  0xe3   : > { %vm592_vm3 = vcmp.gt.f32.partialorder %v435_v40, 0.0  ;;  %v656_v46 = vmul.f32 0.2, %v435_v40  ;;  %vm624_vm4 = vcmp.gt.f32.partialorder %v515_v41, 0.0  ;;  %v688_v47 = vmul.f32 0.2, %v515_v41  ;;  %v438_v48 = vpop.f32.mrf.mxu0  ;;  %v518_v49 = vpop.f32.mrf.mxu1 }
  0xe4   : > { %v657_v52 = vmul.f32 0.2, %v437_v44  ;;  %v689_v53 = vmul.f32 0.2, %v517_v45  ;;  %v439_v56 = vadd.f32 %v438_v48, %v1349_v33  ;;  %v519_v57 = vadd.f32 %v518_v49, %v1349_v33 }
  0xe5   : > { %v720_v54 = vsel %vm592_vm3, %v435_v40, %v656_v46  ;;  %v752_v55 = vsel %vm624_vm4, %v515_v41, %v688_v47  ;;  %v442_v58 = vpop.f32.mrf.mxu0  ;;  %v522_v59 = vpop.f32.mrf.mxu1  ;;  %vm593_vm5 = vcmp.gt.f32.partialorder %v437_v44, 0.0  ;;  %vm625_vm6 = vcmp.gt.f32.partialorder %v517_v45, 0.0 }
  0xe6   : > { %v1150_v60 = vpack.c.bf16 %v720_v54, %v719_v50  ;;  %v1166_v61 = vpack.c.bf16 %v752_v55, %v751_v51  ;;  %vm594_vm7 = vcmp.gt.f32.partialorder %v439_v56, 0.0  ;;  %v658_v62 = vmul.f32 0.2, %v439_v56 }
  0xe7   : > { %vm626_vm8 = vcmp.gt.f32.partialorder %v519_v57, 0.0  ;;  %v690_v63 = vmul.f32 0.2, %v519_v57  ;;  %v444_v0 = vpop.f32.mrf.mxu0  ;;  %v524_v1 = vpop.f32.mrf.mxu1  ;;  %v443_v2 = vadd.f32 %v442_v58, %v1347_v30  ;;  %v523_v3 = vadd.f32 %v522_v59, %v1347_v30 }
  0xe8   : > { %975 = vst [vmem:[%s1361_s14] sm:$0xff] %v1150_v60  ;;  %991 = vst [vmem:[%s1361_s14 + $0x80] sm:$0xff] %v1166_v61  ;;  %v445_v4 = vadd.f32 %v444_v0, %v1349_v33  ;;  %v525_v5 = vadd.f32 %v524_v1, %v1349_v33  ;;  %v721_v6 = vsel %vm593_vm5, %v437_v44, %v657_v52 }
  0xe9   : > { %v753_v7 = vsel %vm625_vm6, %v517_v45, %v689_v53  ;;  %v722_v8 = vsel %vm594_vm7, %v439_v56, %v658_v62  ;;  %v754_v9 = vsel %vm626_vm8, %v519_v57, %v690_v63  ;;  %v446_v10 = vpop.f32.mrf.mxu0  ;;  %v526_v11 = vpop.f32.mrf.mxu1  ;;  %vm595_vm9 = vcmp.gt.f32.partialorder %v443_v2, 0.0 }
  0xea   : > { %v1151_v12 = vpack.c.bf16 %v722_v8, %v721_v6  ;;  %v1167_v13 = vpack.c.bf16 %v754_v9, %v753_v7  ;;  %v659_v14 = vmul.f32 0.2, %v443_v2  ;;  %vm627_vm10 = vcmp.gt.f32.partialorder %v523_v3, 0.0 }
  0xeb   : > { %v691_v15 = vmul.f32 0.2, %v523_v3  ;;  %vm596_vm11 = vcmp.gt.f32.partialorder %v445_v4, 0.0  ;;  %v660_v16 = vmul.f32 0.2, %v445_v4  ;;  %v448_v17 = vpop.f32.mrf.mxu0  ;;  %v528_v18 = vpop.f32.mrf.mxu1  ;;  %vm628_vm12 = vcmp.gt.f32.partialorder %v525_v5, 0.0 }
  0xec   : > { %976 = vst [vmem:[%s1361_s14 + $0x8] sm:$0xff] %v1151_v12  ;;  %992 = vst [vmem:[%s1361_s14 + $0x88] sm:$0xff] %v1167_v13  ;;  %v723_v19 = vsel %vm595_vm9, %v443_v2, %v659_v14  ;;  %v692_v20 = vmul.f32 0.2, %v525_v5  ;;  %v447_v21 = vadd.f32 %v446_v10, %v1347_v30  ;;  %v527_v24 = vadd.f32 %v526_v11, %v1347_v30 }
  0xed   : > { %v755_v22 = vsel %vm627_vm10, %v523_v3, %v691_v15  ;;  %v724_v23 = vsel %vm596_vm11, %v445_v4, %v660_v16  ;;  %v449_v25 = vadd.f32 %v448_v17, %v1349_v33  ;;  %v452_v26 = vpop.f32.mrf.mxu0  ;;  %v532_v27 = vpop.f32.mrf.mxu1  ;;  %v529_v39 = vadd.f32 %v528_v18, %v1349_v33 }
  0xee   : > { %v1152_v28 = vpack.c.bf16 %v724_v23, %v723_v19  ;;  %v756_v29 = vsel %vm628_vm12, %v525_v5, %v692_v20  ;;  %vm597_vm13 = vcmp.gt.f32.partialorder %v447_v21, 0.0  ;;  %v661_v31 = vmul.f32 0.2, %v447_v21 }
  0xef   : > { %v1168_v32 = vpack.c.bf16 %v756_v29, %v755_v22  ;;  %vm629_vm14 = vcmp.gt.f32.partialorder %v527_v24, 0.0  ;;  %v693_v34 = vmul.f32 0.2, %v527_v24  ;;  %vm598_vm15 = vcmp.gt.f32.partialorder %v449_v25, 0.0  ;;  %v454_v35 = vpop.f32.mrf.mxu0  ;;  %v534_v36 = vpop.f32.mrf.mxu1 }
  0xf0   : > { %977 = vst [vmem:[%s1361_s14 + $0x10] sm:$0xff] %v1152_v28  ;;  %v725_v37 = vsel %vm597_vm13, %v447_v21, %v661_v31  ;;  %v662_v38 = vmul.f32 0.2, %v449_v25  ;;  %v453_v40 = vadd.f32 %v452_v26, %v1347_v30  ;;  %v533_v42 = vadd.f32 %v532_v27, %v1347_v30 }
  0xf1   : > { %993 = vst [vmem:[%s1361_s14 + $0x90] sm:$0xff] %v1168_v32  ;;  %v757_v41 = vsel %vm629_vm14, %v527_v24, %v693_v34  ;;  %v455_v43 = vadd.f32 %v454_v35, %v1349_v33  ;;  %v535_v44 = vadd.f32 %v534_v36, %v1349_v33  ;;  %v456_v45 = vpop.f32.mrf.mxu0  ;;  %v536_v46 = vpop.f32.mrf.mxu1  ;;  %vm630_vm0 = vcmp.gt.f32.partialorder %v529_v39, 0.0 }
  0xf2   : > { %v726_v47 = vsel %vm598_vm15, %v449_v25, %v662_v38  ;;  %v694_v48 = vmul.f32 0.2, %v529_v39  ;;  %vm599_vm1 = vcmp.gt.f32.partialorder %v453_v40, 0.0  ;;  %v663_v50 = vmul.f32 0.2, %v453_v40 }
  0xf3   : > { %v1153_v49 = vpack.c.bf16 %v726_v47, %v725_v37  ;;  %vm631_vm2 = vcmp.gt.f32.partialorder %v533_v42, 0.0  ;;  %v695_v51 = vmul.f32 0.2, %v533_v42  ;;  %v458_v52 = vpop.f32.mrf.mxu0  ;;  %v538_v53 = vpop.f32.mrf.mxu1  ;;  %vm600_vm3 = vcmp.gt.f32.partialorder %v455_v43, 0.0 }
  0xf4   : > { %v758_v54 = vsel %vm630_vm0, %v529_v39, %v694_v48  ;;  %v664_v55 = vmul.f32 0.2, %v455_v43  ;;  %vm632_vm4 = vcmp.gt.f32.partialorder %v535_v44, 0.0  ;;  %v727_v57 = vsel %vm599_vm1, %v453_v40, %v663_v50 }
  0xf5   : > { %978 = vst [vmem:[%s1361_s14 + $0x18] sm:$0xff] %v1153_v49  ;;  %v1169_v56 = vpack.c.bf16 %v758_v54, %v757_v41  ;;  %v759_v58 = vsel %vm631_vm2, %v533_v42, %v695_v51  ;;  %v696_v59 = vmul.f32 0.2, %v535_v44  ;;  %v462_v60 = vpop.f32.mrf.mxu0  ;;  %v542_v61 = vpop.f32.mrf.mxu1  ;;  %v457_v63 = vadd.f32 %v456_v45, %v1347_v30 }
  0xf6   : > { %v728_v62 = vsel %vm600_vm3, %v455_v43, %v664_v55  ;;  %v537_v0 = vadd.f32 %v536_v46, %v1347_v30  ;;  %v459_v1 = vadd.f32 %v458_v52, %v1349_v33  ;;  %v539_v4 = vadd.f32 %v538_v53, %v1349_v33 }
  0xf7   : > { %994 = vst [vmem:[%s1361_s14 + $0x98] sm:$0xff] %v1169_v56  ;;  %v1154_v2 = vpack.c.bf16 %v728_v62, %v727_v57  ;;  %v760_v3 = vsel %vm632_vm4, %v535_v44, %v696_v59  ;;  %v463_v5 = vadd.f32 %v462_v60, %v1347_v30  ;;  %v464_v6 = vpop.f32.mrf.mxu0  ;;  %v544_v7 = vpop.f32.mrf.mxu1  ;;  %vm601_vm5 = vcmp.gt.f32.partialorder %v457_v63, 0.0 }
  0xf8   : > { %v1170_v8 = vpack.c.bf16 %v760_v3, %v759_v58  ;;  %v665_v9 = vmul.f32 0.2, %v457_v63  ;;  %vm633_vm6 = vcmp.gt.f32.partialorder %v537_v0, 0.0  ;;  %v697_v10 = vmul.f32 0.2, %v537_v0 }
  0xf9   : > { %979 = vst [vmem:[%s1361_s14 + $0x20] sm:$0xff] %v1154_v2  ;;  %vm602_vm7 = vcmp.gt.f32.partialorder %v459_v1, 0.0  ;;  %v666_v11 = vmul.f32 0.2, %v459_v1  ;;  %vm634_vm8 = vcmp.gt.f32.partialorder %v539_v4, 0.0  ;;  %v466_v12 = vpop.f32.mrf.mxu0  ;;  %v546_v13 = vpop.f32.mrf.mxu1  ;;  %vm603_vm9 = vcmp.gt.f32.partialorder %v463_v5, 0.0 }
  0xfa   : > { %995 = vst [vmem:[%s1361_s14 + $0xa0] sm:$0xff] %v1170_v8  ;;  %v729_v14 = vsel %vm601_vm5, %v457_v63, %v665_v9  ;;  %v698_v15 = vmul.f32 0.2, %v539_v4  ;;  %v667_v16 = vmul.f32 0.2, %v463_v5  ;;  %v761_v17 = vsel %vm633_vm6, %v537_v0, %v697_v10 }
  0xfb   : > { %v730_v18 = vsel %vm602_vm7, %v459_v1, %v666_v11  ;;  %v543_v19 = vadd.f32 %v542_v61, %v1347_v30  ;;  %v465_v20 = vadd.f32 %v464_v6, %v1349_v33  ;;  %v468_v21 = vpop.f32.mrf.mxu0  ;;  %v548_v22 = vpop.f32.mrf.mxu1  ;;  %v545_v26 = vadd.f32 %v544_v7, %v1349_v33 }
  0xfc   : > { %v1155_v23 = vpack.c.bf16 %v730_v18, %v729_v14  ;;  %v762_v24 = vsel %vm634_vm8, %v539_v4, %v698_v15  ;;  %v731_v25 = vsel %vm603_vm9, %v463_v5, %v667_v16  ;;  %v467_v35 = vadd.f32 %v466_v12, %v1347_v30 }
  0xfd   : > { %v1171_v27 = vpack.c.bf16 %v762_v24, %v761_v17  ;;  %vm635_vm10 = vcmp.gt.f32.partialorder %v543_v19, 0.0  ;;  %v699_v28 = vmul.f32 0.2, %v543_v19  ;;  %vm604_vm11 = vcmp.gt.f32.partialorder %v465_v20, 0.0  ;;  %v472_v29 = vpop.f32.mrf.mxu0  ;;  %v552_v31 = vpop.f32.mrf.mxu1 }
  0xfe   : > { %980 = vst [vmem:[%s1361_s14 + $0x28] sm:$0xff] %v1155_v23  ;;  %v668_v32 = vmul.f32 0.2, %v465_v20  ;;  %vm636_vm12 = vcmp.gt.f32.partialorder %v545_v26, 0.0  ;;  %v700_v34 = vmul.f32 0.2, %v545_v26  ;;  %v547_v37 = vadd.f32 %v546_v13, %v1347_v30 }
  0xff   : > { %996 = vst [vmem:[%s1361_s14 + $0xa8] sm:$0xff] %v1171_v27  ;;  %v763_v36 = vsel %vm635_vm10, %v543_v19, %v699_v28  ;;  %v469_v38 = vadd.f32 %v468_v21, %v1349_v33  ;;  %v549_v39 = vadd.f32 %v548_v22, %v1349_v33  ;;  %v474_v40 = vpop.f32.mrf.mxu0  ;;  %v554_v41 = vpop.f32.mrf.mxu1  ;;  %vm605_vm13 = vcmp.gt.f32.partialorder %v467_v35, 0.0 }
 0x100   : > { %v732_v42 = vsel %vm604_vm11, %v465_v20, %v668_v32  ;;  %v764_v43 = vsel %vm636_vm12, %v545_v26, %v700_v34  ;;  %v669_v44 = vmul.f32 0.2, %v467_v35  ;;  %vm637_vm14 = vcmp.gt.f32.partialorder %v547_v37, 0.0 }
 0x101   : > { %v1156_v45 = vpack.c.bf16 %v732_v42, %v731_v25  ;;  %v1172_v46 = vpack.c.bf16 %v764_v43, %v763_v36  ;;  %v701_v47 = vmul.f32 0.2, %v547_v37  ;;  %v476_v48 = vpop.f32.mrf.mxu0  ;;  %v556_v49 = vpop.f32.mrf.mxu1  ;;  %vm606_vm15 = vcmp.gt.f32.partialorder %v469_v38, 0.0 }
 0x102   : > { %v733_v50 = vsel %vm605_vm13, %v467_v35, %v669_v44  ;;  %v670_v51 = vmul.f32 0.2, %v469_v38  ;;  %vm638_vm0 = vcmp.gt.f32.partialorder %v549_v39, 0.0  ;;  %v702_v53 = vmul.f32 0.2, %v549_v39 }
 0x103   : > { %981 = vst [vmem:[%s1361_s14 + $0x30] sm:$0xff] %v1156_v45  ;;  %997 = vst [vmem:[%s1361_s14 + $0xb0] sm:$0xff] %v1172_v46  ;;  %v765_v52 = vsel %vm637_vm14, %v547_v37, %v701_v47  ;;  %v473_v54 = vadd.f32 %v472_v29, %v1347_v30  ;;  %v553_v55 = vadd.f32 %v552_v31, %v1347_v30  ;;  %v478_v56 = vpop.f32.mrf.mxu0  ;;  %v558_v57 = vpop.f32.mrf.mxu1 }
 0x104   : > { %v734_v58 = vsel %vm606_vm15, %v469_v38, %v670_v51  ;;  %v475_v59 = vadd.f32 %v474_v40, %v1349_v33  ;;  %v555_v60 = vadd.f32 %v554_v41, %v1349_v33  ;;  %v477_v61 = vadd.f32 %v476_v48, %v1347_v30 }
 0x105   : > { %v1157_v62 = vpack.c.bf16 %v734_v58, %v733_v50  ;;  %v766_v63 = vsel %vm638_vm0, %v549_v39, %v702_v53  ;;  %vm607_vm1 = vcmp.gt.f32.partialorder %v473_v54, 0.0  ;;  %v671_v0 = vmul.f32 0.2, %v473_v54  ;;  %v482_v1 = vpop.f32.mrf.mxu0  ;;  %v562_v2 = vpop.f32.mrf.mxu1 }
 0x106   : > { %v1173_v3 = vpack.c.bf16 %v766_v63, %v765_v52  ;;  %vm639_vm2 = vcmp.gt.f32.partialorder %v553_v55, 0.0  ;;  %v703_v4 = vmul.f32 0.2, %v553_v55  ;;  %vm608_vm3 = vcmp.gt.f32.partialorder %v475_v59, 0.0 }
 0x107   : > { %982 = vst [vmem:[%s1361_s14 + $0x38] sm:$0xff] %v1157_v62  ;;  %v735_v5 = vsel %vm607_vm1, %v473_v54, %v671_v0  ;;  %v672_v6 = vmul.f32 0.2, %v475_v59  ;;  %vm640_vm4 = vcmp.gt.f32.partialorder %v555_v60, 0.0  ;;  %v704_v7 = vmul.f32 0.2, %v555_v60  ;;  %v484_v8 = vpop.f32.mrf.mxu0  ;;  %v564_v9 = vpop.f32.mrf.mxu1 }
 0x108   : > { %998 = vst [vmem:[%s1361_s14 + $0xb8] sm:$0xff] %v1173_v3  ;;  %v767_v10 = vsel %vm639_vm2, %v553_v55, %v703_v4  ;;  %vm609_vm5 = vcmp.gt.f32.partialorder %v477_v61, 0.0  ;;  %v673_v11 = vmul.f32 0.2, %v477_v61  ;;  %v557_v12 = vadd.f32 %v556_v49, %v1347_v30 }
 0x109   : > { %v736_v13 = vsel %vm608_vm3, %v475_v59, %v672_v6  ;;  %v768_v14 = vsel %vm640_vm4, %v555_v60, %v704_v7  ;;  %v479_v15 = vadd.f32 %v478_v56, %v1349_v33  ;;  %v559_v16 = vadd.f32 %v558_v57, %v1349_v33  ;;  %v486_v17 = vpop.f32.mrf.mxu0  ;;  %v566_v18 = vpop.f32.mrf.mxu1 }
 0x10a   : > { %v1158_v19 = vpack.c.bf16 %v736_v13, %v735_v5  ;;  %v1174_v20 = vpack.c.bf16 %v768_v14, %v767_v10  ;;  %v737_v21 = vsel %vm609_vm5, %v477_v61, %v673_v11  ;;  %vm641_vm6 = vcmp.gt.f32.partialorder %v557_v12, 0.0 }
 0x10b   : > { %v705_v22 = vmul.f32 0.2, %v557_v12  ;;  %vm610_vm7 = vcmp.gt.f32.partialorder %v479_v15, 0.0  ;;  %v674_v23 = vmul.f32 0.2, %v479_v15  ;;  %vm642_vm8 = vcmp.gt.f32.partialorder %v559_v16, 0.0  ;;  %v488_v24 = vpop.f32.mrf.mxu0  ;;  %v568_v25 = vpop.f32.mrf.mxu1 }
 0x10c   : > { %983 = vst [vmem:[%s1361_s14 + $0x40] sm:$0xff] %v1158_v19  ;;  %999 = vst [vmem:[%s1361_s14 + $0xc0] sm:$0xff] %v1174_v20  ;;  %v706_v26 = vmul.f32 0.2, %v559_v16  ;;  %v483_v27 = vadd.f32 %v482_v1, %v1347_v30  ;;  %v563_v28 = vadd.f32 %v562_v2, %v1347_v30  ;;  %v485_v29 = vadd.f32 %v484_v8, %v1349_v33 }
 0x10d   : > { %v769_v31 = vsel %vm641_vm6, %v557_v12, %v705_v22  ;;  %v738_v32 = vsel %vm610_vm7, %v479_v15, %v674_v23  ;;  %v565_v34 = vadd.f32 %v564_v9, %v1349_v33  ;;  %v487_v35 = vadd.f32 %v486_v17, %v1347_v30  ;;  %v492_v36 = vpop.f32.mrf.mxu0  ;;  %v572_v37 = vpop.f32.mrf.mxu1 }
 0x10e   : > { %v1159_v38 = vpack.c.bf16 %v738_v32, %v737_v21  ;;  %v770_v39 = vsel %vm642_vm8, %v559_v16, %v706_v26  ;;  %vm611_vm9 = vcmp.gt.f32.partialorder %v483_v27, 0.0  ;;  %v675_v40 = vmul.f32 0.2, %v483_v27 }
 0x10f   : > { %v1175_v41 = vpack.c.bf16 %v770_v39, %v769_v31  ;;  %vm643_vm10 = vcmp.gt.f32.partialorder %v563_v28, 0.0  ;;  %v707_v42 = vmul.f32 0.2, %v563_v28  ;;  %vm612_vm11 = vcmp.gt.f32.partialorder %v485_v29, 0.0  ;;  %v494_v43 = vpop.f32.mrf.mxu0  ;;  %v574_v44 = vpop.f32.mrf.mxu1 }
 0x110   : > { %984 = vst [vmem:[%s1361_s14 + $0x48] sm:$0xff] %v1159_v38  ;;  %v739_v45 = vsel %vm611_vm9, %v483_v27, %v675_v40  ;;  %v676_v46 = vmul.f32 0.2, %v485_v29  ;;  %vm644_vm12 = vcmp.gt.f32.partialorder %v565_v34, 0.0  ;;  %v708_v47 = vmul.f32 0.2, %v565_v34 }
 0x111   : > { %1000 = vst [vmem:[%s1361_s14 + $0xc8] sm:$0xff] %v1175_v41  ;;  %v771_v48 = vsel %vm643_vm10, %v563_v28, %v707_v42  ;;  %vm613_vm13 = vcmp.gt.f32.partialorder %v487_v35, 0.0  ;;  %v677_v49 = vmul.f32 0.2, %v487_v35  ;;  %v567_v50 = vadd.f32 %v566_v18, %v1347_v30  ;;  %v496_v51 = vpop.f32.mrf.mxu0  ;;  %v576_v52 = vpop.f32.mrf.mxu1 }
 0x112   : > { %v740_v53 = vsel %vm612_vm11, %v485_v29, %v676_v46  ;;  %v772_v54 = vsel %vm644_vm12, %v565_v34, %v708_v47  ;;  %v489_v55 = vadd.f32 %v488_v24, %v1349_v33  ;;  %v569_v56 = vadd.f32 %v568_v25, %v1349_v33 }
 0x113   : > { %v1160_v57 = vpack.c.bf16 %v740_v53, %v739_v45  ;;  %v1176_v58 = vpack.c.bf16 %v772_v54, %v771_v48  ;;  %v741_v59 = vsel %vm613_vm13, %v487_v35, %v677_v49  ;;  %vm645_vm14 = vcmp.gt.f32.partialorder %v567_v50, 0.0  ;;  %v498_v60 = vpop.f32.mrf.mxu0  ;;  %v578_v61 = vpop.f32.mrf.mxu1 }
 0x114   : > { %v709_v62 = vmul.f32 0.2, %v567_v50  ;;  %vm614_vm15 = vcmp.gt.f32.partialorder %v489_v55, 0.0  ;;  %v678_v63 = vmul.f32 0.2, %v489_v55  ;;  %vm646_vm0 = vcmp.gt.f32.partialorder %v569_v56, 0.0 }
 0x115   : > { %985 = vst [vmem:[%s1361_s14 + $0x50] sm:$0xff] %v1160_v57  ;;  %1001 = vst [vmem:[%s1361_s14 + $0xd0] sm:$0xff] %v1176_v58  ;;  %v710_v0 = vmul.f32 0.2, %v569_v56  ;;  %v493_v1 = vadd.f32 %v492_v36, %v1347_v30  ;;  %v573_v2 = vadd.f32 %v572_v37, %v1347_v30  ;;  %v495_v3 = vadd.f32 %v494_v43, %v1349_v33  ;;  %v502_v4 = vpop.f32.mrf.mxu0  ;;  %v582_v5 = vpop.f32.mrf.mxu1 }
 0x116   : > { %v773_v6 = vsel %vm645_vm14, %v567_v50, %v709_v62  ;;  %v742_v7 = vsel %vm614_vm15, %v489_v55, %v678_v63  ;;  %v575_v8 = vadd.f32 %v574_v44, %v1349_v33  ;;  %v497_v9 = vadd.f32 %v496_v51, %v1347_v30 }
 0x117   : > { %v1161_v10 = vpack.c.bf16 %v742_v7, %v741_v59  ;;  %v774_v11 = vsel %vm646_vm0, %v569_v56, %v710_v0  ;;  %vm615_vm1 = vcmp.gt.f32.partialorder %v493_v1, 0.0  ;;  %v679_v12 = vmul.f32 0.2, %v493_v1  ;;  %v504_v15 = vpop.f32.mrf.mxu0  ;;  %v584_v19 = vpop.f32.mrf.mxu1 }
 0x118   : > { %v1177_v13 = vpack.c.bf16 %v774_v11, %v773_v6  ;;  %vm647_vm2 = vcmp.gt.f32.partialorder %v573_v2, 0.0  ;;  %v711_v14 = vmul.f32 0.2, %v573_v2  ;;  %vm616_vm3 = vcmp.gt.f32.partialorder %v495_v3, 0.0 }
 0x119   : > { %986 = vst [vmem:[%s1361_s14 + $0x58] sm:$0xff] %v1161_v10  ;;  %v743_v16 = vsel %vm615_vm1, %v493_v1, %v679_v12  ;;  %v680_v17 = vmul.f32 0.2, %v495_v3  ;;  %vm648_vm4 = vcmp.gt.f32.partialorder %v575_v8, 0.0  ;;  %v712_v18 = vmul.f32 0.2, %v575_v8  ;;  %v506_v31 = vpop.f32.mrf.mxu0  ;;  %v586_v35 = vpop.f32.mrf.mxu1 }
 0x11a   : > { %1002 = vst [vmem:[%s1361_s14 + $0xd8] sm:$0xff] %v1177_v13  ;;  %v775_v20 = vsel %vm647_vm2, %v573_v2, %v711_v14  ;;  %vm617_vm5 = vcmp.gt.f32.partialorder %v497_v9, 0.0  ;;  %v681_v21 = vmul.f32 0.2, %v497_v9  ;;  %v577_v22 = vadd.f32 %v576_v52, %v1347_v30 }
 0x11b   : > { %v744_v23 = vsel %vm616_vm3, %v495_v3, %v680_v17  ;;  %v776_v24 = vsel %vm648_vm4, %v575_v8, %v712_v18  ;;  %v499_v25 = vadd.f32 %v498_v60, %v1349_v33  ;;  %v579_v26 = vadd.f32 %v578_v61, %v1349_v33  ;;  %v508_v49 = vpop.f32.mrf.mxu0  ;;  %v588_v50 = vpop.f32.mrf.mxu1 }
 0x11c   : > { %v1162_v27 = vpack.c.bf16 %v744_v23, %v743_v16  ;;  %v1178_v28 = vpack.c.bf16 %v776_v24, %v775_v20  ;;  %v745_v29 = vsel %vm617_vm5, %v497_v9, %v681_v21  ;;  %vm649_vm6 = vcmp.gt.f32.partialorder %v577_v22, 0.0 }
 0x11d   : > { %v713_v32 = vmul.f32 0.2, %v577_v22  ;;  %vm618_vm7 = vcmp.gt.f32.partialorder %v499_v25, 0.0  ;;  %v682_v34 = vmul.f32 0.2, %v499_v25  ;;  %vm650_vm8 = vcmp.gt.f32.partialorder %v579_v26, 0.0 }
 0x11e   : > { %987 = vst [vmem:[%s1361_s14 + $0x60] sm:$0xff] %v1162_v27  ;;  %1003 = vst [vmem:[%s1361_s14 + $0xe0] sm:$0xff] %v1178_v28  ;;  %v714_v36 = vmul.f32 0.2, %v579_v26  ;;  %v503_v37 = vadd.f32 %v502_v4, %v1347_v30  ;;  %v583_v38 = vadd.f32 %v582_v5, %v1347_v30  ;;  %v505_v39 = vadd.f32 %v504_v15, %v1349_v33 }
 0x11f   : > { %v777_v40 = vsel %vm649_vm6, %v577_v22, %v713_v32  ;;  %v746_v41 = vsel %vm618_vm7, %v499_v25, %v682_v34  ;;  %v585_v42 = vadd.f32 %v584_v19, %v1349_v33  ;;  %v507_v43 = vadd.f32 %v506_v31, %v1347_v30 }
 0x120   : > { %v1163_v44 = vpack.c.bf16 %v746_v41, %v745_v29  ;;  %v778_v45 = vsel %vm650_vm8, %v579_v26, %v714_v36  ;;  %vm619_vm9 = vcmp.gt.f32.partialorder %v503_v37, 0.0  ;;  %v683_v46 = vmul.f32 0.2, %v503_v37 }
 0x121   : > { %v1179_v47 = vpack.c.bf16 %v778_v45, %v777_v40  ;;  %vm651_vm10 = vcmp.gt.f32.partialorder %v583_v38, 0.0  ;;  %v715_v48 = vmul.f32 0.2, %v583_v38  ;;  %vm620_vm11 = vcmp.gt.f32.partialorder %v505_v39, 0.0 }
 0x122   : > { %988 = vst [vmem:[%s1361_s14 + $0x68] sm:$0xff] %v1163_v44  ;;  %v684_v51 = vmul.f32 0.2, %v505_v39  ;;  %vm652_vm12 = vcmp.gt.f32.partialorder %v585_v42, 0.0  ;;  %v716_v52 = vmul.f32 0.2, %v585_v42  ;;  %v747_v53 = vsel %vm619_vm9, %v503_v37, %v683_v46 }
 0x123   : > { %1004 = vst [vmem:[%s1361_s14 + $0xe8] sm:$0xff] %v1179_v47  ;;  %v779_v54 = vsel %vm651_vm10, %v583_v38, %v715_v48  ;;  %v685_v55 = vmul.f32 0.2, %v507_v43  ;;  %v587_v56 = vadd.f32 %v586_v35, %v1347_v30  ;;  %v509_v59 = vadd.f32 %v508_v49, %v1349_v33 }
 0x124   : > { %v748_v57 = vsel %vm620_vm11, %v505_v39, %v684_v51  ;;  %v780_v58 = vsel %vm652_vm12, %v585_v42, %v716_v52  ;;  %v589_v60 = vadd.f32 %v588_v50, %v1349_v33  ;;  %vm621_vm13 = vcmp.gt.f32.partialorder %v507_v43, 0.0 }
 0x125   : > { %v1164_v61 = vpack.c.bf16 %v748_v57, %v747_v53  ;;  %v1180_v62 = vpack.c.bf16 %v780_v58, %v779_v54  ;;  %vm653_vm14 = vcmp.gt.f32.partialorder %v587_v56, 0.0  ;;  %v717_v63 = vmul.f32 0.2, %v587_v56 }
 0x126   : > { %vm622_vm15 = vcmp.gt.f32.partialorder %v509_v59, 0.0  ;;  %v686_v0 = vmul.f32 0.2, %v509_v59  ;;  %vm654_vm0 = vcmp.gt.f32.partialorder %v589_v60, 0.0  ;;  %v718_v1 = vmul.f32 0.2, %v589_v60 }
 0x127   : > { %989 = vst [vmem:[%s1361_s14 + $0x70] sm:$0xff] %v1164_v61  ;;  %1005 = vst [vmem:[%s1361_s14 + $0xf0] sm:$0xff] %v1180_v62  ;;  %v749_v30 = vsel %vm621_vm13, %v507_v43, %v685_v55  ;;  %v781_v3 = vsel %vm653_vm14, %v587_v56, %v717_v63 }
 0x128   : > { %v750_v2 = vsel %vm622_vm15, %v509_v59, %v686_v0  ;;  %v782_v5 = vsel %vm654_vm0, %v589_v60, %v718_v1 }
 0x129   : > { %v1165_v4 = vpack.c.bf16 %v750_v2, %v749_v30  ;;  %v1181_v6 = vpack.c.bf16 %v782_v5, %v781_v3 }
 0x12b   : > { %990 = vst [vmem:[%s1361_s14 + $0x78] sm:$0xff] %v1165_v4  ;;  %1006 = vst [vmem:[%s1361_s14 + $0xf8] sm:$0xff] %v1181_v6 }
 0x12c PF: > { %s13_s12 = sadd.s32 1, %s1233_s12  }
 0x12d   : > { %p10_p4 = scmp.ge.s32.totalorder %s13_s12, 4  }
 0x12f   :  { %12 = sbr.rel (!%p10_p4) target bundleno = 1 (0x1), region = 62 }

// kernel: discriminator_forward.5
= control target key start
LH: loop header
LB: loop body
LE: loop exit
PB: predicated region body
PF: predicated region fallthrough
CT: control target
= control target key end

     0   :  { %s1352_s1 = inlined_call_operand.vmem [shape: f32[1,128], index: 1, kind: input, shape index: {}]   ;;  %s1353_s0 = inlined_call_operand.vmem [shape: f32[512,128], index: 0, kind: input, shape index: {}]   ;;  %s1354_s2 = inlined_call_operand.vmem [shape: f32[1,128], index: 2, kind: input, shape index: {}]   ;;  %s1355_s3 = inlined_call_operand.vmem [shape: f32[64,128], index: 3, kind: input, shape index: {}]   ;;  %s1356_s4 = inlined_call_operand.<no memory space> [shape: f32[1,1], index: 4, kind: input, shape index: {}]   ;;  %s1357_s5 = inlined_call_operand.vmem [shape: f32[8,128], index: 5, kind: output, shape index: {}]  }
   0x1   :  { %v834_v0 = vld [vmem:[%s1352_s1] ss:$0 sm:$0xff]  ;;  %v134_v3 = vld [vmem:[%s1353_s0 + $0x48] sm:$0xff]  ;;  %v135_v4 = vld [vmem:[%s1353_s0 + $0x50] sm:$0xff] }
   0x2   :  { %v839_v1 = vld [vmem:[%s1354_s2] ss:$0 sm:$0xff]  ;;  %v136_v5 = vld [vmem:[%s1353_s0 + $0x58] sm:$0xff]  ;;  %v142_v8 = vmul.f32 %v834_v0, %v134_v3  ;;  %v138_v9 = vld [vmem:[%s1353_s0 + $0x68] sm:$0xff]  ;;  %v143_v12 = vmul.f32 %v834_v0, %v135_v4 }
   0x3   :  { %v133_v2 = vld [vmem:[%s1353_s0 + $0x40] sm:$0xff]  ;;  %v139_v10 = vld [vmem:[%s1353_s0 + $0x70] sm:$0xff]  ;;  %v140_v11 = vld [vmem:[%s1353_s0 + $0x78] sm:$0xff]  ;;  %v144_v13 = vmul.f32 %v834_v0, %v136_v5  ;;  %v146_v15 = vmul.f32 %v834_v0, %v138_v9 }
   0x4   :  { %v137_v6 = vld [vmem:[%s1353_s0 + $0x60] sm:$0xff]  ;;  %v141_v7 = vmul.f32 %v834_v0, %v133_v2  ;;  %v147_v16 = vmul.f32 %v834_v0, %v139_v10  ;;  %v148_v17 = vmul.f32 %v834_v0, %v140_v11  ;;  %v150_v19 = vadd.f32 %v839_v1, %v142_v8  ;;  %v892_v28 = vld [vmem:[%s1355_s3 + $0x8] sm:$0xff]  ;;  %v897_v29 = vld [vmem:[%s1355_s3 + $0x10] sm:$0xff] }
   0x5   :  { %v145_v14 = vmul.f32 %v834_v0, %v137_v6  ;;  %v151_v20 = vadd.f32 %v839_v1, %v143_v12  ;;  %v152_v21 = vadd.f32 %v839_v1, %v144_v13  ;;  %v154_v23 = vadd.f32 %v839_v1, %v146_v15  ;;  %v33_v26 = vld [vmem:[%s1353_s0] sm:$0xff]  ;;  %v902_v30 = vld [vmem:[%s1355_s3 + $0x18] sm:$0xff]  ;;  %v912_v33 = vld [vmem:[%s1355_s3 + $0x28] sm:$0xff] }
   0x6   :  { %v149_v18 = vadd.f32 %v839_v1, %v141_v7  ;;  %v155_v24 = vadd.f32 %v839_v1, %v147_v16  ;;  %v156_v25 = vadd.f32 %v839_v1, %v148_v17  ;;  %v887_v27 = vld [vmem:[%s1355_s3] sm:$0xff]  ;;  %vm158_vm1 = vcmp.gt.f32.partialorder %v150_v19, 0.0  ;;  %v919_v42 = vld [vmem:[%s1355_s3 + $0x30] sm:$0xff]  ;;  %v924_v43 = vld [vmem:[%s1355_s3 + $0x38] sm:$0xff] }
   0x7   :  { %v153_v22 = vadd.f32 %v839_v1, %v145_v14  ;;  %vm159_vm2 = vcmp.gt.f32.partialorder %v151_v20, 0.0  ;;  %vm160_vm3 = vcmp.gt.f32.partialorder %v152_v21, 0.0  ;;  %vm162_vm5 = vcmp.gt.f32.partialorder %v154_v23, 0.0  ;;  %v907_v32 = vld [vmem:[%s1355_s3 + $0x20] sm:$0xff]  ;;  %v34_v48 = vld [vmem:[%s1353_s0 + $0x8] sm:$0xff]  ;;  %v35_v53 = vld [vmem:[%s1353_s0 + $0x10] sm:$0xff] }
   0x8   :  { %vm157_vm0 = vcmp.gt.f32.partialorder %v149_v18, 0.0  ;;  %vm163_vm6 = vcmp.gt.f32.partialorder %v155_v24, 0.0  ;;  %vm164_vm7 = vcmp.gt.f32.partialorder %v156_v25, 0.0  ;;  %v165_v31 = vmul.f32 0.2, %v149_v18  ;;  %v36_v54 = vld [vmem:[%s1353_s0 + $0x18] sm:$0xff] }
   0x9   :  { %vm161_vm4 = vcmp.gt.f32.partialorder %v153_v22, 0.0  ;;  %v166_v34 = vmul.f32 0.2, %v150_v19  ;;  %v167_v35 = vmul.f32 0.2, %v151_v20  ;;  %v47_v37 = vmul.f32 %v834_v0, %v33_v26  ;;  %v37_v55 = vld [vmem:[%s1353_s0 + $0x20] sm:$0xff] }
   0xa   :  { %v168_v36 = vmul.f32 0.2, %v152_v21  ;;  %v169_v38 = vmul.f32 0.2, %v153_v22  ;;  %v170_v39 = vmul.f32 0.2, %v154_v23  ;;  %v173_v41 = vsel %vm157_vm0, %v149_v18, %v165_v31 }
   0xb   :  { %v171_v40 = vmul.f32 0.2, %v155_v24  ;;  %v172_v44 = vmul.f32 0.2, %v156_v25  ;;  %v174_v45 = vsel %vm158_vm1, %v150_v19, %v166_v34  ;;  %v175_v46 = vsel %vm159_vm2, %v151_v20, %v167_v35  ;;  %v38_v60 = vld [vmem:[%s1353_s0 + $0x28] sm:$0xff]  ;;  %v39_v61 = vld [vmem:[%s1353_s0 + $0x30] sm:$0xff] }
   0xc   :  { %v176_v47 = vsel %vm160_vm3, %v152_v21, %v168_v36  ;;  %v177_v49 = vsel %vm161_vm4, %v153_v22, %v169_v38  ;;  %v178_v50 = vsel %vm162_vm5, %v154_v23, %v170_v39  ;;  %v181_v52 = vmul.f32 %v173_v41, %v887_v27  ;;  %v40_v62 = vld [vmem:[%s1353_s0 + $0x38] sm:$0xff]  ;;  %v221_v23 = vld [vmem:[%s1353_s0 + $0x80] sm:$0xff] }
   0xd   :  { %v179_v51 = vsel %vm163_vm6, %v155_v24, %v171_v40  ;;  %v180_v56 = vsel %vm164_vm7, %v156_v25, %v172_v44  ;;  %v182_v57 = vmul.f32 %v174_v45, %v892_v28  ;;  %v183_v58 = vmul.f32 %v175_v46, %v897_v29 }
   0xe   :  { %v184_v59 = vmul.f32 %v176_v47, %v902_v30  ;;  %v185_v63 = vmul.f32 %v177_v49, %v907_v32  ;;  %v186_v2 = vmul.f32 %v178_v50, %v912_v33  ;;  %v187_v3 = vmul.f32 %v179_v51, %v919_v42 }
   0xf   :  { %v188_v4 = vmul.f32 %v180_v56, %v924_v43  ;;  %v189_v5 = vadd.f32 %v182_v57, %v181_v52  ;;  %v48_v6 = vmul.f32 %v834_v0, %v34_v48  ;;  %v49_v7 = vmul.f32 %v834_v0, %v35_v53  ;;  %v224_v56 = vld [vmem:[%s1353_s0 + $0x98] sm:$0xff] }
  0x10   :  { %v50_v8 = vmul.f32 %v834_v0, %v36_v54  ;;  %v51_v9 = vmul.f32 %v834_v0, %v37_v55  ;;  %v52_v10 = vmul.f32 %v834_v0, %v38_v60  ;;  %v53_v11 = vmul.f32 %v834_v0, %v39_v61  ;;  %v222_v54 = vld [vmem:[%s1353_s0 + $0x88] sm:$0xff]  ;;  %v223_v55 = vld [vmem:[%s1353_s0 + $0x90] sm:$0xff]  ;;  %v225_v61 = vld [vmem:[%s1353_s0 + $0xa0] sm:$0xff] }
  0x11   :  { %v54_v12 = vmul.f32 %v834_v0, %v40_v62  ;;  %v190_v13 = vadd.f32 %v189_v5, %v183_v58  ;;  %v61_v14 = vadd.f32 %v839_v1, %v47_v37  ;;  %v62_v15 = vadd.f32 %v839_v1, %v48_v6  ;;  %v226_v62 = vld [vmem:[%s1353_s0 + $0xa8] sm:$0xff]  ;;  %v228_v6 = vld [vmem:[%s1353_s0 + $0xb8] sm:$0xff] }
  0x12   :  { %v63_v16 = vadd.f32 %v839_v1, %v49_v7  ;;  %v64_v17 = vadd.f32 %v839_v1, %v50_v8  ;;  %v65_v18 = vadd.f32 %v839_v1, %v51_v9  ;;  %v66_v19 = vadd.f32 %v839_v1, %v52_v10 }
  0x13   :  { %v67_v20 = vadd.f32 %v839_v1, %v53_v11  ;;  %v191_v21 = vadd.f32 %v190_v13, %v184_v59  ;;  %v68_v22 = vadd.f32 %v839_v1, %v54_v12  ;;  %vm69_vm8 = vcmp.gt.f32.partialorder %v61_v14, 0.0 }
  0x14   :  { %vm70_vm9 = vcmp.gt.f32.partialorder %v62_v15, 0.0  ;;  %vm71_vm10 = vcmp.gt.f32.partialorder %v63_v16, 0.0  ;;  %vm72_vm11 = vcmp.gt.f32.partialorder %v64_v17, 0.0  ;;  %vm73_vm12 = vcmp.gt.f32.partialorder %v65_v18, 0.0 }
  0x15   :  { %vm74_vm13 = vcmp.gt.f32.partialorder %v66_v19, 0.0  ;;  %v192_v24 = vadd.f32 %v191_v21, %v185_v63  ;;  %vm75_vm14 = vcmp.gt.f32.partialorder %v67_v20, 0.0  ;;  %vm76_vm15 = vcmp.gt.f32.partialorder %v68_v22, 0.0  ;;  %v227_v63 = vld [vmem:[%s1353_s0 + $0xb0] sm:$0xff] }
  0x16   :  { %v77_v25 = vmul.f32 0.2, %v61_v14  ;;  %v78_v26 = vmul.f32 0.2, %v62_v15  ;;  %v79_v31 = vmul.f32 0.2, %v63_v16  ;;  %v229_v35 = vmul.f32 %v834_v0, %v221_v23 }
  0x17   :  { %v80_v34 = vmul.f32 0.2, %v64_v17  ;;  %v193_v36 = vadd.f32 %v192_v24, %v186_v2  ;;  %v81_v37 = vmul.f32 0.2, %v65_v18  ;;  %v82_v38 = vmul.f32 0.2, %v66_v19 }
  0x18   :  { %v83_v39 = vmul.f32 0.2, %v67_v20  ;;  %v84_v40 = vmul.f32 0.2, %v68_v22  ;;  %v85_v41 = vsel %vm69_vm8, %v61_v14, %v77_v25  ;;  %v86_v44 = vsel %vm70_vm9, %v62_v15, %v78_v26 }
  0x19   :  { %v87_v45 = vsel %vm71_vm10, %v63_v16, %v79_v31  ;;  %v194_v46 = vadd.f32 %v193_v36, %v187_v3  ;;  %v88_v47 = vsel %vm72_vm11, %v64_v17, %v80_v34  ;;  %v89_v48 = vsel %vm73_vm12, %v65_v18, %v81_v37  ;;  %v309_v34 = vld [vmem:[%s1353_s0 + $0xc0] sm:$0xff] }
  0x1a   :  { %v90_v49 = vsel %vm74_vm13, %v66_v19, %v82_v38  ;;  %v91_v50 = vsel %vm75_vm14, %v67_v20, %v83_v39  ;;  %v92_v51 = vsel %vm76_vm15, %v68_v22, %v84_v40  ;;  %v93_v52 = vmul.f32 %v85_v41, %v887_v27 }
  0x1b   :  { %v94_v53 = vmul.f32 %v86_v44, %v892_v28  ;;  %v195_v57 = vadd.f32 %v194_v46, %v188_v4  ;;  %v95_v58 = vmul.f32 %v87_v45, %v897_v29  ;;  %v96_v59 = vmul.f32 %v88_v47, %v902_v30 }
  0x1c   :  { %v97_v60 = vmul.f32 %v89_v48, %v907_v32  ;;  %v98_v2 = vmul.f32 %v90_v49, %v912_v33  ;;  %v99_v3 = vmul.f32 %v91_v50, %v919_v42  ;;  %v100_v4 = vmul.f32 %v92_v51, %v924_v43 }
  0x1d   :  { %v101_v5 = vadd.f32 %v94_v53, %v93_v52  ;;  %v196_v7 = vrot.slane %v195_v57, 4  ;;  %v230_v8 = vmul.f32 %v834_v0, %v222_v54  ;;  %v231_v9 = vmul.f32 %v834_v0, %v223_v55 }
  0x1e   :  { %v232_v10 = vmul.f32 %v834_v0, %v224_v56  ;;  %v233_v12 = vmul.f32 %v834_v0, %v225_v61  ;;  %v234_v13 = vmul.f32 %v834_v0, %v226_v62  ;;  %v235_v14 = vmul.f32 %v834_v0, %v227_v63  ;;  %v311_v61 = vld [vmem:[%s1353_s0 + $0xd0] sm:$0xff] }
  0x1f   :  { %v102_v11 = vadd.f32 %v101_v5, %v95_v58  ;;  %v197_v15 = vadd.f32 %v196_v7, %v195_v57  ;;  %v236_v16 = vmul.f32 %v834_v0, %v228_v6  ;;  %v237_v17 = vadd.f32 %v839_v1, %v229_v35  ;;  %v313_v5 = vld [vmem:[%s1353_s0 + $0xe0] sm:$0xff]  ;;  %v314_v6 = vld [vmem:[%s1353_s0 + $0xe8] sm:$0xff] }
  0x20   :  { %v238_v18 = vadd.f32 %v839_v1, %v230_v8  ;;  %v239_v20 = vadd.f32 %v839_v1, %v231_v9  ;;  %v240_v21 = vadd.f32 %v839_v1, %v232_v10  ;;  %v241_v22 = vadd.f32 %v839_v1, %v233_v12  ;;  %v316_v12 = vld [vmem:[%s1353_s0 + $0xf8] sm:$0xff] }
  0x21   :  { %v103_v19 = vadd.f32 %v102_v11, %v96_v59  ;;  %v198_v23 = vrot.slane %v197_v15, 2  ;;  %v242_v24 = vadd.f32 %v839_v1, %v234_v13  ;;  %v243_v25 = vadd.f32 %v839_v1, %v235_v14  ;;  %v315_v11 = vld [vmem:[%s1353_s0 + $0xf0] sm:$0xff] }
  0x22   :  { %v244_v26 = vadd.f32 %v839_v1, %v236_v16  ;;  %vm245_vm0 = vcmp.gt.f32.partialorder %v237_v17, 0.0  ;;  %vm246_vm1 = vcmp.gt.f32.partialorder %v238_v18, 0.0  ;;  %vm247_vm2 = vcmp.gt.f32.partialorder %v239_v20, 0.0 }
  0x23   :  { %v104_v31 = vadd.f32 %v103_v19, %v97_v60  ;;  %v199_v35 = vadd.f32 %v198_v23, %v197_v15  ;;  %vm248_vm3 = vcmp.gt.f32.partialorder %v240_v21, 0.0  ;;  %vm249_vm4 = vcmp.gt.f32.partialorder %v241_v22, 0.0  ;;  %v310_v60 = vld [vmem:[%s1353_s0 + $0xc8] sm:$0xff] }
  0x24   :  { %vm250_vm5 = vcmp.gt.f32.partialorder %v242_v24, 0.0  ;;  %vm251_vm6 = vcmp.gt.f32.partialorder %v243_v25, 0.0  ;;  %vm252_vm7 = vcmp.gt.f32.partialorder %v244_v26, 0.0  ;;  %v253_v37 = vmul.f32 0.2, %v237_v17 }
  0x25   :  { %v105_v36 = vadd.f32 %v104_v31, %v98_v2  ;;  %v200_v38 = vrot.slane %v199_v35, 1  ;;  %v254_v39 = vmul.f32 0.2, %v238_v18  ;;  %v255_v40 = vmul.f32 0.2, %v239_v20 }
  0x26   :  { %v317_v41 = vmul.f32 %v834_v0, %v309_v34  ;;  %v256_v45 = vmul.f32 0.2, %v240_v21  ;;  %v257_v46 = vmul.f32 0.2, %v241_v22  ;;  %v258_v47 = vmul.f32 0.2, %v242_v24 }
  0x27   :  { %v106_v44 = vadd.f32 %v105_v36, %v99_v3  ;;  %v201_v48 = vadd.f32 %v200_v38, %v199_v35  ;;  %v259_v49 = vmul.f32 0.2, %v243_v25  ;;  %v260_v50 = vmul.f32 0.2, %v244_v26 }
  0x28   :  { %v261_v51 = vsel %vm245_vm0, %v237_v17, %v253_v37  ;;  %v262_v53 = vsel %vm246_vm1, %v238_v18, %v254_v39  ;;  %v263_v54 = vsel %vm247_vm2, %v239_v20, %v255_v40  ;;  %v264_v55 = vsel %vm248_vm3, %v240_v21, %v256_v45  ;;  %v397_v45 = vld [vmem:[%s1353_s0 + $0x100] sm:$0xff] }
  0x29   :  { %v107_v52 = vadd.f32 %v106_v44, %v100_v4  ;;  %202 = vadd.xlane.f32.xlu1 %v201_v48  ;;  %v265_v56 = vsel %vm249_vm4, %v241_v22, %v257_v46  ;;  %v266_v57 = vsel %vm250_vm5, %v242_v24, %v258_v47  ;;  %v267_v58 = vsel %vm251_vm6, %v243_v25, %v259_v49  ;;  %v312_v4 = vld [vmem:[%s1353_s0 + $0xd8] sm:$0xff] }
  0x2a   :  { %v268_v59 = vsel %vm252_vm7, %v244_v26, %v260_v50  ;;  %v269_v63 = vmul.f32 %v261_v51, %v887_v27  ;;  %v270_v2 = vmul.f32 %v262_v53, %v892_v28  ;;  %v271_v3 = vmul.f32 %v263_v54, %v897_v29 }
  0x2b   :  { %v108_v62 = vrot.slane %v107_v52, 4  ;;  %v272_v7 = vmul.f32 %v264_v55, %v902_v30  ;;  %v273_v8 = vmul.f32 %v265_v56, %v907_v32  ;;  %v274_v9 = vmul.f32 %v266_v57, %v912_v33 }
  0x2c   :  { %v275_v10 = vmul.f32 %v267_v58, %v919_v42  ;;  %v276_v14 = vmul.f32 %v268_v59, %v924_v43  ;;  %v277_v15 = vadd.f32 %v270_v2, %v269_v63  ;;  %v318_v16 = vmul.f32 %v834_v0, %v310_v60 }
  0x2d   :  { %v109_v13 = vadd.f32 %v108_v62, %v107_v52  ;;  %v319_v17 = vmul.f32 %v834_v0, %v311_v61  ;;  %v320_v18 = vmul.f32 %v834_v0, %v312_v4  ;;  %v321_v19 = vmul.f32 %v834_v0, %v313_v5  ;;  %v398_v4 = vld [vmem:[%s1353_s0 + $0x108] sm:$0xff] }
  0x2e   :  { %v322_v20 = vmul.f32 %v834_v0, %v314_v6  ;;  %v278_v22 = vadd.f32 %v277_v15, %v271_v3  ;;  %v323_v23 = vmul.f32 %v834_v0, %v315_v11  ;;  %v324_v24 = vmul.f32 %v834_v0, %v316_v12  ;;  %v401_v11 = vld [vmem:[%s1353_s0 + $0x120] sm:$0xff] }
  0x2f   :  { %v110_v21 = vrot.slane %v109_v13, 2  ;;  %v325_v25 = vadd.f32 %v839_v1, %v317_v41  ;;  %v326_v26 = vadd.f32 %v839_v1, %v318_v16  ;;  %v327_v31 = vadd.f32 %v839_v1, %v319_v17  ;;  %v402_v16 = vld [vmem:[%s1353_s0 + $0x128] sm:$0xff]  ;;  %v403_v17 = vld [vmem:[%s1353_s0 + $0x130] sm:$0xff] }
  0x30   :  { %v328_v34 = vadd.f32 %v839_v1, %v320_v18  ;;  %v279_v36 = vadd.f32 %v278_v22, %v272_v7  ;;  %v329_v37 = vadd.f32 %v839_v1, %v321_v19  ;;  %v330_v38 = vadd.f32 %v839_v1, %v322_v20  ;;  %v404_v18 = vld [vmem:[%s1353_s0 + $0x138] sm:$0xff] }
  0x31   :  { %v111_v35 = vadd.f32 %v110_v21, %v109_v13  ;;  %v331_v39 = vadd.f32 %v839_v1, %v323_v23  ;;  %v332_v40 = vadd.f32 %v839_v1, %v324_v24  ;;  %vm333_vm8 = vcmp.gt.f32.partialorder %v325_v25, 0.0 }
  0x32   :  { %vm334_vm9 = vcmp.gt.f32.partialorder %v326_v26, 0.0  ;;  %v280_v41 = vadd.f32 %v279_v36, %v273_v8  ;;  %vm335_vm10 = vcmp.gt.f32.partialorder %v327_v31, 0.0  ;;  %vm336_vm11 = vcmp.gt.f32.partialorder %v328_v34, 0.0 }
  0x33   :  { %v112_v44 = vrot.slane %v111_v35, 1  ;;  %vm337_vm12 = vcmp.gt.f32.partialorder %v329_v37, 0.0  ;;  %vm338_vm13 = vcmp.gt.f32.partialorder %v330_v38, 0.0  ;;  %vm339_vm14 = vcmp.gt.f32.partialorder %v331_v39, 0.0 }
  0x34   :  { %vm340_vm15 = vcmp.gt.f32.partialorder %v332_v40, 0.0  ;;  %v281_v47 = vadd.f32 %v280_v41, %v274_v9  ;;  %v341_v48 = vmul.f32 0.2, %v325_v25  ;;  %v342_v49 = vmul.f32 0.2, %v326_v26  ;;  %v399_v9 = vld [vmem:[%s1353_s0 + $0x110] sm:$0xff] }
  0x35   :  { %v113_v46 = vadd.f32 %v112_v44, %v111_v35  ;;  %v343_v50 = vmul.f32 0.2, %v327_v31  ;;  %v344_v51 = vmul.f32 0.2, %v328_v34  ;;  %v345_v52 = vmul.f32 0.2, %v329_v37 }
  0x36   :  { %v405_v53 = vmul.f32 %v834_v0, %v397_v45  ;;  %v282_v54 = vadd.f32 %v281_v47, %v275_v10  ;;  %v346_v55 = vmul.f32 0.2, %v330_v38  ;;  %v347_v56 = vmul.f32 0.2, %v331_v39  ;;  %v400_v10 = vld [vmem:[%s1353_s0 + $0x118] sm:$0xff] }
  0x37   :  { %114 = vadd.xlane.f32.xlu0 %v113_v46  ;;  %v348_v57 = vmul.f32 0.2, %v332_v40  ;;  %v349_v58 = vsel %vm333_vm8, %v325_v25, %v341_v48  ;;  %v350_v59 = vsel %vm334_vm9, %v326_v26, %v342_v49  ;;  %v351_v60 = vsel %vm335_vm10, %v327_v31, %v343_v50 }
  0x38   :  { %v352_v61 = vsel %vm336_vm11, %v328_v34, %v344_v51  ;;  %v283_v62 = vadd.f32 %v282_v54, %v276_v14  ;;  %v353_v63 = vsel %vm337_vm12, %v329_v37, %v345_v52  ;;  %v354_v2 = vsel %vm338_vm13, %v330_v38, %v346_v55 }
  0x39   :  { %v355_v3 = vsel %vm339_vm14, %v331_v39, %v347_v56  ;;  %v356_v5 = vsel %vm340_vm15, %v332_v40, %v348_v57  ;;  %v357_v6 = vmul.f32 %v349_v58, %v887_v27  ;;  %v358_v7 = vmul.f32 %v350_v59, %v892_v28 }
  0x3a   :  { %v359_v8 = vmul.f32 %v351_v60, %v897_v29  ;;  %v284_v12 = vrot.slane %v283_v62, 4  ;;  %v360_v13 = vmul.f32 %v352_v61, %v902_v30  ;;  %v361_v14 = vmul.f32 %v353_v63, %v907_v32 }
  0x3b   :  { %v362_v15 = vmul.f32 %v354_v2, %v912_v33  ;;  %v363_v19 = vmul.f32 %v355_v3, %v919_v42  ;;  %v364_v20 = vmul.f32 %v356_v5, %v924_v43  ;;  %v365_v21 = vadd.f32 %v358_v7, %v357_v6 }
  0x3c   :  { %v406_v22 = vmul.f32 %v834_v0, %v398_v4  ;;  %v285_v23 = vadd.f32 %v284_v12, %v283_v62  ;;  %v407_v24 = vmul.f32 %v834_v0, %v399_v9  ;;  %v408_v25 = vmul.f32 %v834_v0, %v400_v10  ;;  %v485_v9 = vld [vmem:[%s1353_s0 + $0x140] sm:$0xff] }
  0x3d   :  { %v409_v26 = vmul.f32 %v834_v0, %v401_v11  ;;  %v366_v31 = vadd.f32 %v365_v21, %v359_v8  ;;  %v410_v34 = vmul.f32 %v834_v0, %v402_v16  ;;  %v411_v35 = vmul.f32 %v834_v0, %v403_v17  ;;  %v488_v16 = vld [vmem:[%s1353_s0 + $0x158] sm:$0xff]  ;;  %v489_v21 = vld [vmem:[%s1353_s0 + $0x160] sm:$0xff] }
  0x3e   :  { %v412_v36 = vmul.f32 %v834_v0, %v404_v18  ;;  %v286_v37 = vrot.slane %v285_v23, 2  ;;  %v413_v38 = vadd.f32 %v839_v1, %v405_v53  ;;  %v414_v39 = vadd.f32 %v839_v1, %v406_v22  ;;  %v490_v22 = vld [vmem:[%s1353_s0 + $0x168] sm:$0xff] }
  0x3f   :  { %v415_v40 = vadd.f32 %v839_v1, %v407_v24  ;;  %v367_v44 = vadd.f32 %v366_v31, %v360_v13  ;;  %v416_v41 = vadd.f32 %v839_v1, %v408_v25  ;;  %v417_v45 = vadd.f32 %v839_v1, %v409_v26  ;;  %v492_v31 = vld [vmem:[%s1353_s0 + $0x178] sm:$0xff] }
  0x40   :  { %v418_v46 = vadd.f32 %v839_v1, %v410_v34  ;;  %v287_v47 = vadd.f32 %v286_v37, %v285_v23  ;;  %v419_v48 = vadd.f32 %v839_v1, %v411_v35  ;;  %v420_v49 = vadd.f32 %v839_v1, %v412_v36  ;;  %v491_v23 = vld [vmem:[%s1353_s0 + $0x170] sm:$0xff] }
  0x41   :  { %vm421_vm0 = vcmp.gt.f32.partialorder %v413_v38, 0.0  ;;  %v368_v50 = vadd.f32 %v367_v44, %v361_v14  ;;  %vm422_vm1 = vcmp.gt.f32.partialorder %v414_v39, 0.0  ;;  %vm423_vm2 = vcmp.gt.f32.partialorder %v415_v40, 0.0  ;;  %v486_v14 = vld [vmem:[%s1353_s0 + $0x148] sm:$0xff] }
  0x42   :  { %vm424_vm3 = vcmp.gt.f32.partialorder %v416_v41, 0.0  ;;  %v288_v51 = vrot.slane %v287_v47, 1  ;;  %vm425_vm4 = vcmp.gt.f32.partialorder %v417_v45, 0.0  ;;  %vm426_vm5 = vcmp.gt.f32.partialorder %v418_v46, 0.0 }
  0x43   :  { %vm427_vm6 = vcmp.gt.f32.partialorder %v419_v48, 0.0  ;;  %v369_v52 = vadd.f32 %v368_v50, %v362_v15  ;;  %vm428_vm7 = vcmp.gt.f32.partialorder %v420_v49, 0.0  ;;  %v429_v53 = vmul.f32 0.2, %v413_v38  ;;  %v487_v15 = vld [vmem:[%s1353_s0 + $0x150] sm:$0xff] }
  0x44   :  { %v430_v54 = vmul.f32 0.2, %v414_v39  ;;  %v289_v55 = vadd.f32 %v288_v51, %v287_v47  ;;  %v431_v56 = vmul.f32 0.2, %v415_v40  ;;  %v432_v57 = vmul.f32 0.2, %v416_v41 }
  0x45   :  { %v433_v58 = vmul.f32 0.2, %v417_v45  ;;  %v370_v59 = vadd.f32 %v369_v52, %v363_v19  ;;  %v434_v60 = vmul.f32 0.2, %v418_v46  ;;  %v435_v61 = vmul.f32 0.2, %v419_v48 }
  0x46   :  { %v436_v62 = vmul.f32 0.2, %v420_v49  ;;  %290 = vadd.xlane.f32.xlu1 %v289_v55  ;;  %v437_v63 = vsel %vm421_vm0, %v413_v38, %v429_v53  ;;  %v438_v2 = vsel %vm422_vm1, %v414_v39, %v430_v54  ;;  %v439_v3 = vsel %vm423_vm2, %v415_v40, %v431_v56 }
  0x47   :  { %v440_v4 = vsel %vm424_vm3, %v416_v41, %v432_v57  ;;  %v371_v5 = vadd.f32 %v370_v59, %v364_v20  ;;  %v441_v6 = vsel %vm425_vm4, %v417_v45, %v433_v58  ;;  %v442_v7 = vsel %vm426_vm5, %v418_v46, %v434_v60 }
  0x48   :  { %v443_v8 = vsel %vm427_vm6, %v419_v48, %v435_v61  ;;  %v444_v10 = vsel %vm428_vm7, %v420_v49, %v436_v62  ;;  %v445_v11 = vmul.f32 %v437_v63, %v887_v27  ;;  %v446_v12 = vmul.f32 %v438_v2, %v892_v28 }
  0x49   :  { %v447_v13 = vmul.f32 %v439_v3, %v897_v29  ;;  %v372_v17 = vrot.slane %v371_v5, 4  ;;  %v448_v18 = vmul.f32 %v440_v4, %v902_v30  ;;  %v449_v19 = vmul.f32 %v441_v6, %v907_v32 }
  0x4a   :  { %v450_v20 = vmul.f32 %v442_v7, %v912_v33  ;;  %v451_v24 = vmul.f32 %v443_v8, %v919_v42  ;;  %v452_v25 = vmul.f32 %v444_v10, %v924_v43  ;;  %v453_v26 = vadd.f32 %v446_v12, %v445_v11 }
  0x4b   :  { %v493_v34 = vmul.f32 %v834_v0, %v485_v9  ;;  %v373_v35 = vadd.f32 %v372_v17, %v371_v5  ;;  %v494_v36 = vmul.f32 %v834_v0, %v486_v14  ;;  %v495_v37 = vmul.f32 %v834_v0, %v487_v15  ;;  %v573_v17 = vld [vmem:[%s1353_s0 + $0x180] sm:$0xff] }
  0x4c   :  { %v496_v38 = vmul.f32 %v834_v0, %v488_v16  ;;  %v454_v39 = vadd.f32 %v453_v26, %v447_v13  ;;  %v497_v40 = vmul.f32 %v834_v0, %v489_v21  ;;  %v498_v44 = vmul.f32 %v834_v0, %v490_v22  ;;  %v578_v26 = vld [vmem:[%s1353_s0 + $0x1a8] sm:$0xff] }
  0x4d   :  { %v499_v41 = vmul.f32 %v834_v0, %v491_v23  ;;  %v374_v45 = vrot.slane %v373_v35, 2  ;;  %v500_v46 = vmul.f32 %v834_v0, %v492_v31  ;;  %v501_v47 = vadd.f32 %v839_v1, %v493_v34 }
  0x4e   :  { %v502_v48 = vadd.f32 %v839_v1, %v494_v36  ;;  %v455_v49 = vadd.f32 %v454_v39, %v448_v18  ;;  %v503_v50 = vadd.f32 %v839_v1, %v495_v37  ;;  %v504_v51 = vadd.f32 %v839_v1, %v496_v38  ;;  %v574_v18 = vld [vmem:[%s1353_s0 + $0x188] sm:$0xff]  ;;  %v579_v37 = vld [vmem:[%s1353_s0 + $0x1b0] sm:$0xff]  ;;  %v580_v38 = vld [vmem:[%s1353_s0 + $0x1b8] sm:$0xff] }
  0x4f   :  { %v505_v52 = vadd.f32 %v839_v1, %v497_v40  ;;  %v375_v53 = vadd.f32 %v374_v45, %v373_v35  ;;  %v506_v54 = vadd.f32 %v839_v1, %v498_v44  ;;  %v507_v55 = vadd.f32 %v839_v1, %v499_v41 }
  0x50   :  { %v508_v56 = vadd.f32 %v839_v1, %v500_v46  ;;  %v456_v57 = vadd.f32 %v455_v49, %v449_v19  ;;  %vm509_vm8 = vcmp.gt.f32.partialorder %v501_v47, 0.0  ;;  %vm510_vm9 = vcmp.gt.f32.partialorder %v502_v48, 0.0  ;;  %v575_v19 = vld [vmem:[%s1353_s0 + $0x190] sm:$0xff] }
  0x51   :  { %vm511_vm10 = vcmp.gt.f32.partialorder %v503_v50, 0.0  ;;  %v376_v58 = vrot.slane %v375_v53, 1  ;;  %vm512_vm11 = vcmp.gt.f32.partialorder %v504_v51, 0.0  ;;  %vm513_vm12 = vcmp.gt.f32.partialorder %v505_v52, 0.0 }
  0x52   :  { %vm514_vm13 = vcmp.gt.f32.partialorder %v506_v54, 0.0  ;;  %v457_v59 = vadd.f32 %v456_v57, %v450_v20  ;;  %vm515_vm14 = vcmp.gt.f32.partialorder %v507_v55, 0.0  ;;  %vm516_vm15 = vcmp.gt.f32.partialorder %v508_v56, 0.0 }
  0x53   :  { %v517_v60 = vmul.f32 0.2, %v501_v47  ;;  %v377_v61 = vadd.f32 %v376_v58, %v375_v53  ;;  %v518_v62 = vmul.f32 0.2, %v502_v48  ;;  %v519_v63 = vmul.f32 0.2, %v503_v50 }
  0x54   :  { %v520_v2 = vmul.f32 0.2, %v504_v51  ;;  %v458_v3 = vadd.f32 %v457_v59, %v451_v24  ;;  %v521_v4 = vmul.f32 0.2, %v505_v52  ;;  %v522_v5 = vmul.f32 0.2, %v506_v54 }
  0x55   :  { %v523_v6 = vmul.f32 0.2, %v507_v55  ;;  %378 = vadd.xlane.f32.xlu0 %v377_v61  ;;  %v524_v7 = vmul.f32 0.2, %v508_v56  ;;  %v525_v8 = vsel %vm509_vm8, %v501_v47, %v517_v60  ;;  %v526_v9 = vsel %vm510_vm9, %v502_v48, %v518_v62  ;;  %v576_v24 = vld [vmem:[%s1353_s0 + $0x198] sm:$0xff] }
  0x56   :  { %v527_v10 = vsel %vm511_vm10, %v503_v50, %v519_v63  ;;  %v459_v11 = vadd.f32 %v458_v3, %v452_v25  ;;  %v528_v12 = vsel %vm512_vm11, %v504_v51, %v520_v2  ;;  %v529_v13 = vsel %vm513_vm12, %v505_v52, %v521_v4  ;;  %v577_v25 = vld [vmem:[%s1353_s0 + $0x1a0] sm:$0xff] }
  0x57   :  { %v530_v14 = vsel %vm514_vm13, %v506_v54, %v522_v5  ;;  %v533_v15 = vmul.f32 %v525_v8, %v887_v27  ;;  %v534_v16 = vmul.f32 %v526_v9, %v892_v28  ;;  %v531_v21 = vsel %vm515_vm14, %v507_v55, %v523_v6 }
  0x58   :  { %v460_v20 = vrot.slane %v459_v11, 4  ;;  %v532_v22 = vsel %vm516_vm15, %v508_v56, %v524_v7  ;;  %v535_v23 = vmul.f32 %v527_v10, %v897_v29  ;;  %v536_v31 = vmul.f32 %v528_v12, %v902_v30 }
  0x59   :  { %v537_v34 = vmul.f32 %v529_v13, %v907_v32  ;;  %v538_v35 = vmul.f32 %v530_v14, %v912_v33  ;;  %v541_v36 = vadd.f32 %v534_v16, %v533_v15  ;;  %v581_v40 = vmul.f32 %v834_v0, %v573_v17 }
  0x5a   :  { %v461_v39 = vadd.f32 %v460_v20, %v459_v11  ;;  %v582_v44 = vmul.f32 %v834_v0, %v574_v18  ;;  %v583_v41 = vmul.f32 %v834_v0, %v575_v19  ;;  %v584_v46 = vmul.f32 %v834_v0, %v576_v24  ;;  %v661_v18 = vld [vmem:[%s1353_s0 + $0x1c0] sm:$0xff] }
  0x5b   :  { %v542_v45 = vadd.f32 %v541_v36, %v535_v23  ;;  %v585_v47 = vmul.f32 %v834_v0, %v577_v25  ;;  %v586_v48 = vmul.f32 %v834_v0, %v578_v26  ;;  %v587_v50 = vmul.f32 %v834_v0, %v579_v37  ;;  %v663_v26 = vld [vmem:[%s1353_s0 + $0x1d0] sm:$0xff]  ;;  %v665_v37 = vld [vmem:[%s1353_s0 + $0x1e0] sm:$0xff] }
  0x5c   :  { %v462_v49 = vrot.slane %v461_v39, 2  ;;  %v588_v51 = vmul.f32 %v834_v0, %v580_v38  ;;  %v589_v52 = vadd.f32 %v839_v1, %v581_v40  ;;  %v590_v54 = vadd.f32 %v839_v1, %v582_v44  ;;  %v666_v40 = vld [vmem:[%s1353_s0 + $0x1e8] sm:$0xff] }
  0x5d   :  { %v543_v53 = vadd.f32 %v542_v45, %v536_v31  ;;  %v591_v55 = vadd.f32 %v839_v1, %v583_v41  ;;  %v592_v56 = vadd.f32 %v839_v1, %v584_v46  ;;  %v539_v58 = vmul.f32 %v531_v21, %v919_v42  ;;  %v664_v31 = vld [vmem:[%s1353_s0 + $0x1d8] sm:$0xff] }
  0x5e   :  { %v463_v57 = vadd.f32 %v462_v49, %v461_v39  ;;  %v540_v59 = vmul.f32 %v532_v22, %v924_v43  ;;  %v593_v61 = vadd.f32 %v839_v1, %v585_v47  ;;  %v594_v62 = vadd.f32 %v839_v1, %v586_v48  ;;  %v662_v22 = vld [vmem:[%s1353_s0 + $0x1c8] sm:$0xff] }
  0x5f   :  { %v544_v60 = vadd.f32 %v543_v53, %v537_v34  ;;  %v595_v2 = vadd.f32 %v839_v1, %v587_v50  ;;  %v596_v3 = vadd.f32 %v839_v1, %v588_v51  ;;  %vm597_vm0 = vcmp.gt.f32.partialorder %v589_v52, 0.0 }
  0x60   :  { %v464_v63 = vrot.slane %v463_v57, 1  ;;  %vm598_vm1 = vcmp.gt.f32.partialorder %v590_v54, 0.0  ;;  %vm599_vm2 = vcmp.gt.f32.partialorder %v591_v55, 0.0  ;;  %vm600_vm3 = vcmp.gt.f32.partialorder %v592_v56, 0.0 }
  0x61   :  { %v545_v4 = vadd.f32 %v544_v60, %v538_v35  ;;  %v605_v6 = vmul.f32 0.2, %v589_v52  ;;  %v606_v7 = vmul.f32 0.2, %v590_v54  ;;  %v607_v8 = vmul.f32 0.2, %v591_v55 }
  0x62   :  { %v465_v5 = vadd.f32 %v464_v63, %v463_v57  ;;  %vm601_vm4 = vcmp.gt.f32.partialorder %v593_v61, 0.0  ;;  %v608_v10 = vmul.f32 0.2, %v592_v56  ;;  %v609_v11 = vmul.f32 0.2, %v593_v61 }
  0x63   :  { %v546_v9 = vadd.f32 %v545_v4, %v539_v58  ;;  %v610_v12 = vmul.f32 0.2, %v594_v62  ;;  %v613_v13 = vsel %vm597_vm0, %v589_v52, %v605_v6  ;;  %v614_v14 = vsel %vm598_vm1, %v590_v54, %v606_v7  ;;  %v667_v52 = vld [vmem:[%s1353_s0 + $0x1f0] sm:$0xff]  ;;  %v668_v54 = vld [vmem:[%s1353_s0 + $0x1f8] sm:$0xff] }
  0x64   :  { %466 = vadd.xlane.f32.xlu1 %v465_v5  ;;  %vm602_vm5 = vcmp.gt.f32.partialorder %v594_v62, 0.0  ;;  %v615_v16 = vsel %vm599_vm2, %v591_v55, %v607_v8  ;;  %v616_v17 = vsel %vm600_vm3, %v592_v56, %v608_v10  ;;  %vm603_vm6 = vcmp.gt.f32.partialorder %v595_v2, 0.0 }
  0x65   :  { %v547_v15 = vadd.f32 %v546_v9, %v540_v59  ;;  %v611_v19 = vmul.f32 0.2, %v595_v2  ;;  %v612_v20 = vmul.f32 0.2, %v596_v3  ;;  %v621_v21 = vmul.f32 %v613_v13, %v887_v27 }
  0x66   :  { %vm604_vm7 = vcmp.gt.f32.partialorder %v596_v3, 0.0  ;;  %v622_v24 = vmul.f32 %v614_v14, %v892_v28  ;;  %v623_v25 = vmul.f32 %v615_v16, %v897_v29  ;;  %v617_v34 = vsel %vm601_vm4, %v593_v61, %v609_v11 }
  0x67   :  { %v548_v23 = vrot.slane %v547_v15, 4  ;;  %v618_v35 = vsel %vm602_vm5, %v594_v62, %v610_v12  ;;  %v624_v36 = vmul.f32 %v616_v17, %v902_v30  ;;  %v669_v44 = vmul.f32 %v834_v0, %v661_v18 }
  0x68   :  { %v629_v39 = vadd.f32 %v622_v24, %v621_v21  ;;  %v670_v41 = vmul.f32 %v834_v0, %v662_v22  ;;  %v619_v45 = vsel %vm603_vm6, %v595_v2, %v611_v19  ;;  %v620_v46 = vsel %vm604_vm7, %v596_v3, %v612_v20 }
  0x69   :  { %v549_v38 = vadd.f32 %v548_v23, %v547_v15  ;;  %v671_v47 = vmul.f32 %v834_v0, %v663_v26  ;;  %v672_v48 = vmul.f32 %v834_v0, %v664_v31  ;;  %v625_v50 = vmul.f32 %v617_v34, %v907_v32 }
  0x6a   :  { %v630_v51 = vadd.f32 %v629_v39, %v623_v25  ;;  %v673_v53 = vmul.f32 %v834_v0, %v665_v37  ;;  %v674_v55 = vmul.f32 %v834_v0, %v666_v40  ;;  %v677_v56 = vadd.f32 %v839_v1, %v669_v44 }
  0x6b   :  { %v550_v49 = vrot.slane %v549_v38, 2  ;;  %v678_v57 = vadd.f32 %v839_v1, %v670_v41  ;;  %v679_v58 = vadd.f32 %v839_v1, %v671_v47  ;;  %v626_v60 = vmul.f32 %v618_v35, %v912_v33 }
  0x6c   :  { %v631_v61 = vadd.f32 %v630_v51, %v624_v36  ;;  %v627_v62 = vmul.f32 %v619_v45, %v919_v42  ;;  %v628_v63 = vmul.f32 %v620_v46, %v924_v43  ;;  %v675_v2 = vmul.f32 %v834_v0, %v667_v52 }
  0x6d   :  { %v551_v59 = vadd.f32 %v550_v49, %v549_v38  ;;  %v680_v3 = vadd.f32 %v839_v1, %v672_v48  ;;  %v676_v6 = vmul.f32 %v834_v0, %v668_v54  ;;  %v681_v7 = vadd.f32 %v839_v1, %v673_v53 }
  0x6e   :  { %v632_v5 = vadd.f32 %v631_v61, %v625_v50  ;;  %v682_v8 = vadd.f32 %v839_v1, %v674_v55  ;;  %vm685_vm8 = vcmp.gt.f32.partialorder %v677_v56, 0.0  ;;  %vm686_vm9 = vcmp.gt.f32.partialorder %v678_v57, 0.0  ;;  %v798_v1 = vld [vmem:[%s1354_s2] ss:$0 sm:$0xff] }
  0x6f   :  { %v552_v4 = vrot.slane %v551_v59, 1  ;;  %vm687_vm10 = vcmp.gt.f32.partialorder %v679_v58, 0.0  ;;  %v693_v10 = vmul.f32 0.2, %v677_v56  ;;  %v694_v11 = vmul.f32 0.2, %v678_v57 }
  0x70   :  { %v633_v9 = vadd.f32 %v632_v5, %v626_v60  ;;  %vm688_vm11 = vcmp.gt.f32.partialorder %v680_v3, 0.0  ;;  %v695_v12 = vmul.f32 0.2, %v679_v58  ;;  %v696_v13 = vmul.f32 0.2, %v680_v3 }
  0x71   :  { %v553_v33 = vadd.f32 %v552_v4, %v551_v59  ;;  %v10_v14 = vstv %s1356_s4  ;;  %v683_v15 = vadd.f32 %v798_v1, %v675_v2  ;;  %v697_v16 = vmul.f32 0.2, %v681_v7 }
  0x72   :  { %v634_v0 = vadd.f32 %v633_v9, %v627_v62  ;;  %11 = vst [vmem:[#allocation2] sm:$0x1] %v10_v14  ;;  %vm689_vm12 = vcmp.gt.f32.partialorder %v681_v7, 0.0  ;;  %v701_v17 = vsel %vm685_vm8, %v677_v56, %v693_v10  ;;  %v702_v18 = vsel %vm686_vm9, %v678_v57, %v694_v11 }
  0x73   :  { %554 = vadd.xlane.f32.xlu0 %v553_v33  ;;  %v703_v19 = vsel %vm687_vm10, %v679_v58, %v695_v12  ;;  %v684_v21 = vadd.f32 %v798_v1, %v676_v6  ;;  %v698_v22 = vmul.f32 0.2, %v682_v8  ;;  %v704_v23 = vsel %vm688_vm11, %v680_v3, %v696_v13 }
  0x74   :  { %v635_v20 = vadd.f32 %v634_v0, %v628_v63  ;;  %vm690_vm13 = vcmp.gt.f32.partialorder %v682_v8, 0.0  ;;  %v709_v24 = vmul.f32 %v701_v17, %v887_v27  ;;  %v710_v25 = vmul.f32 %v702_v18, %v892_v28  ;;  %v799_v28 = vld [vmem:[%s1355_s3 + $0x28] sm:$0xff] }
  0x75   :  { %v711_v26 = vmul.f32 %v703_v19, %v897_v29  ;;  %v699_v34 = vmul.f32 0.2, %v683_v15  ;;  %v705_v35 = vsel %vm689_vm12, %v681_v7, %v697_v16  ;;  %vm691_vm14 = vcmp.gt.f32.partialorder %v683_v15, 0.0 }
  0x76   :  { %v636_v31 = vrot.slane %v635_v20, 4  ;;  %v712_v36 = vmul.f32 %v704_v23, %v902_v30  ;;  %v717_v37 = vadd.f32 %v710_v25, %v709_v24  ;;  %v700_v39 = vmul.f32 0.2, %v684_v21 }
  0x77   :  { %v706_v40 = vsel %vm690_vm13, %v682_v8, %v698_v22  ;;  %vm692_vm15 = vcmp.gt.f32.partialorder %v684_v21, 0.0  ;;  %v713_v44 = vmul.f32 %v705_v35, %v907_v32  ;;  %v707_v27 = vsel %vm691_vm14, %v683_v15, %v699_v34 }
  0x78   :  { %v637_v38 = vadd.f32 %v636_v31, %v635_v20  ;;  %v718_v41 = vadd.f32 %v717_v37, %v711_v26  ;;  %v714_v29 = vmul.f32 %v799_v28, %v706_v40  ;;  %v708_v48 = vsel %vm692_vm15, %v684_v21, %v700_v39 }
  0x79   :  { %v715_v30 = vmul.f32 %v707_v27, %v919_v42  ;;  %v716_v51 = vmul.f32 %v708_v48, %v924_v43  ;;  %v800_v61 = vmov 0   ;;  %v32_v42 = vld [vmem:[#allocation2] sm:$0x1] }
  0x7a   :  { %v638_v45 = vrot.slane %v637_v38, 2  ;;  %v719_v46 = vadd.f32 %v718_v41, %v712_v36  ;;  %765 = vset.pattern.permute.xlu1 %v800_v61  ;;  %764 = vset.pattern.permute.xlu0 %v800_v61 }
  0x7c   :  { %v639_v47 = vadd.f32 %v638_v45, %v637_v38  ;;  %v720_v49 = vadd.f32 %v719_v46, %v713_v44 }
  0x7e   :  { %v640_v50 = vrot.slane %v639_v47, 1  ;;  %v721_v52 = vadd.f32 %v720_v49, %v714_v29 }
  0x80   :  { %v641_v53 = vadd.f32 %v640_v50, %v639_v47  ;;  %v722_v32 = vadd.f32 %v721_v52, %v715_v30  ;;  %v128_v30 = vlaneseq }
  0x82   :  { %642 = vadd.xlane.f32.xlu0 %v641_v53  ;;  %v723_v54 = vadd.f32 %v722_v32, %v716_v51  ;;  %v129_v49 = vshrl.u32 %v128_v30, 7 }
  0x84   :  { %v724_v55 = vrot.slane %v723_v54, 4  ;;  %v130_v50 = vsub.s32 0, %v129_v49 }
  0x86   :  { %v725_v56 = vadd.f32 %v724_v55, %v723_v54 }
  0x88   :  { %v726_v57 = vrot.slane %v725_v56, 2 }
  0x8a   :  { %v727_v58 = vadd.f32 %v726_v57, %v725_v56 }
  0x8c   :  { %v728_v59 = vrot.slane %v727_v58, 1 }
  0x8e   :  { %v729_v60 = vadd.f32 %v728_v59, %v727_v58 }
  0x90   :  { %730 = vadd.xlane.f32.xlu0 %v729_v60 }
  0xb2   :  { %v203_v62 = vpop.xlane.xlu1 %202 }
  0xb3   :  { %v204_v63 = vadd.f32 %v203_v62, %v32_v42 }
  0xb5   :  { %v756_v2 = vmul.f32 -1.442695, %v204_v63 }
  0xb7   :  { %766 = vpow2.f32 %v756_v2 }
  0xc0   :  { %v115_v43 = vpop.xlane.xlu0 %114 }
  0xc1   :  { %v116_v3 = vadd.f32 %v115_v43, %v32_v42 }
  0xc3   :  { %v755_v4 = vmul.f32 -1.442695, %v116_v3 }
  0xc4   :  { %v767_v5 = vpop.eup %766 }
  0xc5   :  { %768 = vpow2.f32 %v755_v4  ;;  %v208_v6 = vadd.f32 1.0, %v767_v5 }
  0xc7   :  { %770 = vrcp.f32 %v208_v6 }
  0xcf   :  { %v291_v7 = vpop.xlane.xlu1 %290 }
  0xd0   :  { %v292_v8 = vadd.f32 %v291_v7, %v32_v42 }
  0xd2   :  { %v769_v33 = vpop.eup %768  ;;  %v757_v10 = vmul.f32 -1.442695, %v292_v8 }
  0xd3   :  { %v120_v9 = vadd.f32 1.0, %v769_v33 }
  0xd4   :  { %v771_v11 = vpop.eup %770 }
  0xd5   :  { %772 = vrcp.f32 %v120_v9  ;;  %213 = vperm.xlu1 %765, %v771_v11  }
  0xd6   :  { %774 = vpow2.f32 %v757_v10 }
  0xde   :  { %v379_v12 = vpop.xlane.xlu0 %378 }
  0xdf   :  { %v380_v13 = vadd.f32 %v379_v12, %v32_v42 }
  0xe1   :  { %v758_v0 = vmul.f32 -1.442695, %v380_v13 }
  0xe2   :  { %v773_v14 = vpop.eup %772 }
  0xe3   :  { %v775_v1 = vpop.eup %774  ;;  %125 = vperm.xlu0 %764, %v773_v14   ;;  %776 = vpow2.f32 %v758_v0 }
  0xe4   :  { %v296_v15 = vadd.f32 1.0, %v775_v1 }
  0xe6   :  { %778 = vrcp.f32 %v296_v15 }
  0xed   :  { %v467_v16 = vpop.xlane.xlu1 %466 }
  0xee   :  { %v468_v17 = vadd.f32 %v467_v16, %v32_v42 }
  0xf0   :  { %v777_v18 = vpop.eup %776  ;;  %v759_v19 = vmul.f32 -1.442695, %v468_v17 }
  0xf1   :  { %v384_v20 = vadd.f32 1.0, %v777_v18 }
  0xf2   :  { %780 = vpow2.f32 %v759_v19 }
  0xf3   :  { %v779_v21 = vpop.eup %778  ;;  %782 = vrcp.f32 %v384_v20 }
  0xf4   :  { %301 = vperm.xlu0 %764, %v779_v21  }
  0xfc   :  { %v555_v22 = vpop.xlane.xlu0 %554 }
  0xfd   :  { %v556_v23 = vadd.f32 %v555_v22, %v32_v42 }
  0xff   :  { %v781_v24 = vpop.eup %780  ;;  %v760_v25 = vmul.f32 -1.442695, %v556_v23 }
 0x100   :  { %v783_v26 = vpop.eup %782  ;;  %v472_v31 = vadd.f32 1.0, %v781_v24 }
 0x101   :  { %784 = vpow2.f32 %v760_v25  ;;  %389 = vperm.xlu1 %765, %v783_v26  }
 0x102   :  { %786 = vrcp.f32 %v472_v31 }
 0x10b   :  { %v643_v34 = vpop.xlane.xlu0 %642 }
 0x10c   :  { %v644_v35 = vadd.f32 %v643_v34, %v32_v42 }
 0x10e   :  { %v785_v36 = vpop.eup %784  ;;  %v761_v39 = vmul.f32 -1.442695, %v644_v35 }
 0x10f   :  { %v787_v37 = vpop.eup %786  ;;  %v560_v38 = vadd.f32 1.0, %v785_v36 }
 0x110   :  { %477 = vperm.xlu0 %764, %v787_v37  }
 0x111   :  { %788 = vrcp.f32 %v560_v38 }
 0x112   :  { %790 = vpow2.f32 %v761_v39 }
 0x119   :  { %v731_v40 = vpop.xlane.xlu0 %730 }
 0x11a   :  { %v732_v44 = vadd.f32 %v731_v40, %v32_v42 }
 0x11c   :  { %v762_v45 = vmul.f32 -1.442695, %v732_v44 }
 0x11e   :  { %v789_v41 = vpop.eup %788  ;;  %792 = vpow2.f32 %v762_v45 }
 0x11f   :  { %v791_v27 = vpop.eup %790  ;;  %565 = vperm.xlu1 %765, %v789_v41  }
 0x120   :  { %v648_v28 = vadd.f32 1.0, %v791_v27 }
 0x122   :  { %794 = vrcp.f32 %v648_v28 }
 0x12b   :  { %v793_v29 = vpop.eup %792 }
 0x12c   :  { %v736_v46 = vadd.f32 1.0, %v793_v29 }
 0x12e   :  { %796 = vrcp.f32 %v736_v46 }
 0x12f   :  { %v795_v47 = vpop.eup %794 }
 0x130   :  { %653 = vperm.xlu0 %764, %v795_v47  }
 0x13b   :  { %v797_v48 = vpop.eup %796 }
 0x13c   :  { %741 = vperm.xlu0 %764, %v797_v48  }
 0x150   :  { %v214_v51 = vpop.permute.xlu1 %213 }
 0x151   :  { %v219_v52 = vrot.slane %v214_v51, %v130_v50 }
 0x153   :  { %220 = vst [vmem:[%s1357_s5 + $0x1] sm:$0x1] %v219_v52 }
 0x15e   :  { %v126_v53 = vpop.permute.xlu0 %125 }
 0x15f   :  { %v131_v32 = vrot.slane %v126_v53, %v130_v50 }
 0x161   :  { %132 = vst [vmem:[%s1357_s5] sm:$0x1] %v131_v32 }
 0x16f   :  { %v302_v54 = vpop.permute.xlu0 %301 }
 0x170   :  { %v307_v55 = vrot.slane %v302_v54, %v130_v50 }
 0x172   :  { %308 = vst [vmem:[%s1357_s5 + $0x2] sm:$0x1] %v307_v55 }
 0x17c   :  { %v390_v56 = vpop.permute.xlu1 %389 }
 0x17d   :  { %v395_v57 = vrot.slane %v390_v56, %v130_v50 }
 0x17f   :  { %396 = vst [vmem:[%s1357_s5 + $0x3] sm:$0x1] %v395_v57 }
 0x18b   :  { %v478_v58 = vpop.permute.xlu0 %477 }
 0x18c   :  { %v483_v59 = vrot.slane %v478_v58, %v130_v50 }
 0x18e   :  { %484 = vst [vmem:[%s1357_s5 + $0x4] sm:$0x1] %v483_v59 }
 0x19a   :  { %v566_v60 = vpop.permute.xlu1 %565 }
 0x19b   :  { %v571_v61 = vrot.slane %v566_v60, %v130_v50 }
 0x19d   :  { %572 = vst [vmem:[%s1357_s5 + $0x5] sm:$0x1] %v571_v61 }
 0x1ab   :  { %v654_v42 = vpop.permute.xlu0 %653 }
 0x1ac   :  { %v659_v62 = vrot.slane %v654_v42, %v130_v50 }
 0x1ae   :  { %660 = vst [vmem:[%s1357_s5 + $0x6] sm:$0x1] %v659_v62 }
 0x1b7   :  { %v742_v63 = vpop.permute.xlu0 %741 }
 0x1b8   :  { %v747_v2 = vrot.slane %v742_v63, %v130_v50 }
 0x1ba   :  { %748 = vst [vmem:[%s1357_s5 + $0x7] sm:$0x1] %v747_v2 }

// kernel: discriminator_forward.4
= control target key start
LH: loop header
LB: loop body
LE: loop exit
PB: predicated region body
PF: predicated region fallthrough
CT: control target
= control target key end

     0   :  { %s6363_s18 = smov 0   ;;  %s7891_s0 = inlined_call_operand.vmem [shape: bf16[576,256], index: 0, kind: input, shape index: {}]   ;;  %s7892_s1 = inlined_call_operand.vmem [shape: bf16[576,256], index: 1, kind: input, shape index: {}]   ;;  %s7893_s2 = inlined_call_operand.vmem [shape: bf16[4,256,128], index: 2, kind: input, shape index: {}]   ;;  %s7894_s3 = inlined_call_operand.vmem [shape: f32[1,128], index: 3, kind: input, shape index: {}]   ;;  %s7895_s4 = inlined_call_operand.vmem [shape: f32[512,128], index: 4, kind: output, shape index: {0}]   ;;  %s7896_s5 = inlined_call_operand.vmem [shape: f32[16,128], index: 5, kind: output, shape index: {1}]  }
   0x1 LB: > { %s6369_s19 = sadd.s32 4294967295, %s6331_s18   ;;  %p4511_p0 = scmp.ge.s32.totalorder %s6331_s18, 1  ;;  %s6331_s18 = sphi %s6363_s18, %s16_s18  }
   0x2   : > { %p204_p1 = scmp.lt.s32.totalorder %s6331_s18, 3 }
   0x4   : > { %p205_p2 = pnand %p4511_p0, %p204_p1 }
   0x5   : > { %s243_s27 = smul.u32 (!%p205_p2), 36, %s6369_s19  ;;  %s4516_s28 = sshll.u32 (!%p205_p2), %s6369_s19, 5 }
   0x6   : > { %208 = sbr.rel (%p205_p2) target bundleno = 529 (0x211), region = 36  ;;  %p7558_p4 = scmp.lt.s32.totalorder (!%p205_p2), %s4516_s28, 63 }
   0x7   : > { %p244_p3 = scmp.lt.s32.totalorder (!%p205_p2), %s243_s27, 71  ;;  %p263_p5 = scmp.lt.s32.totalorder (!%p205_p2), %s6369_s19, 1 }
   0xb   : > { %v5940_v0 = vld [vmem:[%s7893_s2 + $0xf8] sm:$0xff]   ;;  %v5944_v4 = vld [vmem:[%s7893_s2 + $0xf0] sm:$0xff]   ;;  %v5948_v8 = vld [vmem:[%s7893_s2 + $0xe8] sm:$0xff]   ;;  %s7899_s27 = smov (!%p244_p3, %s243_s27), 71  ;;  %s7901_s28 = smov (!%p7558_p4, %s4516_s28), 63 }
   0xc   : > { %v5941_v1 = vld [vmem:[%s7893_s2 + $0x78] sm:$0xff]   ;;  %5292 = vmatprep.subr.bf16.mxu0 %v5940_v0  ;;  %v5945_v5 = vld [vmem:[%s7893_s2 + $0x70] sm:$0xff]   ;;  %v5949_v9 = vld [vmem:[%s7893_s2 + $0x68] sm:$0xff]   ;;  %s5290_s30 = sshll.u32 %s7899_s27, 3  ;;  %s4517_s26 = sshll.u32 %s7901_s28, 3 }
   0xd   : > { %v5942_v2 = vld [vmem:[%s7893_s2 + $0xb8] sm:$0xff]   ;;  %5332 = vmatprep.subr.bf16.mxu1 %v5941_v1  ;;  %v5946_v6 = vld [vmem:[%s7893_s2 + $0xb0] sm:$0xff]   ;;  %v5950_v10 = vld [vmem:[%s7893_s2 + $0xa8] sm:$0xff]   ;;  %s6467_s14 = scalar_lea.vmem %s7892_s1, %s5290_s30  ;;  %s6472_s16 = scalar_lea.vmem %s7891_s0, %s5290_s30 }
   0xe   : > { %v5943_v3 = vld [vmem:[%s7893_s2 + $0x38] sm:$0xff]   ;;  %5293 = vmatpush3.bf16.msra.mxu0 %v5942_v2  ;;  %v5947_v7 = vld [vmem:[%s7893_s2 + $0x30] sm:$0xff]   ;;  %v5951_v11 = vld [vmem:[%s7893_s2 + $0x28] sm:$0xff]   ;;  %s7637_s11 = scalar_lea.vmem %s7895_s4, %s4517_s26  ;;  %s7903_s19 = smov (!%p263_p5, %s6369_s19), 1 }
   0xf   : > { %5333 = vmatpush3.bf16.msra.mxu1 %v5943_v3  ;;  %5294 = vmatprep.subr.bf16.mxu0 %v5944_v4  ;;  %v5952_v12 = vld [vmem:[%s7893_s2 + $0xe0] sm:$0xff]   ;;  %v5956_v16 = vld [vmem:[%s7893_s2 + $0xd8] sm:$0xff]   ;;  %v5960_v20 = vld [vmem:[%s7893_s2 + $0xd0] sm:$0xff]   ;;  %s4518_s27 = sshll.u32 %s7903_s19, 3 }
  0x10   : > { %5334 = vmatprep.subr.bf16.mxu1 %v5945_v5  ;;  %v5953_v13 = vld [vmem:[%s7893_s2 + $0x60] sm:$0xff]   ;;  %v5957_v17 = vld [vmem:[%s7893_s2 + $0x58] sm:$0xff]   ;;  %v5961_v21 = vld [vmem:[%s7893_s2 + $0x50] sm:$0xff]   ;;  %s266_s20 = scalar_lea.vmem %s7896_s5, %s4518_s27 }
  0x11   : > { %v5954_v14 = vld [vmem:[%s7893_s2 + $0xa0] sm:$0xff]   ;;  %v5958_v18 = vld [vmem:[%s7893_s2 + $0x98] sm:$0xff]   ;;  %v5962_v22 = vld [vmem:[%s7893_s2 + $0x90] sm:$0xff]  }
  0x12   : > { %5295 = vmatpush3.bf16.msra.mxu0 %v5946_v6  ;;  %v5955_v15 = vld [vmem:[%s7893_s2 + $0x20] sm:$0xff]   ;;  %v5959_v19 = vld [vmem:[%s7893_s2 + $0x18] sm:$0xff]   ;;  %v5963_v23 = vld [vmem:[%s7893_s2 + $0x10] sm:$0xff]  }
  0x13   : > { %5335 = vmatpush3.bf16.msra.mxu1 %v5947_v7  ;;  %5296 = vmatprep.subr.bf16.mxu0 %v5948_v8  ;;  %v5964_v24 = vld [vmem:[%s7893_s2 + $0xc8] sm:$0xff]   ;;  %v5968_v28 = vld [vmem:[%s7893_s2 + $0xc0] sm:$0xff]   ;;  %v5976_v40 = vld [vmem:[%s7893_s2 + $0x178] sm:$0xff]  }
  0x14   : > { %5336 = vmatprep.subr.bf16.mxu1 %v5949_v9  ;;  %v5965_v25 = vld [vmem:[%s7893_s2 + $0x48] sm:$0xff]   ;;  %v5969_v29 = vld [vmem:[%s7893_s2 + $0x40] sm:$0xff]   ;;  %v5977_v41 = vld [vmem:[%s7893_s2 + $0x1f8] sm:$0xff]  }
  0x15   : > { %v5966_v26 = vld [vmem:[%s7893_s2 + $0x88] sm:$0xff]   ;;  %v5970_v30 = vld [vmem:[%s7893_s2 + $0x80] sm:$0xff]   ;;  %v5978_v42 = vld [vmem:[%s7893_s2 + $0x138] sm:$0xff]  }
  0x16   : > { %5297 = vmatpush3.bf16.msra.mxu0 %v5950_v10  ;;  %v5967_v27 = vld [vmem:[%s7893_s2 + $0x8] sm:$0xff]   ;;  %v5971_v31 = vld [vmem:[%s7893_s2] sm:$0xff]   ;;  %v5979_v43 = vld [vmem:[%s7893_s2 + $0x1b8] sm:$0xff]  }
  0x17   : > { %5337 = vmatpush3.bf16.msra.mxu1 %v5951_v11  ;;  %5298 = vmatprep.subr.bf16.mxu0 %v5952_v12  ;;  %v309_v32 = vld [vmem:[%s6467_s14] sm:$0xff]  ;;  %v6482_v33 = vld [vmem:[%s6467_s14 + $0x8] sm:$0xff]  ;;  %v5980_v44 = vld [vmem:[%s7893_s2 + $0x170] sm:$0xff]  }
  0x18   : > { %5338 = vmatprep.subr.bf16.mxu1 %v5953_v13  ;;  %v269_v34 = vld [vmem:[%s6472_s16] sm:$0xff]  ;;  %v4551_v35 = vcombine.low %v309_v32, %v6482_v33  ;;  %v4552_v36 = vcombine.high %v309_v32, %v6482_v33  ;;  %v6488_v37 = vld [vmem:[%s6472_s16 + $0x8] sm:$0xff]  ;;  %v5981_v45 = vld [vmem:[%s7893_s2 + $0x1f0] sm:$0xff]  }
  0x19   : > { %v4575_v38 = vcombine.low %v269_v34, %v6488_v37  ;;  %v4576_v39 = vcombine.high %v269_v34, %v6488_v37  ;;  %v5982_v46 = vld [vmem:[%s7893_s2 + $0x130] sm:$0xff]   ;;  %v6520_v49 = vld [vmem:[%s6467_s14 + $0x18] sm:$0xff]  ;;  %v5988_v56 = vld [vmem:[%s7893_s2 + $0x168] sm:$0xff]  }
  0x1a   : > { %5299 = vmatpush3.bf16.msra.mxu0 %v5954_v14  ;;  %518 = vmatprep.mubr.bf16.mxu0 %v4552_v36  ;;  %v5983_v47 = vld [vmem:[%s7893_s2 + $0x1b0] sm:$0xff]   ;;  %v6528_v52 = vld [vmem:[%s6472_s16 + $0x18] sm:$0xff]  ;;  %v5989_v57 = vld [vmem:[%s7893_s2 + $0x1e8] sm:$0xff]  }
  0x1b   : > { %5339 = vmatpush3.bf16.msra.mxu1 %v5955_v15  ;;  %5300 = vmatprep.subr.bf16.mxu0 %v5956_v16  ;;  %v6517_v48 = vld [vmem:[%s6467_s14 + $0x10] sm:$0xff]  ;;  %v5990_v58 = vld [vmem:[%s7893_s2 + $0x128] sm:$0xff]   ;;  %v5992_v60 = vld [vmem:[%s7893_s2 + $0x160] sm:$0xff]  }
  0x1c   : > { %5340 = vmatprep.subr.bf16.mxu1 %v5957_v17  ;;  %719 = vmatprep.mubr.bf16.mxu1 %v4576_v39  ;;  %v4554_v50 = vcombine.high %v6517_v48, %v6520_v49  ;;  %v6525_v51 = vld [vmem:[%s6472_s16 + $0x10] sm:$0xff]  ;;  %v4553_v53 = vcombine.low %v6517_v48, %v6520_v49  ;;  %v5991_v59 = vld [vmem:[%s7893_s2 + $0x1a8] sm:$0xff]   ;;  %v5993_v61 = vld [vmem:[%s7893_s2 + $0x1e0] sm:$0xff]   ;;  %v4687_v36 = vcombine.low %v6482_v33, %v6517_v48 }
  0x1d   : > { %v4578_v54 = vcombine.high %v6525_v51, %v6528_v52  ;;  %v4577_v55 = vcombine.low %v6525_v51, %v6528_v52  ;;  %v5994_v62 = vld [vmem:[%s7893_s2 + $0x120] sm:$0xff]   ;;  %v6564_v1 = vld [vmem:[%s6467_s14 + $0x28] sm:$0xff]  ;;  %v6000_v8 = vld [vmem:[%s7893_s2 + $0x158] sm:$0xff]  }
  0x1e   : > { %5301 = vmatpush3.bf16.msra.mxu0 %v5958_v18  ;;  %v5995_v63 = vld [vmem:[%s7893_s2 + $0x1a0] sm:$0xff]   ;;  %v6570_v3 = vld [vmem:[%s6472_s16 + $0x28] sm:$0xff]  ;;  %v6001_v9 = vld [vmem:[%s7893_s2 + $0x1d8] sm:$0xff]  }
  0x1f   : > { %5341 = vmatpush3.bf16.msra.mxu1 %v5959_v19  ;;  %5302 = vmatprep.subr.bf16.mxu0 %v5960_v20  ;;  %v6561_v0 = vld [vmem:[%s6467_s14 + $0x20] sm:$0xff]  ;;  %v6002_v10 = vld [vmem:[%s7893_s2 + $0x118] sm:$0xff]   ;;  %v6004_v12 = vld [vmem:[%s7893_s2 + $0x150] sm:$0xff]  }
  0x20   : > { %5342 = vmatprep.subr.bf16.mxu1 %v5961_v21  ;;  %v6567_v2 = vld [vmem:[%s6472_s16 + $0x20] sm:$0xff]  ;;  %v4556_v4 = vcombine.high %v6561_v0, %v6564_v1  ;;  %v4555_v6 = vcombine.low %v6561_v0, %v6564_v1  ;;  %v6003_v11 = vld [vmem:[%s7893_s2 + $0x198] sm:$0xff]   ;;  %v6005_v13 = vld [vmem:[%s7893_s2 + $0x1d0] sm:$0xff]  }
  0x21   : > { %v4580_v5 = vcombine.high %v6567_v2, %v6570_v3  ;;  %v4579_v7 = vcombine.low %v6567_v2, %v6570_v3  ;;  %v6006_v14 = vld [vmem:[%s7893_s2 + $0x110] sm:$0xff]   ;;  %v6608_v17 = vld [vmem:[%s6467_s14 + $0x38] sm:$0xff]  ;;  %v6018_v32 = vld [vmem:[%s7893_s2 + $0x100] sm:$0xff]  }
  0x22   : > { %5303 = vmatpush3.bf16.msra.mxu0 %v5962_v22  ;;  %v6007_v15 = vld [vmem:[%s7893_s2 + $0x190] sm:$0xff]   ;;  %v6616_v20 = vld [vmem:[%s6472_s16 + $0x38] sm:$0xff]  ;;  %v6019_v34 = vld [vmem:[%s7893_s2 + $0x180] sm:$0xff]  }
  0x23   : > { %5343 = vmatpush3.bf16.msra.mxu1 %v5963_v23  ;;  %5304 = vmatprep.subr.bf16.mxu0 %v5964_v24  ;;  %v6605_v16 = vld [vmem:[%s6467_s14 + $0x30] sm:$0xff]  ;;  %v6012_v24 = vld [vmem:[%s7893_s2 + $0x148] sm:$0xff]   ;;  %v6025_v39 = vld [vmem:[%s7893_s2 + $0x78] sm:$0xff]  }
  0x24   : > { %5344 = vmatprep.subr.bf16.mxu1 %v5965_v25  ;;  %v6611_v18 = vld [vmem:[%s6472_s16 + $0x30] sm:$0xff]  ;;  %v4558_v19 = vcombine.high %v6605_v16, %v6608_v17  ;;  %v4557_v21 = vcombine.low %v6605_v16, %v6608_v17  ;;  %v6013_v25 = vld [vmem:[%s7893_s2 + $0x1c8] sm:$0xff]  }
  0x25   : > { %v4582_v22 = vcombine.high %v6611_v18, %v6616_v20  ;;  %v4581_v23 = vcombine.low %v6611_v18, %v6616_v20 }
  0x26   : > { %5305 = vmatpush3.bf16.msra.mxu0 %v5966_v26  ;;  %v4632_v26 = vcombine.high %v6488_v37, %v6525_v51 }
  0x27   : > { %5345 = vmatpush3.bf16.msra.mxu1 %v5967_v27  ;;  %5306 = vmatprep.subr.bf16.mxu0 %v5968_v28  ;;  %v6014_v27 = vld [vmem:[%s7893_s2 + $0x108] sm:$0xff]   ;;  %v4688_v28 = vcombine.high %v6482_v33, %v6517_v48  ;;  %v4690_v33 = vcombine.high %v6520_v49, %v6561_v0 }
  0x28   : > { %5346 = vmatprep.subr.bf16.mxu1 %v5969_v29  ;;  %v6015_v29 = vld [vmem:[%s7893_s2 + $0x188] sm:$0xff]  }
  0x29   : > { %v6036_v48 = vld [vmem:[%s7893_s2 + $0xe8] sm:$0xff]  }
  0x2a   : > { %5307 = vmatpush3.bf16.msra.mxu0 %v5970_v30  ;;  %v6016_v30 = vld [vmem:[%s7893_s2 + $0x140] sm:$0xff]  }
  0x2b   : > { %5347 = vmatpush3.bf16.msra.mxu1 %v5971_v31  ;;  %5372 = vmatprep.subr.bf16.mxu0 %v5976_v40  ;;  %v6017_v31 = vld [vmem:[%s7893_s2 + $0x1c0] sm:$0xff]   ;;  %v4634_v40 = vcombine.high %v6528_v52, %v6567_v2 }
  0x2c   : > { %5412 = vmatprep.subr.bf16.mxu1 %v5977_v41  ;;  %v6027_v41 = vld [vmem:[%s7893_s2 + $0x38] sm:$0xff]  }
  0x2d   : > { %519 = vmatmul.mubr.bf16.vlgmr.msra.gmra.mxu0 %v4551_v35  ;;  %v4631_v35 = vcombine.low %v6488_v37, %v6525_v51  ;;  %v6026_v37 = vld [vmem:[%s7893_s2 + $0xb8] sm:$0xff]   ;;  %v4636_v51 = vcombine.high %v6570_v3, %v6611_v18 }
  0x2e   : > { %720 = vmatmul.mubr.bf16.vlgmr.msra.gmra.mxu1 %v4575_v38  ;;  %5373 = vmatpush3.bf16.msra.mxu0 %v5978_v42  ;;  %v6024_v38 = vld [vmem:[%s7893_s2 + $0xf8] sm:$0xff]   ;;  %v6028_v42 = vld [vmem:[%s7893_s2 + $0xf0] sm:$0xff]  }
  0x2f   : > { %5413 = vmatpush3.bf16.msra.mxu1 %v5979_v43  ;;  %5374 = vmatprep.subr.bf16.mxu0 %v5980_v44  ;;  %v6029_v43 = vld [vmem:[%s7893_s2 + $0x70] sm:$0xff]  }
  0x30   : > { %5414 = vmatprep.subr.bf16.mxu1 %v5981_v45  ;;  %526 = vmatprep.mubr.bf16.mxu0 %v4554_v50  ;;  %v6030_v44 = vld [vmem:[%s7893_s2 + $0xb0] sm:$0xff]   ;;  %v6037_v50 = vld [vmem:[%s7893_s2 + $0x68] sm:$0xff]  }
  0x31   : > { %727 = vmatprep.mubr.bf16.mxu1 %v4578_v54  ;;  %v6031_v45 = vld [vmem:[%s7893_s2 + $0x30] sm:$0xff]   ;;  %v6040_v54 = vld [vmem:[%s7893_s2 + $0xe0] sm:$0xff]  }
  0x32   : > { %5375 = vmatpush3.bf16.msra.mxu0 %v5982_v46  ;;  %v4633_v46 = vcombine.low %v6528_v52, %v6567_v2  ;;  %v6038_v52 = vld [vmem:[%s7893_s2 + $0xa8] sm:$0xff]   ;;  %v6054_v2 = vld [vmem:[%s7893_s2 + $0x90] sm:$0xff]  }
  0x33   : > { %5415 = vmatpush3.bf16.msra.mxu1 %v5983_v47  ;;  %5376 = vmatprep.subr.bf16.mxu0 %v5988_v56  ;;  %v4689_v47 = vcombine.low %v6520_v49, %v6561_v0  ;;  %v4692_v49 = vcombine.high %v6564_v1, %v6605_v16  ;;  %v6042_v56 = vld [vmem:[%s7893_s2 + $0xa0] sm:$0xff]   ;;  %v6052_v0 = vld [vmem:[%s7893_s2 + $0xd0] sm:$0xff]  }
  0x34   : > { %5416 = vmatprep.subr.bf16.mxu1 %v5989_v57  ;;  %v6043_v57 = vld [vmem:[%s7893_s2 + $0x20] sm:$0xff]  }
  0x35   : > { %527 = vmatmul.mubr.bf16.gmra.mxu0 %v4553_v53  ;;  %v6039_v53 = vld [vmem:[%s7893_s2 + $0x28] sm:$0xff]  }
  0x36   : > { %728 = vmatmul.mubr.bf16.gmra.mxu1 %v4577_v55  ;;  %5377 = vmatpush3.bf16.msra.mxu0 %v5990_v58  ;;  %v6041_v55 = vld [vmem:[%s7893_s2 + $0x60] sm:$0xff]   ;;  %v4635_v58 = vcombine.low %v6570_v3, %v6611_v18  ;;  %v6055_v3 = vld [vmem:[%s7893_s2 + $0x10] sm:$0xff]   ;;  %v1350_v18 = vld [vmem:[%s6467_s14 + $0x48] sm:$0xff] }
  0x37   : > { %5417 = vmatpush3.bf16.msra.mxu1 %v5991_v59  ;;  %5378 = vmatprep.subr.bf16.mxu0 %v5992_v60  ;;  %v4691_v59 = vcombine.low %v6564_v1, %v6605_v16  ;;  %v6048_v60 = vld [vmem:[%s7893_s2 + $0xd8] sm:$0xff]   ;;  %v6053_v1 = vld [vmem:[%s7893_s2 + $0x50] sm:$0xff]   ;;  %v6066_v16 = vld [vmem:[%s7893_s2 + $0x80] sm:$0xff]  }
  0x38   : > { %5418 = vmatprep.subr.bf16.mxu1 %v5993_v61  ;;  %534 = vmatprep.mubr.bf16.mxu0 %v4556_v4  ;;  %v6049_v61 = vld [vmem:[%s7893_s2 + $0x58] sm:$0xff]   ;;  %v759_v4 = vld [vmem:[%s6472_s16 + $0x40] sm:$0xff] }
  0x39   : > { %735 = vmatprep.mubr.bf16.mxu1 %v4580_v5  ;;  %v1009_v5 = vld [vmem:[%s6467_s14 + $0x40] sm:$0xff] }
  0x3a   : > { %5379 = vmatpush3.bf16.msra.mxu0 %v5994_v62  ;;  %v6050_v62 = vld [vmem:[%s7893_s2 + $0x98] sm:$0xff]  }
  0x3b   : > { %5419 = vmatpush3.bf16.msra.mxu1 %v5995_v63  ;;  %5380 = vmatprep.subr.bf16.mxu0 %v6000_v8  ;;  %v6051_v63 = vld [vmem:[%s7893_s2 + $0x18] sm:$0xff]   ;;  %v4637_v8 = vcombine.low %v6616_v20, %v759_v4 }
  0x3c   : > { %5420 = vmatprep.subr.bf16.mxu1 %v6001_v9  ;;  %v4693_v9 = vcombine.low %v6608_v17, %v1009_v5 }
  0x3d   : > { %535 = vmatmul.mubr.bf16.gmra.mxu0 %v4555_v6  ;;  %v4638_v6 = vcombine.high %v6616_v20, %v759_v4  ;;  %v1310_v20 = vld [vmem:[%s6472_s16 + $0x48] sm:$0xff]  ;;  %v6905_v4 = vld [vmem:[%s6472_s16 + $0x78] sm:$0xff] }
  0x3e   : > { %736 = vmatmul.mubr.bf16.gmra.mxu1 %v4579_v7  ;;  %5381 = vmatpush3.bf16.msra.mxu0 %v6002_v10  ;;  %v4694_v7 = vcombine.high %v6608_v17, %v1009_v5  ;;  %v6060_v10 = vld [vmem:[%s7893_s2 + $0xc8] sm:$0xff]   ;;  %v6067_v17 = vld [vmem:[%s7893_s2] sm:$0xff]  }
  0x3f   : > { %5421 = vmatpush3.bf16.msra.mxu1 %v6003_v11  ;;  %5382 = vmatprep.subr.bf16.mxu0 %v6004_v12  ;;  %v6061_v11 = vld [vmem:[%s7893_s2 + $0x48] sm:$0xff]  }
  0x40   : > { %5422 = vmatprep.subr.bf16.mxu1 %v6005_v13  ;;  %542 = vmatprep.mubr.bf16.mxu0 %v4558_v19  ;;  %v6062_v12 = vld [vmem:[%s7893_s2 + $0x88] sm:$0xff]   ;;  %v6776_v19 = vld [vmem:[%s6467_s14 + $0x50] sm:$0xff] }
  0x41   : > { %743 = vmatprep.mubr.bf16.mxu1 %v4582_v22  ;;  %v6063_v13 = vld [vmem:[%s7893_s2 + $0x8] sm:$0xff]   ;;  %v4745_v22 = vcombine.high %v1350_v18, %v6776_v19 }
  0x42   : > { %5383 = vmatpush3.bf16.msra.mxu0 %v6006_v14  ;;  %v6064_v14 = vld [vmem:[%s7893_s2 + $0xc0] sm:$0xff]  }
  0x43   : > { %5423 = vmatpush3.bf16.msra.mxu1 %v6007_v15  ;;  %5384 = vmatprep.subr.bf16.mxu0 %v6012_v24  ;;  %v6065_v15 = vld [vmem:[%s7893_s2 + $0x40] sm:$0xff]  }
  0x44   : > { %5424 = vmatprep.subr.bf16.mxu1 %v6013_v25 }
  0x45   : > { %543 = vmatmul.mubr.bf16.gmra.mxu0 %v4557_v21  ;;  %v4744_v21 = vcombine.low %v1350_v18, %v6776_v19  ;;  %v6114_v18 = vld [vmem:[%s7893_s2 + $0x100] sm:$0xff]  }
  0x46   : > { %744 = vmatmul.mubr.bf16.gmra.mxu1 %v4581_v23  ;;  %5385 = vmatpush3.bf16.msra.mxu0 %v6014_v27  ;;  %v6782_v23 = vld [vmem:[%s6472_s16 + $0x50] sm:$0xff]  ;;  %v6073_v27 = vld [vmem:[%s7893_s2 + $0x1f8] sm:$0xff]  }
  0x47   : > { %5425 = vmatpush3.bf16.msra.mxu1 %v6015_v29  ;;  %961 = vmatprep.mubr.bf16.mxu0 %v4632_v26  ;;  %v4768_v24 = vcombine.low %v1310_v20, %v6782_v23  ;;  %v4769_v25 = vcombine.high %v1310_v20, %v6782_v23  ;;  %v6072_v26 = vld [vmem:[%s7893_s2 + $0x178] sm:$0xff]   ;;  %v6115_v20 = vld [vmem:[%s7893_s2 + $0x180] sm:$0xff]  }
  0x48   : > { %5386 = vmatprep.subr.bf16.mxu0 %v6016_v30  ;;  %1211 = vmatprep.mubr.bf16.mxu1 %v4688_v28  ;;  %v6074_v28 = vld [vmem:[%s7893_s2 + $0x138] sm:$0xff]   ;;  %v6076_v30 = vld [vmem:[%s7893_s2 + $0x170] sm:$0xff]  }
  0x49   : > { %5426 = vmatprep.subr.bf16.mxu1 %v6017_v31  ;;  %v6075_v29 = vld [vmem:[%s7893_s2 + $0x1b8] sm:$0xff]   ;;  %v6077_v31 = vld [vmem:[%s7893_s2 + $0x1f0] sm:$0xff]  }
  0x4a   : > { %5387 = vmatpush3.bf16.msra.mxu0 %v6018_v32  ;;  %v6078_v32 = vld [vmem:[%s7893_s2 + $0x130] sm:$0xff]  }
  0x4b   : > { %5427 = vmatpush3.bf16.msra.mxu1 %v6019_v34  ;;  %5452 = vmatprep.subr.bf16.mxu0 %v6024_v38  ;;  %v6079_v34 = vld [vmem:[%s7893_s2 + $0x1b0] sm:$0xff]  }
  0x4c   : > { %5492 = vmatprep.subr.bf16.mxu1 %v6025_v39  ;;  %v6819_v39 = vld [vmem:[%s6472_s16 + $0x58] sm:$0xff] }
  0x4d   : > { %962 = vmatmul.mubr.bf16.vlgmr.msra.gmra.mxu0 %v4631_v35  ;;  %v6811_v35 = vld [vmem:[%s6467_s14 + $0x58] sm:$0xff] }
  0x4e   : > { %1212 = vmatmul.mubr.bf16.vlgmr.msra.gmra.mxu1 %v4687_v36  ;;  %5453 = vmatpush3.bf16.msra.mxu0 %v6026_v37  ;;  %v6814_v36 = vld [vmem:[%s6467_s14 + $0x60] sm:$0xff] }
  0x4f   : > { %5493 = vmatpush3.bf16.msra.mxu1 %v6027_v41  ;;  %969 = vmatprep.mubr.bf16.mxu0 %v4634_v40  ;;  %v4747_v38 = vcombine.high %v6811_v35, %v6814_v36  ;;  %v6822_v40 = vld [vmem:[%s6472_s16 + $0x60] sm:$0xff]  ;;  %v4746_v37 = vcombine.low %v6811_v35, %v6814_v36 }
  0x50   : > { %5454 = vmatprep.subr.bf16.mxu0 %v6028_v42  ;;  %1219 = vmatprep.mubr.bf16.mxu1 %v4690_v33  ;;  %v4771_v33 = vcombine.high %v6819_v39, %v6822_v40  ;;  %v4770_v41 = vcombine.low %v6819_v39, %v6822_v40  ;;  %v6084_v42 = vld [vmem:[%s7893_s2 + $0x168] sm:$0xff]  }
  0x51   : > { %5494 = vmatprep.subr.bf16.mxu1 %v6029_v43  ;;  %v6085_v43 = vld [vmem:[%s7893_s2 + $0x1e8] sm:$0xff]  }
  0x52   : > { %5455 = vmatpush3.bf16.msra.mxu0 %v6030_v44  ;;  %v6086_v44 = vld [vmem:[%s7893_s2 + $0x128] sm:$0xff]  }
  0x53   : > { %5495 = vmatpush3.bf16.msra.mxu1 %v6031_v45  ;;  %5456 = vmatprep.subr.bf16.mxu0 %v6036_v48  ;;  %v6087_v45 = vld [vmem:[%s7893_s2 + $0x1a8] sm:$0xff]   ;;  %v6090_v48 = vld [vmem:[%s7893_s2 + $0x120] sm:$0xff]  }
  0x54   : > { %5496 = vmatprep.subr.bf16.mxu1 %v6037_v50  ;;  %v6091_v50 = vld [vmem:[%s7893_s2 + $0x1a0] sm:$0xff]  }
  0x55   : > { %970 = vmatmul.mubr.bf16.gmra.mxu0 %v4633_v46  ;;  %v6088_v46 = vld [vmem:[%s7893_s2 + $0x160] sm:$0xff]  }
  0x56   : > { %1220 = vmatmul.mubr.bf16.gmra.mxu1 %v4689_v47  ;;  %5457 = vmatpush3.bf16.msra.mxu0 %v6038_v52  ;;  %v6089_v47 = vld [vmem:[%s7893_s2 + $0x1e0] sm:$0xff]   ;;  %v6858_v52 = vld [vmem:[%s6467_s14 + $0x70] sm:$0xff] }
  0x57   : > { %5497 = vmatpush3.bf16.msra.mxu1 %v6039_v53  ;;  %977 = vmatprep.mubr.bf16.mxu0 %v4636_v51  ;;  %v6855_v51 = vld [vmem:[%s6467_s14 + $0x68] sm:$0xff]  ;;  %v6864_v53 = vld [vmem:[%s6472_s16 + $0x70] sm:$0xff] }
  0x58   : > { %5458 = vmatprep.subr.bf16.mxu0 %v6040_v54  ;;  %1227 = vmatprep.mubr.bf16.mxu1 %v4692_v49  ;;  %v6861_v49 = vld [vmem:[%s6472_s16 + $0x68] sm:$0xff]  ;;  %v4749_v54 = vcombine.high %v6855_v51, %v6858_v52 }
  0x59   : > { %5498 = vmatprep.subr.bf16.mxu1 %v6041_v55  ;;  %v4773_v55 = vcombine.high %v6861_v49, %v6864_v53 }
  0x5a   : > { %5459 = vmatpush3.bf16.msra.mxu0 %v6042_v56  ;;  %v4748_v56 = vcombine.low %v6855_v51, %v6858_v52 }
  0x5b   : > { %5499 = vmatpush3.bf16.msra.mxu1 %v6043_v57  ;;  %5460 = vmatprep.subr.bf16.mxu0 %v6048_v60  ;;  %v4772_v57 = vcombine.low %v6861_v49, %v6864_v53  ;;  %v6098_v60 = vld [vmem:[%s7893_s2 + $0x118] sm:$0xff]  }
  0x5c   : > { %5500 = vmatprep.subr.bf16.mxu1 %v6049_v61  ;;  %v6099_v61 = vld [vmem:[%s7893_s2 + $0x198] sm:$0xff]  }
  0x5d   : > { %978 = vmatmul.mubr.bf16.gmra.mxu0 %v4635_v58  ;;  %v6096_v58 = vld [vmem:[%s7893_s2 + $0x158] sm:$0xff]  }
  0x5e   : > { %1228 = vmatmul.mubr.bf16.gmra.mxu1 %v4691_v59  ;;  %5461 = vmatpush3.bf16.msra.mxu0 %v6050_v62  ;;  %v6097_v59 = vld [vmem:[%s7893_s2 + $0x1d8] sm:$0xff]   ;;  %v6100_v62 = vld [vmem:[%s7893_s2 + $0x150] sm:$0xff]  }
  0x5f   : > { %5501 = vmatpush3.bf16.msra.mxu1 %v6051_v63  ;;  %5462 = vmatprep.subr.bf16.mxu0 %v6052_v0  ;;  %v6101_v63 = vld [vmem:[%s7893_s2 + $0x1d0] sm:$0xff]  }
  0x60   : > { %5502 = vmatprep.subr.bf16.mxu1 %v6053_v1  ;;  %985 = vmatprep.mubr.bf16.mxu0 %v4638_v6  ;;  %v6102_v0 = vld [vmem:[%s7893_s2 + $0x110] sm:$0xff]   ;;  %v6910_v6 = vld [vmem:[%s6472_s16 + $0x80] sm:$0xff] }
  0x61   : > { %1235 = vmatprep.mubr.bf16.mxu1 %v4694_v7  ;;  %v6103_v1 = vld [vmem:[%s7893_s2 + $0x190] sm:$0xff]  }
  0x62   : > { %5463 = vmatpush3.bf16.msra.mxu0 %v6054_v2  ;;  %v6899_v2 = vld [vmem:[%s6467_s14 + $0x78] sm:$0xff] }
  0x63   : > { %5503 = vmatpush3.bf16.msra.mxu1 %v6055_v3  ;;  %5464 = vmatprep.subr.bf16.mxu0 %v6060_v10  ;;  %v6902_v3 = vld [vmem:[%s6467_s14 + $0x80] sm:$0xff]  ;;  %v6108_v10 = vld [vmem:[%s7893_s2 + $0x148] sm:$0xff]  }
  0x64   : > { %5504 = vmatprep.subr.bf16.mxu1 %v6061_v11  ;;  %v4751_v5 = vcombine.high %v6899_v2, %v6902_v3  ;;  %v4750_v7 = vcombine.low %v6899_v2, %v6902_v3  ;;  %v6109_v11 = vld [vmem:[%s7893_s2 + $0x1c8] sm:$0xff]  }
  0x65   : > { %986 = vmatmul.mubr.bf16.gmra.mxu0 %v4637_v8  ;;  %v4775_v8 = vcombine.high %v6905_v4, %v6910_v6 }
  0x66   : > { %1236 = vmatmul.mubr.bf16.gmra.mxu1 %v4693_v9  ;;  %5465 = vmatpush3.bf16.msra.mxu0 %v6062_v12  ;;  %v4774_v9 = vcombine.low %v6905_v4, %v6910_v6  ;;  %v4825_v12 = vcombine.high %v6782_v23, %v6819_v39 }
  0x67   : > { %5505 = vmatpush3.bf16.msra.mxu1 %v6063_v13  ;;  %5466 = vmatprep.subr.bf16.mxu0 %v6064_v14  ;;  %v6110_v13 = vld [vmem:[%s7893_s2 + $0x108] sm:$0xff]   ;;  %v4881_v14 = vcombine.high %v6776_v19, %v6811_v35 }
  0x68   : > { %5506 = vmatprep.subr.bf16.mxu1 %v6065_v15  ;;  %1558 = vmatprep.mubr.bf16.mxu0 %v4745_v22  ;;  %v6111_v15 = vld [vmem:[%s7893_s2 + $0x188] sm:$0xff]   ;;  %v4880_v22 = vcombine.low %v6776_v19, %v6811_v35  ;;  %v4883_v19 = vcombine.high %v6814_v36, %v6855_v51 }
  0x69   : > { %1759 = vmatprep.mubr.bf16.mxu1 %v4769_v25  ;;  %v6121_v25 = vld [vmem:[%s7893_s2 + $0x78] sm:$0xff]   ;;  %v6132_v35 = vld [vmem:[%s7893_s2 + $0xe8] sm:$0xff]  }
  0x6a   : > { %5467 = vmatpush3.bf16.msra.mxu0 %v6066_v16  ;;  %v6112_v16 = vld [vmem:[%s7893_s2 + $0x140] sm:$0xff]  }
  0x6b   : > { %5507 = vmatpush3.bf16.msra.mxu1 %v6067_v17  ;;  %5532 = vmatprep.subr.bf16.mxu0 %v6072_v26  ;;  %v6113_v17 = vld [vmem:[%s7893_s2 + $0x1c0] sm:$0xff]   ;;  %v4827_v26 = vcombine.high %v6822_v40, %v6861_v49 }
  0x6c   : > { %5572 = vmatprep.subr.bf16.mxu1 %v6073_v27  ;;  %v6123_v27 = vld [vmem:[%s7893_s2 + $0x38] sm:$0xff]  }
  0x6d   : > { %1559 = vmatmul.mubr.bf16.vlgmr.msra.gmra.mxu0 %v4744_v21  ;;  %v4824_v21 = vcombine.low %v6782_v23, %v6819_v39  ;;  %v6122_v23 = vld [vmem:[%s7893_s2 + $0xb8] sm:$0xff]   ;;  %v4829_v39 = vcombine.high %v6864_v53, %v6905_v4 }
  0x6e   : > { %1760 = vmatmul.mubr.bf16.vlgmr.msra.gmra.mxu1 %v4768_v24  ;;  %5533 = vmatpush3.bf16.msra.mxu0 %v6074_v28  ;;  %v6120_v24 = vld [vmem:[%s7893_s2 + $0xf8] sm:$0xff]   ;;  %v6124_v28 = vld [vmem:[%s7893_s2 + $0xf0] sm:$0xff]  }
  0x6f   : > { %5573 = vmatpush3.bf16.msra.mxu1 %v6075_v29  ;;  %5534 = vmatprep.subr.bf16.mxu0 %v6076_v30  ;;  %v6125_v29 = vld [vmem:[%s7893_s2 + $0x70] sm:$0xff]  }
  0x70   : > { %5574 = vmatprep.subr.bf16.mxu1 %v6077_v31  ;;  %1566 = vmatprep.mubr.bf16.mxu0 %v4747_v38  ;;  %v6126_v30 = vld [vmem:[%s7893_s2 + $0xb0] sm:$0xff]   ;;  %v6133_v38 = vld [vmem:[%s7893_s2 + $0x68] sm:$0xff]  }
  0x71   : > { %1767 = vmatprep.mubr.bf16.mxu1 %v4771_v33  ;;  %v6127_v31 = vld [vmem:[%s7893_s2 + $0x30] sm:$0xff]   ;;  %v6136_v33 = vld [vmem:[%s7893_s2 + $0xe0] sm:$0xff]  }
  0x72   : > { %5535 = vmatpush3.bf16.msra.mxu0 %v6078_v32  ;;  %v4826_v32 = vcombine.low %v6822_v40, %v6861_v49  ;;  %v6134_v40 = vld [vmem:[%s7893_s2 + $0xa8] sm:$0xff]   ;;  %v6150_v49 = vld [vmem:[%s7893_s2 + $0x90] sm:$0xff]  }
  0x73   : > { %5575 = vmatpush3.bf16.msra.mxu1 %v6079_v34  ;;  %5536 = vmatprep.subr.bf16.mxu0 %v6084_v42  ;;  %v4882_v34 = vcombine.low %v6814_v36, %v6855_v51  ;;  %v4885_v36 = vcombine.high %v6858_v52, %v6899_v2  ;;  %v6138_v42 = vld [vmem:[%s7893_s2 + $0xa0] sm:$0xff]   ;;  %v6148_v51 = vld [vmem:[%s7893_s2 + $0xd0] sm:$0xff]  }
  0x74   : > { %5576 = vmatprep.subr.bf16.mxu1 %v6085_v43  ;;  %v6139_v43 = vld [vmem:[%s7893_s2 + $0x20] sm:$0xff]  }
  0x75   : > { %1567 = vmatmul.mubr.bf16.gmra.mxu0 %v4746_v37  ;;  %v6135_v37 = vld [vmem:[%s7893_s2 + $0x28] sm:$0xff]  }
  0x76   : > { %1768 = vmatmul.mubr.bf16.gmra.mxu1 %v4770_v41  ;;  %5537 = vmatpush3.bf16.msra.mxu0 %v6086_v44  ;;  %v6137_v41 = vld [vmem:[%s7893_s2 + $0x60] sm:$0xff]   ;;  %v4828_v44 = vcombine.low %v6864_v53, %v6905_v4  ;;  %v6151_v53 = vld [vmem:[%s7893_s2 + $0x10] sm:$0xff]  }
  0x77   : > { %5577 = vmatpush3.bf16.msra.mxu1 %v6087_v45  ;;  %5538 = vmatprep.subr.bf16.mxu0 %v6088_v46  ;;  %v4884_v45 = vcombine.low %v6858_v52, %v6899_v2  ;;  %v6144_v46 = vld [vmem:[%s7893_s2 + $0xd8] sm:$0xff]   ;;  %v6149_v52 = vld [vmem:[%s7893_s2 + $0x50] sm:$0xff]   ;;  %v6162_v2 = vld [vmem:[%s7893_s2 + $0x80] sm:$0xff]  }
  0x78   : > { %5578 = vmatprep.subr.bf16.mxu1 %v6089_v47  ;;  %1574 = vmatprep.mubr.bf16.mxu0 %v4749_v54  ;;  %v6145_v47 = vld [vmem:[%s7893_s2 + $0x58] sm:$0xff]   ;;  %v1799_v54 = vld [vmem:[%s6472_s16 + $0x88] sm:$0xff]  ;;  %v2382_v4 = vld [vmem:[%s6467_s14 + $0x90] sm:$0xff] }
  0x79   : > { %1775 = vmatprep.mubr.bf16.mxu1 %v4773_v55  ;;  %v2048_v55 = vld [vmem:[%s6467_s14 + $0x88] sm:$0xff] }
  0x7a   : > { %5539 = vmatpush3.bf16.msra.mxu0 %v6090_v48  ;;  %v6146_v48 = vld [vmem:[%s7893_s2 + $0x98] sm:$0xff]  }
  0x7b   : > { %5579 = vmatpush3.bf16.msra.mxu1 %v6091_v50  ;;  %5540 = vmatprep.subr.bf16.mxu0 %v6096_v58  ;;  %v6147_v50 = vld [vmem:[%s7893_s2 + $0x18] sm:$0xff]   ;;  %v4830_v58 = vcombine.low %v6910_v6, %v1799_v54 }
  0x7c   : > { %5580 = vmatprep.subr.bf16.mxu1 %v6097_v59  ;;  %v4886_v59 = vcombine.low %v6902_v3, %v2048_v55 }
  0x7d   : > { %1575 = vmatmul.mubr.bf16.gmra.mxu0 %v4748_v56  ;;  %v4831_v56 = vcombine.high %v6910_v6, %v1799_v54  ;;  %v2342_v6 = vld [vmem:[%s6472_s16 + $0x90] sm:$0xff]  ;;  %v7199_v54 = vld [vmem:[%s6472_s16 + $0xc0] sm:$0xff] }
  0x7e   : > { %1776 = vmatmul.mubr.bf16.gmra.mxu1 %v4772_v57  ;;  %5541 = vmatpush3.bf16.msra.mxu0 %v6098_v60  ;;  %v4887_v57 = vcombine.high %v6902_v3, %v2048_v55  ;;  %v6156_v60 = vld [vmem:[%s7893_s2 + $0xc8] sm:$0xff]   ;;  %v6163_v3 = vld [vmem:[%s7893_s2] sm:$0xff]  }
  0x7f   : > { %5581 = vmatpush3.bf16.msra.mxu1 %v6099_v61  ;;  %5542 = vmatprep.subr.bf16.mxu0 %v6100_v62  ;;  %v6157_v61 = vld [vmem:[%s7893_s2 + $0x48] sm:$0xff]  }
  0x80   : > { %5582 = vmatprep.subr.bf16.mxu1 %v6101_v63  ;;  %1582 = vmatprep.mubr.bf16.mxu0 %v4751_v5  ;;  %v6158_v62 = vld [vmem:[%s7893_s2 + $0x88] sm:$0xff]   ;;  %v7070_v5 = vld [vmem:[%s6467_s14 + $0x98] sm:$0xff] }
  0x81   : > { %1783 = vmatprep.mubr.bf16.mxu1 %v4775_v8  ;;  %v6159_v63 = vld [vmem:[%s7893_s2 + $0x8] sm:$0xff]   ;;  %v4937_v8 = vcombine.high %v2382_v4, %v7070_v5 }
  0x82   : > { %5543 = vmatpush3.bf16.msra.mxu0 %v6102_v0  ;;  %v6160_v0 = vld [vmem:[%s7893_s2 + $0xc0] sm:$0xff]  }
  0x83   : > { %5583 = vmatpush3.bf16.msra.mxu1 %v6103_v1  ;;  %5544 = vmatprep.subr.bf16.mxu0 %v6108_v10  ;;  %v6161_v1 = vld [vmem:[%s7893_s2 + $0x40] sm:$0xff]  }
  0x84   : > { %5584 = vmatprep.subr.bf16.mxu1 %v6109_v11 }
  0x85   : > { %1583 = vmatmul.mubr.bf16.gmra.mxu0 %v4750_v7  ;;  %v4936_v7 = vcombine.low %v2382_v4, %v7070_v5  ;;  %v6210_v4 = vld [vmem:[%s7893_s2 + $0x100] sm:$0xff]  }
  0x86   : > { %1784 = vmatmul.mubr.bf16.gmra.mxu1 %v4774_v9  ;;  %5545 = vmatpush3.bf16.msra.mxu0 %v6110_v13  ;;  %v7076_v9 = vld [vmem:[%s6472_s16 + $0x98] sm:$0xff] }
  0x87   : > { %5585 = vmatpush3.bf16.msra.mxu1 %v6111_v15  ;;  %2000 = vmatprep.mubr.bf16.mxu0 %v4825_v12  ;;  %v4960_v10 = vcombine.low %v2342_v6, %v7076_v9  ;;  %v4961_v11 = vcombine.high %v2342_v6, %v7076_v9  ;;  %v6168_v12 = vld [vmem:[%s7893_s2 + $0x178] sm:$0xff]   ;;  %v6211_v6 = vld [vmem:[%s7893_s2 + $0x180] sm:$0xff]  }
  0x88   : > { %5546 = vmatprep.subr.bf16.mxu0 %v6112_v16  ;;  %2249 = vmatprep.mubr.bf16.mxu1 %v4881_v14  ;;  %v6169_v13 = vld [vmem:[%s7893_s2 + $0x1f8] sm:$0xff]   ;;  %v6172_v16 = vld [vmem:[%s7893_s2 + $0x170] sm:$0xff]  }
  0x89   : > { %5586 = vmatprep.subr.bf16.mxu1 %v6113_v17  ;;  %v6170_v14 = vld [vmem:[%s7893_s2 + $0x138] sm:$0xff]   ;;  %v6173_v17 = vld [vmem:[%s7893_s2 + $0x1f0] sm:$0xff]  }
  0x8a   : > { %5547 = vmatpush3.bf16.msra.mxu0 %v6114_v18  ;;  %v6171_v15 = vld [vmem:[%s7893_s2 + $0x1b8] sm:$0xff]   ;;  %v6174_v18 = vld [vmem:[%s7893_s2 + $0x130] sm:$0xff]  }
  0x8b   : > { %5587 = vmatpush3.bf16.msra.mxu1 %v6115_v20  ;;  %5612 = vmatprep.subr.bf16.mxu0 %v6120_v24  ;;  %v6175_v20 = vld [vmem:[%s7893_s2 + $0x1b0] sm:$0xff]  }
  0x8c   : > { %5652 = vmatprep.subr.bf16.mxu1 %v6121_v25  ;;  %v7113_v25 = vld [vmem:[%s6472_s16 + $0xa0] sm:$0xff] }
  0x8d   : > { %2001 = vmatmul.mubr.bf16.vlgmr.msra.gmra.mxu0 %v4824_v21  ;;  %v7105_v21 = vld [vmem:[%s6467_s14 + $0xa0] sm:$0xff] }
  0x8e   : > { %2250 = vmatmul.mubr.bf16.vlgmr.msra.gmra.mxu1 %v4880_v22  ;;  %5613 = vmatpush3.bf16.msra.mxu0 %v6122_v23  ;;  %v7108_v22 = vld [vmem:[%s6467_s14 + $0xa8] sm:$0xff] }
  0x8f   : > { %5653 = vmatpush3.bf16.msra.mxu1 %v6123_v27  ;;  %2008 = vmatprep.mubr.bf16.mxu0 %v4827_v26  ;;  %v4939_v24 = vcombine.high %v7105_v21, %v7108_v22  ;;  %v7116_v26 = vld [vmem:[%s6472_s16 + $0xa8] sm:$0xff]  ;;  %v4938_v23 = vcombine.low %v7105_v21, %v7108_v22 }
  0x90   : > { %5614 = vmatprep.subr.bf16.mxu0 %v6124_v28  ;;  %2257 = vmatprep.mubr.bf16.mxu1 %v4883_v19  ;;  %v4963_v19 = vcombine.high %v7113_v25, %v7116_v26  ;;  %v4962_v27 = vcombine.low %v7113_v25, %v7116_v26  ;;  %v6180_v28 = vld [vmem:[%s7893_s2 + $0x168] sm:$0xff]  }
  0x91   : > { %5654 = vmatprep.subr.bf16.mxu1 %v6125_v29  ;;  %v6181_v29 = vld [vmem:[%s7893_s2 + $0x1e8] sm:$0xff]  }
  0x92   : > { %5615 = vmatpush3.bf16.msra.mxu0 %v6126_v30  ;;  %v6182_v30 = vld [vmem:[%s7893_s2 + $0x128] sm:$0xff]  }
  0x93   : > { %5655 = vmatpush3.bf16.msra.mxu1 %v6127_v31  ;;  %5616 = vmatprep.subr.bf16.mxu0 %v6132_v35  ;;  %v6183_v31 = vld [vmem:[%s7893_s2 + $0x1a8] sm:$0xff]   ;;  %v6186_v35 = vld [vmem:[%s7893_s2 + $0x120] sm:$0xff]  }
  0x94   : > { %5656 = vmatprep.subr.bf16.mxu1 %v6133_v38  ;;  %v6187_v38 = vld [vmem:[%s7893_s2 + $0x1a0] sm:$0xff]  }
  0x95   : > { %2009 = vmatmul.mubr.bf16.gmra.mxu0 %v4826_v32  ;;  %v6184_v32 = vld [vmem:[%s7893_s2 + $0x160] sm:$0xff]  }
  0x96   : > { %2258 = vmatmul.mubr.bf16.gmra.mxu1 %v4882_v34  ;;  %5617 = vmatpush3.bf16.msra.mxu0 %v6134_v40  ;;  %v6185_v34 = vld [vmem:[%s7893_s2 + $0x1e0] sm:$0xff]   ;;  %v7152_v40 = vld [vmem:[%s6467_s14 + $0xb8] sm:$0xff] }
  0x97   : > { %5657 = vmatpush3.bf16.msra.mxu1 %v6135_v37  ;;  %2016 = vmatprep.mubr.bf16.mxu0 %v4829_v39  ;;  %v7149_v39 = vld [vmem:[%s6467_s14 + $0xb0] sm:$0xff]  ;;  %v7158_v37 = vld [vmem:[%s6472_s16 + $0xb8] sm:$0xff] }
  0x98   : > { %5618 = vmatprep.subr.bf16.mxu0 %v6136_v33  ;;  %2265 = vmatprep.mubr.bf16.mxu1 %v4885_v36  ;;  %v7155_v36 = vld [vmem:[%s6472_s16 + $0xb0] sm:$0xff]  ;;  %v4941_v33 = vcombine.high %v7149_v39, %v7152_v40 }
  0x99   : > { %5658 = vmatprep.subr.bf16.mxu1 %v6137_v41  ;;  %v4965_v41 = vcombine.high %v7155_v36, %v7158_v37 }
  0x9a   : > { %5619 = vmatpush3.bf16.msra.mxu0 %v6138_v42  ;;  %v4940_v42 = vcombine.low %v7149_v39, %v7152_v40 }
  0x9b   : > { %5659 = vmatpush3.bf16.msra.mxu1 %v6139_v43  ;;  %5620 = vmatprep.subr.bf16.mxu0 %v6144_v46  ;;  %v4964_v43 = vcombine.low %v7155_v36, %v7158_v37  ;;  %v6194_v46 = vld [vmem:[%s7893_s2 + $0x118] sm:$0xff]  }
  0x9c   : > { %5660 = vmatprep.subr.bf16.mxu1 %v6145_v47  ;;  %v6195_v47 = vld [vmem:[%s7893_s2 + $0x198] sm:$0xff]  }
  0x9d   : > { %2017 = vmatmul.mubr.bf16.gmra.mxu0 %v4828_v44  ;;  %v6192_v44 = vld [vmem:[%s7893_s2 + $0x158] sm:$0xff]  }
  0x9e   : > { %2266 = vmatmul.mubr.bf16.gmra.mxu1 %v4884_v45  ;;  %5621 = vmatpush3.bf16.msra.mxu0 %v6146_v48  ;;  %v6193_v45 = vld [vmem:[%s7893_s2 + $0x1d8] sm:$0xff]   ;;  %v6196_v48 = vld [vmem:[%s7893_s2 + $0x150] sm:$0xff]  }
  0x9f   : > { %5661 = vmatpush3.bf16.msra.mxu1 %v6147_v50  ;;  %5622 = vmatprep.subr.bf16.mxu0 %v6148_v51  ;;  %v6197_v50 = vld [vmem:[%s7893_s2 + $0x1d0] sm:$0xff]  }
  0xa0   : > { %5662 = vmatprep.subr.bf16.mxu1 %v6149_v52  ;;  %2024 = vmatprep.mubr.bf16.mxu0 %v4831_v56  ;;  %v6198_v51 = vld [vmem:[%s7893_s2 + $0x110] sm:$0xff]   ;;  %v7204_v56 = vld [vmem:[%s6472_s16 + $0xc8] sm:$0xff] }
  0xa1   : > { %2273 = vmatprep.mubr.bf16.mxu1 %v4887_v57  ;;  %v6199_v52 = vld [vmem:[%s7893_s2 + $0x190] sm:$0xff]  }
  0xa2   : > { %5623 = vmatpush3.bf16.msra.mxu0 %v6150_v49  ;;  %v7193_v49 = vld [vmem:[%s6467_s14 + $0xc0] sm:$0xff] }
  0xa3   : > { %5663 = vmatpush3.bf16.msra.mxu1 %v6151_v53  ;;  %5624 = vmatprep.subr.bf16.mxu0 %v6156_v60  ;;  %v7196_v53 = vld [vmem:[%s6467_s14 + $0xc8] sm:$0xff] }
  0xa4   : > { %5664 = vmatprep.subr.bf16.mxu1 %v6157_v61  ;;  %v4943_v55 = vcombine.high %v7193_v49, %v7196_v53  ;;  %v4942_v57 = vcombine.low %v7193_v49, %v7196_v53  ;;  %v6204_v60 = vld [vmem:[%s7893_s2 + $0x148] sm:$0xff]  }
  0xa5   : > { %2025 = vmatmul.mubr.bf16.gmra.mxu0 %v4830_v58  ;;  %v4967_v58 = vcombine.high %v7199_v54, %v7204_v56  ;;  %v6205_v61 = vld [vmem:[%s7893_s2 + $0x1c8] sm:$0xff]  }
  0xa6   : > { %2274 = vmatmul.mubr.bf16.gmra.mxu1 %v4886_v59  ;;  %5625 = vmatpush3.bf16.msra.mxu0 %v6158_v62  ;;  %v4966_v59 = vcombine.low %v7199_v54, %v7204_v56  ;;  %v5017_v62 = vcombine.high %v7076_v9, %v7113_v25 }
  0xa7   : > { %5665 = vmatpush3.bf16.msra.mxu1 %v6159_v63  ;;  %5626 = vmatprep.subr.bf16.mxu0 %v6160_v0  ;;  %v6206_v63 = vld [vmem:[%s7893_s2 + $0x108] sm:$0xff]   ;;  %v5073_v0 = vcombine.high %v7070_v5, %v7105_v21 }
  0xa8   : > { %5666 = vmatprep.subr.bf16.mxu1 %v6161_v1  ;;  %2590 = vmatprep.mubr.bf16.mxu0 %v4937_v8  ;;  %v6207_v1 = vld [vmem:[%s7893_s2 + $0x188] sm:$0xff]   ;;  %v5072_v8 = vcombine.low %v7070_v5, %v7105_v21  ;;  %v5075_v5 = vcombine.high %v7108_v22, %v7149_v39 }
  0xa9   : > { %2791 = vmatprep.mubr.bf16.mxu1 %v4961_v11  ;;  %v6217_v11 = vld [vmem:[%s7893_s2 + $0x78] sm:$0xff]   ;;  %v6228_v21 = vld [vmem:[%s7893_s2 + $0xe8] sm:$0xff]  }
  0xaa   : > { %5627 = vmatpush3.bf16.msra.mxu0 %v6162_v2  ;;  %v6208_v2 = vld [vmem:[%s7893_s2 + $0x140] sm:$0xff]  }
  0xab   : > { %5667 = vmatpush3.bf16.msra.mxu1 %v6163_v3  ;;  %5692 = vmatprep.subr.bf16.mxu0 %v6168_v12  ;;  %v6209_v3 = vld [vmem:[%s7893_s2 + $0x1c0] sm:$0xff]   ;;  %v5019_v12 = vcombine.high %v7116_v26, %v7155_v36 }
  0xac   : > { %5732 = vmatprep.subr.bf16.mxu1 %v6169_v13  ;;  %v6219_v13 = vld [vmem:[%s7893_s2 + $0x38] sm:$0xff]  }
  0xad   : > { %2591 = vmatmul.mubr.bf16.vlgmr.msra.gmra.mxu0 %v4936_v7  ;;  %v5016_v7 = vcombine.low %v7076_v9, %v7113_v25  ;;  %v6218_v9 = vld [vmem:[%s7893_s2 + $0xb8] sm:$0xff]   ;;  %v5021_v25 = vcombine.high %v7158_v37, %v7199_v54 }
  0xae   : > { %2792 = vmatmul.mubr.bf16.vlgmr.msra.gmra.mxu1 %v4960_v10  ;;  %5693 = vmatpush3.bf16.msra.mxu0 %v6170_v14  ;;  %v6216_v10 = vld [vmem:[%s7893_s2 + $0xf8] sm:$0xff]   ;;  %v6220_v14 = vld [vmem:[%s7893_s2 + $0xf0] sm:$0xff]  }
  0xaf   : > { %5733 = vmatpush3.bf16.msra.mxu1 %v6171_v15  ;;  %5694 = vmatprep.subr.bf16.mxu0 %v6172_v16  ;;  %v6221_v15 = vld [vmem:[%s7893_s2 + $0x70] sm:$0xff]  }
  0xb0   : > { %5734 = vmatprep.subr.bf16.mxu1 %v6173_v17  ;;  %2598 = vmatprep.mubr.bf16.mxu0 %v4939_v24  ;;  %v6222_v16 = vld [vmem:[%s7893_s2 + $0xb0] sm:$0xff]   ;;  %v6229_v24 = vld [vmem:[%s7893_s2 + $0x68] sm:$0xff]  }
  0xb1   : > { %2799 = vmatprep.mubr.bf16.mxu1 %v4963_v19  ;;  %v6223_v17 = vld [vmem:[%s7893_s2 + $0x30] sm:$0xff]   ;;  %v6232_v19 = vld [vmem:[%s7893_s2 + $0xe0] sm:$0xff]  }
  0xb2   : > { %5695 = vmatpush3.bf16.msra.mxu0 %v6174_v18  ;;  %v5018_v18 = vcombine.low %v7116_v26, %v7155_v36  ;;  %v6230_v26 = vld [vmem:[%s7893_s2 + $0xa8] sm:$0xff]   ;;  %v6244_v36 = vld [vmem:[%s7893_s2 + $0xd0] sm:$0xff]  }
  0xb3   : > { %5735 = vmatpush3.bf16.msra.mxu1 %v6175_v20  ;;  %5696 = vmatprep.subr.bf16.mxu0 %v6180_v28  ;;  %v5074_v20 = vcombine.low %v7108_v22, %v7149_v39  ;;  %v5077_v22 = vcombine.high %v7152_v40, %v7193_v49  ;;  %v6234_v28 = vld [vmem:[%s7893_s2 + $0xa0] sm:$0xff]   ;;  %v6243_v39 = vld [vmem:[%s7893_s2 + $0x18] sm:$0xff]  }
  0xb4   : > { %5736 = vmatprep.subr.bf16.mxu1 %v6181_v29  ;;  %v6235_v29 = vld [vmem:[%s7893_s2 + $0x20] sm:$0xff]  }
  0xb5   : > { %2599 = vmatmul.mubr.bf16.gmra.mxu0 %v4938_v23  ;;  %v6231_v23 = vld [vmem:[%s7893_s2 + $0x28] sm:$0xff]  }
  0xb6   : > { %2800 = vmatmul.mubr.bf16.gmra.mxu1 %v4962_v27  ;;  %5697 = vmatpush3.bf16.msra.mxu0 %v6182_v30  ;;  %v6233_v27 = vld [vmem:[%s7893_s2 + $0x60] sm:$0xff]   ;;  %v5020_v30 = vcombine.low %v7158_v37, %v7199_v54 }
  0xb7   : > { %5737 = vmatpush3.bf16.msra.mxu1 %v6183_v31  ;;  %5698 = vmatprep.subr.bf16.mxu0 %v6184_v32  ;;  %v5076_v31 = vcombine.low %v7152_v40, %v7193_v49  ;;  %v6240_v32 = vld [vmem:[%s7893_s2 + $0xd8] sm:$0xff]   ;;  %v6252_v49 = vld [vmem:[%s7893_s2 + $0xc8] sm:$0xff]  }
  0xb8   : > { %5738 = vmatprep.subr.bf16.mxu1 %v6185_v34  ;;  %2606 = vmatprep.mubr.bf16.mxu0 %v4941_v33  ;;  %v6241_v34 = vld [vmem:[%s7893_s2 + $0x58] sm:$0xff]   ;;  %v6245_v33 = vld [vmem:[%s7893_s2 + $0x50] sm:$0xff]  }
  0xb9   : > { %2807 = vmatprep.mubr.bf16.mxu1 %v4965_v41 }
  0xba   : > { %5699 = vmatpush3.bf16.msra.mxu0 %v6186_v35  ;;  %v6242_v35 = vld [vmem:[%s7893_s2 + $0x98] sm:$0xff]  }
  0xbb   : > { %5739 = vmatpush3.bf16.msra.mxu1 %v6187_v38  ;;  %5700 = vmatprep.subr.bf16.mxu0 %v6192_v44  ;;  %v6247_v44 = vld [vmem:[%s7893_s2 + $0x10] sm:$0xff]  }
  0xbc   : > { %5740 = vmatprep.subr.bf16.mxu1 %v6193_v45  ;;  %v2831_v45 = vld [vmem:[%s6472_s16 + $0xd0] sm:$0xff] }
  0xbd   : > { %2607 = vmatmul.mubr.bf16.gmra.mxu0 %v4940_v42  ;;  %v6246_v42 = vld [vmem:[%s7893_s2 + $0x90] sm:$0xff]  }
  0xbe   : > { %2808 = vmatmul.mubr.bf16.gmra.mxu1 %v4964_v43  ;;  %5701 = vmatpush3.bf16.msra.mxu0 %v6194_v46  ;;  %v3080_v46 = vld [vmem:[%s6467_s14 + $0xd0] sm:$0xff] }
  0xbf   : > { %5741 = vmatpush3.bf16.msra.mxu1 %v6195_v47  ;;  %5702 = vmatprep.subr.bf16.mxu0 %v6196_v48  ;;  %v5023_v48 = vcombine.high %v7204_v56, %v2831_v45 }
  0xc0   : > { %5742 = vmatprep.subr.bf16.mxu1 %v6197_v50  ;;  %2614 = vmatprep.mubr.bf16.mxu0 %v4943_v55  ;;  %v5079_v50 = vcombine.high %v7196_v53, %v3080_v46  ;;  %v6253_v55 = vld [vmem:[%s7893_s2 + $0x48] sm:$0xff]  }
  0xc1   : > { %2815 = vmatprep.mubr.bf16.mxu1 %v4967_v58 }
  0xc2   : > { %5703 = vmatpush3.bf16.msra.mxu0 %v6198_v51  ;;  %v5022_v51 = vcombine.low %v7204_v56, %v2831_v45  ;;  %v6254_v56 = vld [vmem:[%s7893_s2 + $0x88] sm:$0xff]  }
  0xc3   : > { %5743 = vmatpush3.bf16.msra.mxu1 %v6199_v52  ;;  %5704 = vmatprep.subr.bf16.mxu0 %v6204_v60  ;;  %v5078_v52 = vcombine.low %v7196_v53, %v3080_v46  ;;  %v6255_v53 = vld [vmem:[%s7893_s2 + $0x8] sm:$0xff]  }
  0xc4   : > { %5744 = vmatprep.subr.bf16.mxu1 %v6205_v61  ;;  %v6257_v61 = vld [vmem:[%s7893_s2 + $0x40] sm:$0xff]   ;;  %v6278_v45 = vld [vmem:[%s7893_s2 + $0x128] sm:$0xff]  }
  0xc5   : > { %2615 = vmatmul.mubr.bf16.gmra.mxu0 %v4942_v57  ;;  %v6279_v46 = vld [vmem:[%s7893_s2 + $0x1a8] sm:$0xff]  }
  0xc6   : > { %2816 = vmatmul.mubr.bf16.gmra.mxu1 %v4966_v59  ;;  %5705 = vmatpush3.bf16.msra.mxu0 %v6206_v63  ;;  %v6256_v59 = vld [vmem:[%s7893_s2 + $0xc0] sm:$0xff]  }
  0xc7   : > { %5745 = vmatpush3.bf16.msra.mxu1 %v6207_v1  ;;  %3032 = vmatprep.mubr.bf16.mxu0 %v5017_v62  ;;  %v6258_v63 = vld [vmem:[%s7893_s2 + $0x80] sm:$0xff]  }
  0xc8   : > { %5706 = vmatprep.subr.bf16.mxu0 %v6208_v2  ;;  %3281 = vmatprep.mubr.bf16.mxu1 %v5073_v0  ;;  %v6259_v1 = vld [vmem:[%s7893_s2] sm:$0xff]  }
  0xc9   : > { %5746 = vmatprep.subr.bf16.mxu1 %v6209_v3  ;;  %v3414_v3 = vld [vmem:[%s6467_s14 + $0xd8] sm:$0xff] }
  0xca   : > { %5707 = vmatpush3.bf16.msra.mxu0 %v6210_v4  ;;  %v7390_v4 = vld [vmem:[%s6467_s14 + $0xe0] sm:$0xff] }
  0xcb   : > { %5747 = vmatpush3.bf16.msra.mxu1 %v6211_v6  ;;  %5772 = vmatprep.subr.bf16.mxu0 %v6216_v10  ;;  %v3374_v6 = vld [vmem:[%s6472_s16 + $0xd8] sm:$0xff]  ;;  %v5129_v10 = vcombine.high %v3414_v3, %v7390_v4 }
  0xcc   : > { %5812 = vmatprep.subr.bf16.mxu1 %v6217_v11  ;;  %v7398_v11 = vld [vmem:[%s6472_s16 + $0xe0] sm:$0xff] }
  0xcd   : > { %3033 = vmatmul.mubr.bf16.vlgmr.msra.gmra.mxu0 %v5016_v7 }
  0xce   : > { %3282 = vmatmul.mubr.bf16.vlgmr.msra.gmra.mxu1 %v5072_v8  ;;  %5773 = vmatpush3.bf16.msra.mxu0 %v6218_v9  ;;  %v5128_v8 = vcombine.low %v3414_v3, %v7390_v4  ;;  %v5152_v9 = vcombine.low %v3374_v6, %v7398_v11  ;;  %v7510_v3 = vld [vmem:[%s6472_s16 + $0x100] sm:$0xff] }
  0xcf   : > { %5813 = vmatpush3.bf16.msra.mxu1 %v6219_v13  ;;  %3040 = vmatprep.mubr.bf16.mxu0 %v5019_v12  ;;  %v6264_v13 = vld [vmem:[%s7893_s2 + $0x178] sm:$0xff]  }
  0xd0   : > { %5774 = vmatprep.subr.bf16.mxu0 %v6220_v14  ;;  %3289 = vmatprep.mubr.bf16.mxu1 %v5075_v5  ;;  %v5153_v5 = vcombine.high %v3374_v6, %v7398_v11 }
  0xd1   : > { %5814 = vmatprep.subr.bf16.mxu1 %v6221_v15  ;;  %v6265_v15 = vld [vmem:[%s7893_s2 + $0x1f8] sm:$0xff]  }
  0xd2   : > { %5775 = vmatpush3.bf16.msra.mxu0 %v6222_v16  ;;  %v6266_v16 = vld [vmem:[%s7893_s2 + $0x138] sm:$0xff]  }
  0xd3   : > { %5815 = vmatpush3.bf16.msra.mxu1 %v6223_v17  ;;  %5776 = vmatprep.subr.bf16.mxu0 %v6228_v21  ;;  %v6267_v17 = vld [vmem:[%s7893_s2 + $0x1b8] sm:$0xff]   ;;  %v6268_v21 = vld [vmem:[%s7893_s2 + $0x170] sm:$0xff]  }
  0xd4   : > { %5816 = vmatprep.subr.bf16.mxu1 %v6229_v24  ;;  %v6269_v24 = vld [vmem:[%s7893_s2 + $0x1f0] sm:$0xff]  }
  0xd5   : > { %3041 = vmatmul.mubr.bf16.gmra.mxu0 %v5018_v18 }
  0xd6   : > { %3290 = vmatmul.mubr.bf16.gmra.mxu1 %v5074_v20  ;;  %5777 = vmatpush3.bf16.msra.mxu0 %v6230_v26 }
  0xd7   : > { %5817 = vmatpush3.bf16.msra.mxu1 %v6231_v23  ;;  %3048 = vmatprep.mubr.bf16.mxu0 %v5021_v25  ;;  %v6271_v23 = vld [vmem:[%s7893_s2 + $0x1b0] sm:$0xff]  }
  0xd8   : > { %5778 = vmatprep.subr.bf16.mxu0 %v6232_v19  ;;  %3297 = vmatprep.mubr.bf16.mxu1 %v5077_v22  ;;  %v6270_v22 = vld [vmem:[%s7893_s2 + $0x130] sm:$0xff]   ;;  %v7439_v19 = vld [vmem:[%s6467_s14 + $0xe8] sm:$0xff] }
  0xd9   : > { %5818 = vmatprep.subr.bf16.mxu1 %v6233_v27  ;;  %v7442_v27 = vld [vmem:[%s6467_s14 + $0xf0] sm:$0xff] }
  0xda   : > { %5779 = vmatpush3.bf16.msra.mxu0 %v6234_v28 }
  0xdb   : > { %5819 = vmatpush3.bf16.msra.mxu1 %v6235_v29  ;;  %5780 = vmatprep.subr.bf16.mxu0 %v6240_v32  ;;  %v7454_v32 = vld [vmem:[%s6472_s16 + $0xf0] sm:$0xff] }
  0xdc   : > { %5820 = vmatprep.subr.bf16.mxu1 %v6241_v34  ;;  %v5130_v34 = vcombine.low %v7439_v19, %v7442_v27 }
  0xdd   : > { %3049 = vmatmul.mubr.bf16.gmra.mxu0 %v5020_v30  ;;  %v5131_v30 = vcombine.high %v7439_v19, %v7442_v27 }
  0xde   : > { %3298 = vmatmul.mubr.bf16.gmra.mxu1 %v5076_v31  ;;  %5781 = vmatpush3.bf16.msra.mxu0 %v6242_v35  ;;  %v7451_v31 = vld [vmem:[%s6472_s16 + $0xe8] sm:$0xff] }
  0xdf   : > { %5821 = vmatpush3.bf16.msra.mxu1 %v6243_v39  ;;  %5782 = vmatprep.subr.bf16.mxu0 %v6244_v36  ;;  %v5155_v35 = vcombine.high %v7451_v31, %v7454_v32  ;;  %v5154_v39 = vcombine.low %v7451_v31, %v7454_v32  ;;  %v6276_v36 = vld [vmem:[%s7893_s2 + $0x168] sm:$0xff]  }
  0xe0   : > { %5822 = vmatprep.subr.bf16.mxu1 %v6245_v33  ;;  %3056 = vmatprep.mubr.bf16.mxu0 %v5023_v48 }
  0xe1   : > { %3305 = vmatprep.mubr.bf16.mxu1 %v5079_v50  ;;  %v6280_v50 = vld [vmem:[%s7893_s2 + $0x160] sm:$0xff]  }
  0xe2   : > { %5783 = vmatpush3.bf16.msra.mxu0 %v6246_v42 }
  0xe3   : > { %5823 = vmatpush3.bf16.msra.mxu1 %v6247_v44  ;;  %5784 = vmatprep.subr.bf16.mxu0 %v6252_v49  ;;  %v6277_v44 = vld [vmem:[%s7893_s2 + $0x1e8] sm:$0xff]  }
  0xe4   : > { %5824 = vmatprep.subr.bf16.mxu1 %v6253_v55  ;;  %v6282_v55 = vld [vmem:[%s7893_s2 + $0x120] sm:$0xff]  }
  0xe5   : > { %3057 = vmatmul.mubr.bf16.gmra.mxu0 %v5022_v51 }
  0xe6   : > { %3306 = vmatmul.mubr.bf16.gmra.mxu1 %v5078_v52  ;;  %5785 = vmatpush3.bf16.msra.mxu0 %v6254_v56  ;;  %v6281_v52 = vld [vmem:[%s7893_s2 + $0x1e0] sm:$0xff]  }
  0xe7   : > { %5825 = vmatpush3.bf16.msra.mxu1 %v6255_v53  ;;  %5786 = vmatprep.subr.bf16.mxu0 %v6256_v59  ;;  %v6283_v53 = vld [vmem:[%s7893_s2 + $0x1a0] sm:$0xff]   ;;  %v7499_v59 = vld [vmem:[%s6467_s14 + $0xf8] sm:$0xff] }
  0xe8   : > { %5826 = vmatprep.subr.bf16.mxu1 %v6257_v61  ;;  %3622 = vmatprep.mubr.bf16.mxu0 %v5129_v10 }
  0xe9   : > { %3823 = vmatprep.mubr.bf16.mxu1 %v5153_v5 }
  0xea   : > { %5787 = vmatpush3.bf16.msra.mxu0 %v6258_v63  ;;  %v7504_v63 = vld [vmem:[%s6467_s14 + $0x100] sm:$0xff] }
  0xeb   : > { %5827 = vmatpush3.bf16.msra.mxu1 %v6259_v1  ;;  %5852 = vmatprep.subr.bf16.mxu0 %v6264_v13  ;;  %v7507_v1 = vld [vmem:[%s6472_s16 + $0xf8] sm:$0xff] }
  0xec   : > { %5892 = vmatprep.subr.bf16.mxu1 %v6265_v15  ;;  %v5157_v10 = vcombine.high %v7507_v1, %v7510_v3  ;;  %v5156_v5 = vcombine.low %v7507_v1, %v7510_v3  ;;  %v6288_v13 = vld [vmem:[%s7893_s2 + $0x158] sm:$0xff]  }
  0xed   : > { %v7317_v38 = vpop.f32.mrf.mxu0  ;;  %3623 = vmatmul.mubr.bf16.vlgmr.msra.gmra.mxu0 %v5128_v8  ;;  %v5133_v8 = vcombine.high %v7499_v59, %v7504_v63 }
  0xee   : > { %v7322_v40 = vpop.f32.mrf.mxu1  ;;  %3824 = vmatmul.mubr.bf16.vlgmr.msra.gmra.mxu1 %v5152_v9  ;;  %5853 = vmatpush3.bf16.msra.mxu0 %v6266_v16  ;;  %v5132_v9 = vcombine.low %v7499_v59, %v7504_v63  ;;  %v6289_v16 = vld [vmem:[%s7893_s2 + $0x1d8] sm:$0xff]  }
  0xef   : > { %v7327_v37 = vpop.f32.mrf.mxu0  ;;  %5893 = vmatpush3.bf16.msra.mxu1 %v6267_v17  ;;  %5854 = vmatprep.subr.bf16.mxu0 %v6268_v21  ;;  %v6290_v21 = vld [vmem:[%s7893_s2 + $0x118] sm:$0xff]  }
  0xf0   : > { %v7332_v41 = vpop.f32.mrf.mxu1  ;;  %5894 = vmatprep.subr.bf16.mxu1 %v6269_v24  ;;  %3630 = vmatprep.mubr.bf16.mxu0 %v5131_v30  ;;  %v5310_v24 = vadd.f32 %v7327_v37, %v7317_v38  ;;  %v6292_v38 = vld [vmem:[%s7893_s2 + $0x150] sm:$0xff]  }
  0xf1   : > { %v7337_v43 = vpop.f32.mrf.mxu0  ;;  %3831 = vmatprep.mubr.bf16.mxu1 %v5155_v35  ;;  %v5350_v30 = vadd.f32 %v7332_v41, %v7322_v40  ;;  %v6293_v40 = vld [vmem:[%s7893_s2 + $0x1d0] sm:$0xff]  }
  0xf2   : > { %v7344_v47 = vpop.f32.mrf.mxu1  ;;  %5855 = vmatpush3.bf16.msra.mxu0 %v6270_v22  ;;  %v6291_v22 = vld [vmem:[%s7893_s2 + $0x198] sm:$0xff]  }
  0xf3   : > { %v7353_v54 = vpop.f32.mrf.mxu0  ;;  %5895 = vmatpush3.bf16.msra.mxu1 %v6271_v23  ;;  %5856 = vmatprep.subr.bf16.mxu0 %v6276_v36  ;;  %v722_v36 = vadd.f32 %v5350_v30, %v5310_v24  ;;  %v5265_v30 = vcombine.high %v7390_v4, %v7439_v19 }
  0xf4   : > { %v7358_v57 = vpop.f32.mrf.mxu1  ;;  %5896 = vmatprep.subr.bf16.mxu1 %v6277_v44 }
  0xf5   : > { %v7366_v58 = vpop.f32.mrf.mxu0  ;;  %3631 = vmatmul.mubr.bf16.gmra.mxu0 %v5130_v34  ;;  %v5313_v34 = vadd.f32 %v7353_v54, %v7337_v43  ;;  %v5353_v35 = vadd.f32 %v7358_v57, %v7344_v47  ;;  %v6294_v43 = vld [vmem:[%s7893_s2 + $0x110] sm:$0xff]  }
  0xf6   : > { %v7371_v60 = vpop.f32.mrf.mxu1  ;;  %3832 = vmatmul.mubr.bf16.gmra.mxu1 %v5154_v39  ;;  %5857 = vmatpush3.bf16.msra.mxu0 %v6278_v45  ;;  %v6295_v57 = vld [vmem:[%s7893_s2 + $0x190] sm:$0xff]  }
  0xf7   : > { %v7376_v62 = vpop.f32.mrf.mxu0  ;;  %5897 = vmatpush3.bf16.msra.mxu1 %v6279_v46  ;;  %5858 = vmatprep.subr.bf16.mxu0 %v6280_v50  ;;  %v725_v44 = vadd.f32 %v5353_v35, %v5313_v34  ;;  %v7568_v46 = vld [vmem:[%s6467_s14 + $0x108] sm:$0xff]  ;;  %v7571_v50 = vld [vmem:[%s6467_s14 + $0x110] sm:$0xff] }
  0xf8   : > { %v7381_v0 = vpop.f32.mrf.mxu1  ;;  %5898 = vmatprep.subr.bf16.mxu1 %v6281_v52  ;;  %3638 = vmatprep.mubr.bf16.mxu0 %v5133_v8  ;;  %v5316_v45 = vadd.f32 %v7376_v62, %v7366_v58  ;;  %v7574_v52 = vld [vmem:[%s6472_s16 + $0x108] sm:$0xff]  ;;  %v5135_v8 = vcombine.high %v7568_v46, %v7571_v50  ;;  %v5134_v58 = vcombine.low %v7568_v46, %v7571_v50 }
  0xf9   : > { %v7386_v2 = vpop.f32.mrf.mxu0  ;;  %3839 = vmatprep.mubr.bf16.mxu1 %v5157_v10  ;;  %v7581_v10 = vld [vmem:[%s6472_s16 + $0x110] sm:$0xff] }
  0xfa   : > { %v7393_v7 = vpop.f32.mrf.mxu1  ;;  %5859 = vmatpush3.bf16.msra.mxu0 %v6282_v55 }
  0xfb   : > { %v7400_v12 = vpop.f32.mrf.mxu0  ;;  %5899 = vmatpush3.bf16.msra.mxu1 %v6283_v53  ;;  %5860 = vmatprep.subr.bf16.mxu0 %v6288_v13  ;;  %v5356_v53 = vadd.f32 %v7381_v0, %v7371_v60  ;;  %v6300_v60 = vld [vmem:[%s7893_s2 + $0x148] sm:$0xff]  }
  0xfc   : > { %v7407_v14 = vpop.f32.mrf.mxu1  ;;  %5900 = vmatprep.subr.bf16.mxu1 %v6289_v16 }
  0xfd   : > { %v7418_v18 = vpop.f32.mrf.mxu0  ;;  %3639 = vmatmul.mubr.bf16.gmra.mxu0 %v5132_v9  ;;  %v5159_v9 = vcombine.high %v7574_v52, %v7581_v10  ;;  %v5359_v24 = vadd.f32 %v7407_v14, %v7393_v7 }
  0xfe   : > { %v7420_v20 = vpop.f32.mrf.mxu1  ;;  %3840 = vmatmul.mubr.bf16.gmra.mxu1 %v5156_v5  ;;  %5861 = vmatpush3.bf16.msra.mxu0 %v6290_v21  ;;  %v5158_v5 = vcombine.low %v7574_v52, %v7581_v10  ;;  %v5319_v21 = vadd.f32 %v7400_v12, %v7386_v2  ;;  %v6302_v2 = vld [vmem:[%s7893_s2 + $0x108] sm:$0xff]  }
  0xff   : > { %v7428_v25 = vpop.f32.mrf.mxu0  ;;  %5901 = vmatpush3.bf16.msra.mxu1 %v6291_v22  ;;  %5862 = vmatprep.subr.bf16.mxu0 %v6292_v38  ;;  %v6301_v22 = vld [vmem:[%s7893_s2 + $0x1c8] sm:$0xff]   ;;  %v730_v38 = vadd.f32 %v5356_v53, %v5316_v45  ;;  %v6306_v45 = vld [vmem:[%s7893_s2 + $0x100] sm:$0xff]  }
 0x100   : > { %v7430_v26 = vpop.f32.mrf.mxu1  ;;  %5902 = vmatprep.subr.bf16.mxu1 %v6293_v40  ;;  %3646 = vmatprep.mubr.bf16.mxu0 %v5135_v8  ;;  %v6303_v40 = vld [vmem:[%s7893_s2 + $0x188] sm:$0xff]  }
 0x101   : > { %v7444_v28 = vpop.f32.mrf.mxu0  ;;  %3847 = vmatprep.mubr.bf16.mxu1 %v5159_v9  ;;  %v5208_v9 = vcombine.low %v7398_v11, %v7451_v31 }
 0x102   : > { %v7446_v29 = vpop.f32.mrf.mxu1  ;;  %5863 = vmatpush3.bf16.msra.mxu0 %v6294_v43  ;;  %v6304_v43 = vld [vmem:[%s7893_s2 + $0x140] sm:$0xff]  }
 0x103   : > { %v7465_v33 = vpop.f32.mrf.mxu0  ;;  %5903 = vmatpush3.bf16.msra.mxu1 %v6295_v57  ;;  %5864 = vmatprep.subr.bf16.mxu0 %v6300_v60 }
 0x104   : > { %v7467_v42 = vpop.f32.mrf.mxu1  ;;  %5904 = vmatprep.subr.bf16.mxu1 %v6301_v22 }
 0x105   : > { %v7478_v48 = vpop.f32.mrf.mxu0  ;;  %3647 = vmatmul.mubr.bf16.gmra.mxu0 %v5134_v58  ;;  %v5322_v58 = vadd.f32 %v7428_v25, %v7418_v18  ;;  %v7642_v18 = vld [vmem:[%s7894_s3] ss:$0 sm:$0xff]  ;;  %v5211_v25 = vcombine.high %v7454_v32, %v7507_v1 }
 0x106   : > { %v7483_v51 = vpop.f32.mrf.mxu1  ;;  %3848 = vmatmul.mubr.bf16.gmra.mxu1 %v5158_v5  ;;  %5865 = vmatpush3.bf16.msra.mxu0 %v6302_v2  ;;  %v5264_v5 = vcombine.low %v7390_v4, %v7439_v19 }
 0x107   : > { %v7488_v49 = vpop.f32.mrf.mxu0  ;;  %5905 = vmatpush3.bf16.msra.mxu1 %v6303_v40  ;;  %5866 = vmatprep.subr.bf16.mxu0 %v6304_v43 }
 0x108   : > { %v7493_v56 = vpop.f32.mrf.mxu1  ;;  %4313 = vmatprep.mubr.bf16.mxu1 %v5265_v30  ;;  %v5328_v43 = vadd.f32 %v7488_v49, %v7478_v48 }
 0x109   : > { %v7501_v61 = vpop.f32.mrf.mxu0 }
 0x10a   : > { %v7512_v6 = vpop.f32.mrf.mxu1  ;;  %5867 = vmatpush3.bf16.msra.mxu0 %v6306_v45  ;;  %v5368_v45 = vadd.f32 %v7493_v56, %v7483_v51 }
 0x10b   : > { %v7525_v15 = vpop.f32.mrf.mxu0 }
 0x10c   : > { %v7530_v17 = vpop.f32.mrf.mxu1  ;;  %v5331_v51 = vadd.f32 %v7525_v15, %v7501_v61 }
 0x10d   : > { %v5388_v23 = vpop.f32.mrf.mxu0 }
 0x10e   : > { %v5428_v37 = vpop.f32.mrf.mxu1 }
 0x10f   : > { %v5389_v41 = vpop.f32.mrf.mxu0 }
 0x110   : > { %v5390_v47 = vadd.f32 %v5389_v41, %v5388_v23  ;;  %v5429_v54 = vpop.f32.mrf.mxu1  ;;  %v5209_v23 = vcombine.high %v7398_v11, %v7451_v31 }
 0x111   : > { %v5391_v39 = vpop.f32.mrf.mxu0  ;;  %v5430_v7 = vadd.f32 %v5429_v54, %v5428_v37 }
 0x112   : > { %v5431_v55 = vpop.f32.mrf.mxu1  ;;  %v994_v0 = vadd.f32 %v5390_v47, %v722_v36  ;;  %4064 = vmatprep.mubr.bf16.mxu0 %v5209_v23 }
 0x113   : > { %v5392_v62 = vpop.f32.mrf.mxu0  ;;  %4065 = vmatmul.mubr.bf16.vlgmr.msra.gmra.mxu0 %v5208_v9 }
 0x114   : > { %v5393_v13 = vadd.f32 %v5392_v62, %v5391_v39  ;;  %v5432_v16 = vpop.f32.mrf.mxu1  ;;  %v1244_v47 = vadd.f32 %v5430_v7, %v994_v0  ;;  %v6305_v39 = vld [vmem:[%s7893_s2 + $0x1c0] sm:$0xff]   ;;  %4072 = vmatprep.mubr.bf16.mxu0 %v5211_v25 }
 0x115   : > { %v5394_v34 = vpop.f32.mrf.mxu0  ;;  %v5433_v14 = vadd.f32 %v5432_v16, %v5431_v55  ;;  %5906 = vmatprep.subr.bf16.mxu1 %v6305_v39  ;;  %v6307_v62 = vld [vmem:[%s7893_s2 + $0x180] sm:$0xff]   ;;  %v5325_v16 = vadd.f32 %v7465_v33, %v7444_v28 }
 0x116   : > { %v995_v12 = vadd.f32 %v5393_v13, %v725_v44  ;;  %v5434_v35 = vpop.f32.mrf.mxu1  ;;  %v733_v44 = vadd.f32 %v5359_v24, %v5319_v21  ;;  %v1258_v11 = vadd.f32 %v7642_v18, %v1244_v47  ;;  %v5362_v13 = vadd.f32 %v7430_v26, %v7420_v20  ;;  %5907 = vmatpush3.bf16.msra.mxu1 %v6307_v62 }
 0x117   : > { %v5395_v41 = vpop.f32.mrf.mxu0  ;;  %v5365_v21 = vadd.f32 %v7467_v42, %v7446_v29  ;;  %v5267_v24 = vcombine.high %v7442_v27, %v7499_v59 }
 0x118   : > { %v1245_v37 = vadd.f32 %v5433_v14, %v995_v12  ;;  %v5396_v54 = vadd.f32 %v5395_v41, %v5394_v34  ;;  %v5435_v57 = vpop.f32.mrf.mxu1  ;;  %1266 = vst [vmem:[%s7637_s11] sm:$0xff] %v1258_v11  ;;  %v1288_v23 = vmul.f32 %v1258_v11, %v1258_v11  ;;  %v738_v14 = vadd.f32 %v5362_v13, %v5322_v58 }
 0x119   : > { %v5397_v36 = vpop.f32.mrf.mxu0  ;;  %v5436_v53 = vadd.f32 %v5435_v57, %v5434_v35  ;;  %4314 = vmatmul.mubr.bf16.vlgmr.msra.gmra.mxu1 %v5264_v5  ;;  %v741_v41 = vadd.f32 %v5365_v21, %v5325_v16  ;;  %v4112_v16 = vld [vmem:[%s6467_s14 + $0x118] sm:$0xff] }
 0x11a   : > { %v996_v55 = vadd.f32 %v5396_v54, %v730_v38  ;;  %v5437_v8 = vpop.f32.mrf.mxu1  ;;  %v1259_v4 = vadd.f32 %v7642_v18, %v1245_v37  ;;  %4321 = vmatprep.mubr.bf16.mxu1 %v5267_v24  ;;  %v5210_v54 = vcombine.low %v7454_v32, %v7507_v1  ;;  %v5269_v32 = vcombine.high %v7504_v63, %v7568_v46 }
 0x11b   : > { %v5398_v60 = vpop.f32.mrf.mxu0 }
 0x11c   : > { %v1246_v19 = vadd.f32 %v5436_v53, %v996_v55  ;;  %v5399_v31 = vadd.f32 %v5398_v60, %v5397_v36  ;;  %v5438_v0 = vpop.f32.mrf.mxu1  ;;  %1267 = vst [vmem:[%s7637_s11 + $0x8] sm:$0xff] %v1259_v4  ;;  %v1274_v30 = vadd.f32 %v1259_v4, %v1258_v11  ;;  %v1289_v34 = vmul.f32 %v1259_v4, %v1259_v4 }
 0x11d   : > { %v5400_v22 = vpop.f32.mrf.mxu0  ;;  %v5439_v28 = vadd.f32 %v5438_v0, %v5437_v8  ;;  %v5266_v55 = vcombine.low %v7442_v27, %v7499_v59  ;;  %v5213_v53 = vcombine.high %v7510_v3, %v7574_v52  ;;  %v5371_v27 = vadd.f32 %v7530_v17, %v7512_v6  ;;  %4073 = vmatmul.mubr.bf16.gmra.mxu0 %v5210_v54 }
 0x11e   : > { %v1260_v2 = vadd.f32 %v7642_v18, %v1246_v19  ;;  %v5440_v20 = vpop.f32.mrf.mxu1  ;;  %v997_v26 = vadd.f32 %v5399_v31, %v733_v44  ;;  %v1296_v29 = vadd.f32 %v1289_v34, %v1288_v23  ;;  %v746_v11 = vadd.f32 %v5368_v45, %v5328_v43  ;;  %v3863_v19 = vld [vmem:[%s6472_s16 + $0x118] sm:$0xff] }
 0x11f   : > { %v5401_v33 = vpop.f32.mrf.mxu0  ;;  %4080 = vmatprep.mubr.bf16.mxu0 %v5213_v53  ;;  %v749_v0 = vadd.f32 %v5371_v27, %v5331_v51  ;;  %v5212_v23 = vcombine.low %v7510_v3, %v7574_v52 }
 0x120   : > { %1268 = vst [vmem:[%s7637_s11 + $0x10] sm:$0xff] %v1260_v2  ;;  %v1275_v42 = vadd.f32 %v1274_v30, %v1260_v2  ;;  %v1290_v7 = vmul.f32 %v1260_v2, %v1260_v2  ;;  %v5441_v12 = vpop.f32.mrf.mxu1  ;;  %v1247_v35 = vadd.f32 %v5439_v28, %v997_v26  ;;  %v5402_v38 = vadd.f32 %v5401_v33, %v5400_v22 }
 0x121   : > { %v5403_v40 = vpop.f32.mrf.mxu0  ;;  %v5442_v36 = vadd.f32 %v5441_v12, %v5440_v20  ;;  %4322 = vmatmul.mubr.bf16.gmra.mxu1 %v5266_v55  ;;  %v5268_v30 = vcombine.low %v7504_v63, %v7568_v46  ;;  %v5215_v2 = vcombine.high %v7581_v10, %v3863_v19 }
 0x122   : > { %v1297_v47 = vadd.f32 %v1296_v29, %v1290_v7  ;;  %v5443_v37 = vpop.f32.mrf.mxu1  ;;  %v1261_v57 = vadd.f32 %v7642_v18, %v1247_v35  ;;  %v998_v39 = vadd.f32 %v5402_v38, %v738_v14  ;;  %4329 = vmatprep.mubr.bf16.mxu1 %v5269_v32  ;;  %v5271_v7 = vcombine.high %v7571_v50, %v4112_v16 }
 0x123   : > { %v5404_v44 = vpop.f32.mrf.mxu0 }
 0x124   : > { %v5405_v48 = vadd.f32 %v5404_v44, %v5403_v40  ;;  %v5444_v49 = vpop.f32.mrf.mxu1  ;;  %1269 = vst [vmem:[%s7637_s11 + $0x18] sm:$0xff] %v1261_v57  ;;  %v1276_v8 = vadd.f32 %v1275_v42, %v1261_v57  ;;  %v1291_v58 = vmul.f32 %v1261_v57, %v1261_v57  ;;  %v1248_v1 = vadd.f32 %v5442_v36, %v998_v39 }
 0x125   : > { %v5406_v62 = vpop.f32.mrf.mxu0  ;;  %v5445_v59 = vadd.f32 %v5444_v49, %v5443_v37  ;;  %4081 = vmatmul.mubr.bf16.gmra.mxu0 %v5212_v23  ;;  %v5214_v57 = vcombine.low %v7581_v10, %v3863_v19  ;;  %v5270_v36 = vcombine.low %v7571_v50, %v4112_v16 }
 0x126   : > { %v999_v56 = vadd.f32 %v5405_v48, %v741_v41  ;;  %v5446_v9 = vpop.f32.mrf.mxu1  ;;  %v1298_v5 = vadd.f32 %v1297_v47, %v1291_v58  ;;  %v1262_v25 = vadd.f32 %v7642_v18, %v1248_v1  ;;  %4088 = vmatprep.mubr.bf16.mxu0 %v5215_v2 }
 0x127   : > { %v5407_v60 = vpop.f32.mrf.mxu0 }
 0x128   : > { %v1249_v4 = vadd.f32 %v5445_v59, %v999_v56  ;;  %v5408_v31 = vadd.f32 %v5407_v60, %v5406_v62  ;;  %v5447_v61 = vpop.f32.mrf.mxu1  ;;  %1270 = vst [vmem:[%s7637_s11 + $0x20] sm:$0xff] %v1262_v25  ;;  %v1277_v6 = vadd.f32 %v1276_v8, %v1262_v25  ;;  %v1292_v15 = vmul.f32 %v1262_v25, %v1262_v25 }
 0x129   : > { %v5409_v17 = vpop.f32.mrf.mxu0  ;;  %v5448_v24 = vadd.f32 %v5447_v61, %v5446_v9  ;;  %4330 = vmatmul.mubr.bf16.gmra.mxu1 %v5268_v30 }
 0x12a   : > { %v1263_v13 = vadd.f32 %v7642_v18, %v1249_v4  ;;  %v1000_v21 = vadd.f32 %v5408_v31, %v746_v11  ;;  %v5449_v22 = vpop.f32.mrf.mxu1  ;;  %v1299_v34 = vadd.f32 %v1298_v5, %v1292_v15  ;;  %4337 = vmatprep.mubr.bf16.mxu1 %v5271_v7 }
 0x12b   : > { %v5410_v20 = vpop.f32.mrf.mxu0 }
 0x12c   : > { %1271 = vst [vmem:[%s7637_s11 + $0x28] sm:$0xff] %v1263_v13  ;;  %v1278_v26 = vadd.f32 %v1277_v6, %v1263_v13  ;;  %v1293_v28 = vmul.f32 %v1263_v13, %v1263_v13  ;;  %v1250_v33 = vadd.f32 %v5448_v24, %v1000_v21  ;;  %v5411_v29 = vadd.f32 %v5410_v20, %v5409_v17  ;;  %v5450_v42 = vpop.f32.mrf.mxu1 }
 0x12d   : > { %v5451_v52 = vadd.f32 %v5450_v42, %v5449_v22  ;;  %v5468_v35 = vpop.f32.mrf.mxu0  ;;  %4089 = vmatmul.mubr.bf16.gmra.mxu0 %v5214_v57 }
 0x12e   : > { %v1300_v12 = vadd.f32 %v1299_v34, %v1293_v28  ;;  %v1264_v14 = vadd.f32 %v7642_v18, %v1250_v33  ;;  %v1001_v3 = vadd.f32 %v5411_v29, %v749_v0  ;;  %v5508_v63 = vpop.f32.mrf.mxu1 }
 0x12f   : > { %v5469_v41 = vpop.f32.mrf.mxu0 }
 0x130   : > { %1272 = vst [vmem:[%s7637_s11 + $0x30] sm:$0xff] %v1264_v14  ;;  %v1279_v46 = vadd.f32 %v1278_v26, %v1264_v14  ;;  %v1294_v38 = vmul.f32 %v1264_v14, %v1264_v14  ;;  %v1251_v40 = vadd.f32 %v5451_v52, %v1001_v3  ;;  %v5509_v43 = vpop.f32.mrf.mxu1  ;;  %v5470_v0 = vadd.f32 %v5469_v41, %v5468_v35 }
 0x131   : > { %v5471_v54 = vpop.f32.mrf.mxu0  ;;  %4338 = vmatmul.mubr.bf16.gmra.mxu1 %v5270_v36  ;;  %v5510_v13 = vadd.f32 %v5509_v43, %v5508_v63 }
 0x132   : > { %v1301_v47 = vadd.f32 %v1300_v12, %v1294_v38  ;;  %v1265_v37 = vadd.f32 %v7642_v18, %v1251_v40  ;;  %v5511_v39 = vpop.f32.mrf.mxu1 }
 0x133   : > { %v5472_v55 = vpop.f32.mrf.mxu0  ;;  %v1762_v30 = vadd.f32 %v5510_v13, %v5470_v0 }
 0x134   : > { %1273 = vst [vmem:[%s7637_s11 + $0x38] sm:$0xff] %v1265_v37  ;;  %v7696_v44 = vadd.f32 %v1279_v46, %v1265_v37  ;;  %v1295_v45 = vmul.f32 %v1265_v37, %v1265_v37  ;;  %v5512_v53 = vpop.f32.mrf.mxu1  ;;  %v5473_v24 = vadd.f32 %v5472_v55, %v5471_v54 }
 0x135   : > { %v5474_v49 = vpop.f32.mrf.mxu0  ;;  %v5513_v22 = vadd.f32 %v5512_v53, %v5511_v39 }
 0x136   : > { %v7698_v48 = vadd.f32 %v1301_v47, %v1295_v45  ;;  %v5514_v8 = vpop.f32.mrf.mxu1 }
 0x137   : > { %v5475_v58 = vpop.f32.mrf.mxu0  ;;  %v1765_v29 = vadd.f32 %v5513_v22, %v5473_v24 }
 0x138   : > { %v5515_v32 = vpop.f32.mrf.mxu1  ;;  %v5476_v7 = vadd.f32 %v5475_v58, %v5474_v49 }
 0x139   : > { %v5477_v1 = vpop.f32.mrf.mxu0  ;;  %v5516_v12 = vadd.f32 %v5515_v32, %v5514_v8 }
 0x13a   : > { %v5517_v62 = vpop.f32.mrf.mxu1 }
 0x13b   : > { %v5478_v10 = vpop.f32.mrf.mxu0  ;;  %v1770_v37 = vadd.f32 %v5516_v12, %v5476_v7 }
 0x13c   : > { %v5518_v51 = vpop.f32.mrf.mxu1  ;;  %v5479_v41 = vadd.f32 %v5478_v10, %v5477_v1 }
 0x13d   : > { %v5480_v27 = vpop.f32.mrf.mxu0  ;;  %v5519_v43 = vadd.f32 %v5518_v51, %v5517_v62 }
 0x13e   : > { %v5520_v50 = vpop.f32.mrf.mxu1 }
 0x13f   : > { %v5481_v56 = vpop.f32.mrf.mxu0  ;;  %v1773_v8 = vadd.f32 %v5519_v43, %v5479_v41 }
 0x140   : > { %v5521_v59 = vpop.f32.mrf.mxu1  ;;  %v5482_v58 = vadd.f32 %v5481_v56, %v5480_v27 }
 0x141   : > { %v7700_v9 = vpop.f32.mrf.mxu0  ;;  %v5522_v32 = vadd.f32 %v5521_v59, %v5520_v50 }
 0x142   : > { %v7702_v5 = vpop.f32.mrf.mxu1 }
 0x143   : > { %v7704_v25 = vpop.f32.mrf.mxu0 }
 0x144   : > { %v7706_v60 = vpop.f32.mrf.mxu1  ;;  %v5485_v27 = vadd.f32 %v7704_v25, %v7700_v9 }
 0x145   : > { %v7708_v11 = vpop.f32.mrf.mxu0  ;;  %v5525_v50 = vadd.f32 %v7706_v60, %v7702_v5 }
 0x146   : > { %v7710_v4 = vpop.f32.mrf.mxu1 }
 0x147   : > { %v7712_v19 = vpop.f32.mrf.mxu0 }
 0x148   : > { %v7714_v31 = vpop.f32.mrf.mxu1  ;;  %v5488_v9 = vadd.f32 %v7712_v19, %v7708_v11 }
 0x149   : > { %v7716_v61 = vpop.f32.mrf.mxu0  ;;  %v5528_v5 = vadd.f32 %v7714_v31, %v7710_v4 }
 0x14a   : > { %v7718_v6 = vpop.f32.mrf.mxu1 }
 0x14b   : > { %v7720_v15 = vpop.f32.mrf.mxu0 }
 0x14c   : > { %v7722_v17 = vpop.f32.mrf.mxu1  ;;  %v5491_v11 = vadd.f32 %v7720_v15, %v7716_v61  ;;  %v1281_v61 = vrot.slane %v7696_v44, 4 }
 0x14d   : > { %v5548_v16 = vpop.f32.mrf.mxu0  ;;  %v5531_v4 = vadd.f32 %v7722_v17, %v7718_v6 }
 0x14e   : > { %v5588_v21 = vpop.f32.mrf.mxu1 }
 0x14f   : > { %v5549_v23 = vpop.f32.mrf.mxu0  ;;  %v1789_v15 = vadd.f32 %v5531_v4, %v5491_v11 }
 0x150   : > { %v5550_v34 = vadd.f32 %v5549_v23, %v5548_v16  ;;  %v5589_v2 = vpop.f32.mrf.mxu1 }
 0x151   : > { %v5551_v20 = vpop.f32.mrf.mxu0  ;;  %v5590_v28 = vadd.f32 %v5589_v2, %v5588_v21  ;;  %v1778_v2 = vadd.f32 %v5522_v32, %v5482_v58 }
 0x152   : > { %v2033_v26 = vadd.f32 %v5550_v34, %v1762_v30  ;;  %v5591_v33 = vpop.f32.mrf.mxu1 }
 0x153   : > { %v5552_v42 = vpop.f32.mrf.mxu0 }
 0x154   : > { %v2282_v14 = vadd.f32 %v5590_v28, %v2033_v26  ;;  %v5553_v3 = vadd.f32 %v5552_v42, %v5551_v20  ;;  %v5592_v52 = vpop.f32.mrf.mxu1 }
 0x155   : > { %v5554_v35 = vpop.f32.mrf.mxu0  ;;  %v5593_v38 = vadd.f32 %v5592_v52, %v5591_v33  ;;  %v1781_v52 = vadd.f32 %v5525_v50, %v5485_v27 }
 0x156   : > { %v2290_v63 = vadd.f32 %v7642_v18, %v2282_v14  ;;  %v2034_v46 = vadd.f32 %v5553_v3, %v1765_v29  ;;  %v5594_v40 = vpop.f32.mrf.mxu1 }
 0x157   : > { %v5555_v47 = vpop.f32.mrf.mxu0 }
 0x158   : > { %2298 = vst [vmem:[%s7637_s11 + $0x40] sm:$0xff] %v2290_v63  ;;  %v2283_v54 = vadd.f32 %v5593_v38, %v2034_v46  ;;  %v5556_v57 = vadd.f32 %v5555_v47, %v5554_v35  ;;  %v5595_v39 = vpop.f32.mrf.mxu1  ;;  %v2320_v0 = vmul.f32 %v2290_v63, %v2290_v63 }
 0x159   : > { %v5557_v36 = vpop.f32.mrf.mxu0  ;;  %v5596_v53 = vadd.f32 %v5595_v39, %v5594_v40 }
 0x15a   : > { %v2291_v45 = vadd.f32 %v7642_v18, %v2283_v54  ;;  %v2035_v55 = vadd.f32 %v5556_v57, %v1770_v37  ;;  %v5597_v49 = vpop.f32.mrf.mxu1  ;;  %v1786_v57 = vadd.f32 %v5528_v5, %v5488_v9 }
 0x15b   : > { %v5558_v13 = vpop.f32.mrf.mxu0 }
 0x15c   : > { %2299 = vst [vmem:[%s7637_s11 + $0x48] sm:$0xff] %v2291_v45  ;;  %v2306_v1 = vadd.f32 %v2291_v45, %v2290_v63  ;;  %v2321_v62 = vmul.f32 %v2291_v45, %v2291_v45  ;;  %v2284_v10 = vadd.f32 %v5596_v53, %v2035_v55  ;;  %v5559_v51 = vadd.f32 %v5558_v13, %v5557_v36  ;;  %v5598_v16 = vpop.f32.mrf.mxu1 }
 0x15d   : > { %v5560_v21 = vpop.f32.mrf.mxu0  ;;  %v5599_v30 = vadd.f32 %v5598_v16, %v5597_v49 }
 0x15e   : > { %v2328_v24 = vadd.f32 %v2321_v62, %v2320_v0  ;;  %v2292_v22 = vadd.f32 %v7642_v18, %v2284_v10  ;;  %v2036_v23 = vadd.f32 %v5559_v51, %v1773_v8  ;;  %v5600_v34 = vpop.f32.mrf.mxu1  ;;  %v1303_v51 = vrot.slane %v7698_v48, 4 }
 0x15f   : > { %v5561_v56 = vpop.f32.mrf.mxu0 }
 0x160   : > { %2300 = vst [vmem:[%s7637_s11 + $0x50] sm:$0xff] %v2292_v22  ;;  %v2307_v59 = vadd.f32 %v2306_v1, %v2292_v22  ;;  %v2322_v20 = vmul.f32 %v2292_v22, %v2292_v22  ;;  %v2285_v26 = vadd.f32 %v5599_v30, %v2036_v23  ;;  %v5562_v28 = vadd.f32 %v5561_v56, %v5560_v21  ;;  %v5601_v33 = vpop.f32.mrf.mxu1 }
 0x161   : > { %v5563_v29 = vpop.f32.mrf.mxu0  ;;  %v5602_v14 = vadd.f32 %v5601_v33, %v5600_v34  ;;  %v1282_v34 = vadd.f32 %v1281_v61, %v7696_v44 }
 0x162   : > { %v2329_v42 = vadd.f32 %v2328_v24, %v2322_v20  ;;  %v2293_v7 = vadd.f32 %v7642_v18, %v2285_v26  ;;  %v2037_v12 = vadd.f32 %v5562_v28, %v1778_v2  ;;  %v5603_v3 = vpop.f32.mrf.mxu1  ;;  %v1304_v20 = vadd.f32 %v1303_v51, %v7698_v48 }
 0x163   : > { %v5564_v25 = vpop.f32.mrf.mxu0 }
 0x164   : > { %2301 = vst [vmem:[%s7637_s11 + $0x58] sm:$0xff] %v2293_v7  ;;  %v2308_v60 = vadd.f32 %v2307_v59, %v2293_v7  ;;  %v2323_v35 = vmul.f32 %v2293_v7, %v2293_v7  ;;  %v2286_v63 = vadd.f32 %v5602_v14, %v2037_v12  ;;  %v5565_v46 = vadd.f32 %v5564_v25, %v5563_v29  ;;  %v5604_v38 = vpop.f32.mrf.mxu1 }
 0x165   : > { %v5566_v40 = vpop.f32.mrf.mxu0  ;;  %v5605_v37 = vadd.f32 %v5604_v38, %v5603_v3  ;;  %v1305_v44 = vrot.slane %v1304_v20, 2 }
 0x166   : > { %v2330_v41 = vadd.f32 %v2329_v42, %v2323_v35  ;;  %v2294_v43 = vadd.f32 %v7642_v18, %v2286_v63  ;;  %v2038_v47 = vadd.f32 %v5565_v46, %v1781_v52  ;;  %v5606_v54 = vpop.f32.mrf.mxu1  ;;  %v1283_v42 = vrot.slane %v1282_v34, 2 }
 0x167   : > { %v5567_v19 = vpop.f32.mrf.mxu0  ;;  %v1306_v46 = vadd.f32 %v1305_v44, %v1304_v20 }
 0x168   : > { %2302 = vst [vmem:[%s7637_s11 + $0x60] sm:$0xff] %v2294_v43  ;;  %v2309_v31 = vadd.f32 %v2308_v60, %v2294_v43  ;;  %v2324_v39 = vmul.f32 %v2294_v43, %v2294_v43  ;;  %v2287_v36 = vadd.f32 %v5605_v37, %v2038_v47  ;;  %v5568_v45 = vadd.f32 %v5567_v19, %v5566_v40  ;;  %v5607_v55 = vpop.f32.mrf.mxu1 }
 0x169   : > { %v5569_v53 = vpop.f32.mrf.mxu0  ;;  %v5608_v32 = vadd.f32 %v5607_v55, %v5606_v54  ;;  %v1284_v25 = vadd.f32 %v1283_v42, %v1282_v34  ;;  %v1307_v4 = vrot.slane %v1306_v46, 1 }
 0x16a   : > { %v2331_v49 = vadd.f32 %v2330_v41, %v2324_v39  ;;  %v2295_v8 = vadd.f32 %v7642_v18, %v2287_v36  ;;  %v2039_v58 = vadd.f32 %v5568_v45, %v1786_v57  ;;  %v5609_v0 = vpop.f32.mrf.mxu1 }
 0x16b   : > { %v5570_v6 = vpop.f32.mrf.mxu0  ;;  %v1285_v47 = vrot.slane %v1284_v25, 1 }
 0x16c   : > { %2303 = vst [vmem:[%s7637_s11 + $0x68] sm:$0xff] %v2295_v8  ;;  %v2310_v17 = vadd.f32 %v2309_v31, %v2295_v8  ;;  %v2325_v13 = vmul.f32 %v2295_v8, %v2295_v8  ;;  %v2288_v1 = vadd.f32 %v5608_v32, %v2039_v58  ;;  %v5571_v62 = vadd.f32 %v5570_v6, %v5569_v53  ;;  %v5610_v10 = vpop.f32.mrf.mxu1 }
 0x16d   : > { %v5611_v22 = vadd.f32 %v5610_v10, %v5609_v0  ;;  %v7751_v23 = vpop.f32.mrf.mxu0  ;;  %v1286_v36 = vadd.f32 %v1285_v47, %v1284_v25  ;;  %v1308_v8 = vadd.f32 %v1307_v4, %v1306_v46 }
 0x16e   : > { %v2332_v16 = vadd.f32 %v2331_v49, %v2325_v13  ;;  %v2296_v21 = vadd.f32 %v7642_v18, %v2288_v1  ;;  %v2040_v24 = vadd.f32 %v5571_v62, %v1789_v15  ;;  %v7753_v30 = vpop.f32.mrf.mxu1 }
 0x16f   : > { %v5629_v56 = vpop.f32.mrf.mxu0 }
 0x170   : > { %2304 = vst [vmem:[%s7637_s11 + $0x70] sm:$0xff] %v2296_v21  ;;  %v2311_v2 = vadd.f32 %v2310_v17, %v2296_v21  ;;  %v2326_v27 = vmul.f32 %v2296_v21, %v2296_v21  ;;  %v2289_v50 = vadd.f32 %v5611_v22, %v2040_v24  ;;  %v5669_v59 = vpop.f32.mrf.mxu1 }
 0x171   : > { %v5631_v33 = vpop.f32.mrf.mxu0 }
 0x172   : > { %v2333_v26 = vadd.f32 %v2332_v16, %v2326_v27  ;;  %v2297_v28 = vadd.f32 %v7642_v18, %v2289_v50  ;;  %v5671_v29 = vpop.f32.mrf.mxu1  ;;  %v5670_v27 = vadd.f32 %v5669_v59, %v7753_v30 }
 0x173   : > { %v5632_v14 = vpop.f32.mrf.mxu0 }
 0x174   : > { %2305 = vst [vmem:[%s7637_s11 + $0x78] sm:$0xff] %v2297_v28  ;;  %v2312_v7 = vadd.f32 %v2311_v2, %v2297_v28  ;;  %v2327_v12 = vmul.f32 %v2297_v28, %v2297_v28  ;;  %v5672_v3 = vpop.f32.mrf.mxu1  ;;  %v5630_v2 = vadd.f32 %v5629_v56, %v7751_v23 }
 0x175   : > { %v5634_v5 = vpop.f32.mrf.mxu0  ;;  %v5673_v28 = vadd.f32 %v5672_v3, %v5671_v29 }
 0x176   : > { %v2313_v52 = vrot.slane %v2312_v7, 4  ;;  %v2334_v9 = vadd.f32 %v2333_v26, %v2327_v12  ;;  %v5674_v63 = vpop.f32.mrf.mxu1  ;;  %v5633_v26 = vadd.f32 %v5632_v14, %v5631_v33 }
 0x177   : > { %v5635_v48 = vpop.f32.mrf.mxu0 }
 0x178   : > { %v2314_v60 = vadd.f32 %v2313_v52, %v2312_v7  ;;  %v2335_v35 = vrot.slane %v2334_v9, 4  ;;  %v5675_v41 = vpop.f32.mrf.mxu1  ;;  %v2794_v7 = vadd.f32 %v5670_v27, %v5630_v2 }
 0x179   : > { %v5637_v43 = vpop.f32.mrf.mxu0 }
 0x17a   : > { %v2315_v38 = vrot.slane %v2314_v60, 2  ;;  %v2336_v40 = vadd.f32 %v2335_v35, %v2334_v9  ;;  %v5677_v57 = vpop.f32.mrf.mxu1  ;;  %v2797_v35 = vadd.f32 %v5673_v28, %v5633_v26 }
 0x17b   : > { %v5638_v11 = vpop.f32.mrf.mxu0 }
 0x17c   : > { %v2316_v37 = vadd.f32 %v2315_v38, %v2314_v60  ;;  %v2337_v54 = vrot.slane %v2336_v40, 2  ;;  %v5678_v39 = vpop.f32.mrf.mxu1  ;;  %v5636_v38 = vadd.f32 %v5635_v48, %v5634_v5  ;;  %v5639_v47 = vadd.f32 %v5638_v11, %v5637_v43 }
 0x17d   : > { %v5640_v53 = vpop.f32.mrf.mxu0 }
 0x17e   : > { %v2317_v19 = vrot.slane %v2316_v37, 1  ;;  %v2338_v31 = vadd.f32 %v2337_v54, %v2336_v40  ;;  %v5680_v49 = vpop.f32.mrf.mxu1  ;;  %v5676_v40 = vadd.f32 %v5675_v41, %v5674_v63 }
 0x17f   : > { %v5641_v0 = vpop.f32.mrf.mxu0 }
 0x180   : > { %v2318_v45 = vadd.f32 %v2317_v19, %v2316_v37  ;;  %v2339_v55 = vrot.slane %v2338_v31, 1  ;;  %v5681_v61 = vpop.f32.mrf.mxu1  ;;  %v5679_v37 = vadd.f32 %v5678_v39, %v5677_v57  ;;  %v2802_v4 = vadd.f32 %v5676_v40, %v5636_v38 }
 0x181   : > { %v7764_v6 = vpop.f32.mrf.mxu0 }
 0x182   : > { %v7760_v58 = vadd.f32 %v2318_v45, %v1286_v36  ;;  %v2340_v32 = vadd.f32 %v2339_v55, %v2338_v31  ;;  %v7766_v17 = vpop.f32.mrf.mxu1  ;;  %v2805_v55 = vadd.f32 %v5679_v37, %v5639_v47 }
 0x183   : > { %v7768_v13 = vpop.f32.mrf.mxu0 }
 0x184   : > { %v7762_v15 = vadd.f32 %v2340_v32, %v1308_v8  ;;  %v7770_v1 = vpop.f32.mrf.mxu1  ;;  %v5642_v8 = vadd.f32 %v5641_v0, %v5640_v53  ;;  %v5682_v32 = vadd.f32 %v5681_v61, %v5680_v49  ;;  %v5645_v53 = vadd.f32 %v7768_v13, %v7764_v6 }
 0x185   : > { %v7772_v62 = vpop.f32.mrf.mxu0  ;;  %v5685_v49 = vadd.f32 %v7770_v1, %v7766_v17 }
 0x186   : > { %v7774_v10 = vpop.f32.mrf.mxu1 }
 0x187   : > { %v7776_v51 = vpop.f32.mrf.mxu0 }
 0x188   : > { %v7778_v16 = vpop.f32.mrf.mxu1  ;;  %v5648_v6 = vadd.f32 %v7776_v51, %v7772_v62 }
 0x189   : > { %v7780_v21 = vpop.f32.mrf.mxu0  ;;  %v5688_v17 = vadd.f32 %v7778_v16, %v7774_v10 }
 0x18a   : > { %v7782_v24 = vpop.f32.mrf.mxu1 }
 0x18b   : > { %v7784_v22 = vpop.f32.mrf.mxu0 }
 0x18c   : > { %v7786_v34 = vpop.f32.mrf.mxu1  ;;  %v5651_v62 = vadd.f32 %v7784_v22, %v7780_v21 }
 0x18d   : > { %v5708_v50 = vpop.f32.mrf.mxu0  ;;  %v5691_v10 = vadd.f32 %v7786_v34, %v7782_v24 }
 0x18e   : > { %v5748_v20 = vpop.f32.mrf.mxu1 }
 0x18f   : > { %v5709_v42 = vpop.f32.mrf.mxu0  ;;  %v2821_v21 = vadd.f32 %v5691_v10, %v5651_v62 }
 0x190   : > { %v5710_v12 = vadd.f32 %v5709_v42, %v5708_v50  ;;  %v5749_v44 = vpop.f32.mrf.mxu1 }
 0x191   : > { %v5711_v52 = vpop.f32.mrf.mxu0  ;;  %v5750_v25 = vadd.f32 %v5749_v44, %v5748_v20  ;;  %v2810_v44 = vadd.f32 %v5682_v32, %v5642_v8 }
 0x192   : > { %v3065_v9 = vadd.f32 %v5710_v12, %v2794_v7  ;;  %v5751_v60 = vpop.f32.mrf.mxu1 }
 0x193   : > { %v5712_v46 = vpop.f32.mrf.mxu0 }
 0x194   : > { %v3314_v23 = vadd.f32 %v5750_v25, %v3065_v9  ;;  %v5713_v56 = vadd.f32 %v5712_v46, %v5711_v52  ;;  %v5752_v30 = vpop.f32.mrf.mxu1 }
 0x195   : > { %v5714_v59 = vpop.f32.mrf.mxu0  ;;  %v5753_v14 = vadd.f32 %v5752_v30, %v5751_v60  ;;  %v2813_v30 = vadd.f32 %v5685_v49, %v5645_v53 }
 0x196   : > { %v3322_v33 = vadd.f32 %v7642_v18, %v3314_v23  ;;  %v3066_v29 = vadd.f32 %v5713_v56, %v2797_v35  ;;  %v5754_v3 = vpop.f32.mrf.mxu1 }
 0x197   : > { %v5715_v54 = vpop.f32.mrf.mxu0 }
 0x198   : > { %3330 = vst [vmem:[%s7637_s11 + $0x80] sm:$0xff] %v3322_v33  ;;  %v3315_v19 = vadd.f32 %v5753_v14, %v3066_v29  ;;  %v5716_v31 = vadd.f32 %v5715_v54, %v5714_v59  ;;  %v5755_v36 = vpop.f32.mrf.mxu1  ;;  %v3352_v2 = vmul.f32 %v3322_v33, %v3322_v33 }
 0x199   : > { %v5717_v5 = vpop.f32.mrf.mxu0  ;;  %v5756_v41 = vadd.f32 %v5755_v36, %v5754_v3 }
 0x19a   : > { %v3323_v63 = vadd.f32 %v7642_v18, %v3315_v19  ;;  %v3067_v48 = vadd.f32 %v5716_v31, %v2802_v4  ;;  %v5757_v45 = vpop.f32.mrf.mxu1  ;;  %v2818_v31 = vadd.f32 %v5688_v17, %v5648_v6 }
 0x19b   : > { %v5718_v27 = vpop.f32.mrf.mxu0 }
 0x19c   : > { %3331 = vst [vmem:[%s7637_s11 + $0x88] sm:$0xff] %v3323_v63  ;;  %v3338_v43 = vadd.f32 %v3323_v63, %v3322_v33  ;;  %v3353_v57 = vmul.f32 %v3323_v63, %v3323_v63  ;;  %v3316_v11 = vadd.f32 %v5756_v41, %v3067_v48  ;;  %v5719_v39 = vadd.f32 %v5718_v27, %v5717_v5  ;;  %v5758_v50 = vpop.f32.mrf.mxu1 }
 0x19d   : > { %v5720_v20 = vpop.f32.mrf.mxu0  ;;  %v5759_v7 = vadd.f32 %v5758_v50, %v5757_v45 }
 0x19e   : > { %v3360_v26 = vadd.f32 %v3353_v57, %v3352_v2  ;;  %v3324_v28 = vadd.f32 %v7642_v18, %v3316_v11  ;;  %v3068_v42 = vadd.f32 %v5719_v39, %v2805_v55  ;;  %v5760_v12 = vpop.f32.mrf.mxu1 }
 0x19f   : > { %v5721_v0 = vpop.f32.mrf.mxu0 }
 0x1a0   : > { %3332 = vst [vmem:[%s7637_s11 + $0x90] sm:$0xff] %v3324_v28  ;;  %v3339_v61 = vadd.f32 %v3338_v43, %v3324_v28  ;;  %v3354_v52 = vmul.f32 %v3324_v28, %v3324_v28  ;;  %v3317_v9 = vadd.f32 %v5759_v7, %v3068_v42  ;;  %v5722_v25 = vadd.f32 %v5721_v0, %v5720_v20  ;;  %v5761_v60 = vpop.f32.mrf.mxu1 }
 0x1a1   : > { %v5723_v35 = vpop.f32.mrf.mxu0  ;;  %v5762_v23 = vadd.f32 %v5761_v60, %v5760_v12 }
 0x1a2   : > { %v3361_v46 = vadd.f32 %v3360_v26, %v3354_v52  ;;  %v3325_v38 = vadd.f32 %v7642_v18, %v3317_v9  ;;  %v3069_v40 = vadd.f32 %v5722_v25, %v2810_v44  ;;  %v5763_v56 = vpop.f32.mrf.mxu1 }
 0x1a3   : > { %v5724_v13 = vpop.f32.mrf.mxu0 }
 0x1a4   : > { %3333 = vst [vmem:[%s7637_s11 + $0x98] sm:$0xff] %v3325_v38  ;;  %v3340_v1 = vadd.f32 %v3339_v61, %v3325_v38  ;;  %v3355_v59 = vmul.f32 %v3325_v38, %v3325_v38  ;;  %v3318_v33 = vadd.f32 %v5762_v23, %v3069_v40  ;;  %v5725_v29 = vadd.f32 %v5724_v13, %v5723_v35  ;;  %v5764_v14 = vpop.f32.mrf.mxu1 }
 0x1a5   : > { %v5726_v3 = vpop.f32.mrf.mxu0  ;;  %v5765_v4 = vadd.f32 %v5764_v14, %v5763_v56 }
 0x1a6   : > { %v3362_v47 = vadd.f32 %v3361_v46, %v3355_v59  ;;  %v3326_v37 = vadd.f32 %v7642_v18, %v3318_v33  ;;  %v3070_v54 = vadd.f32 %v5725_v29, %v2813_v30  ;;  %v5766_v19 = vpop.f32.mrf.mxu1 }
 0x1a7   : > { %v5727_v51 = vpop.f32.mrf.mxu0 }
 0x1a8   : > { %3334 = vst [vmem:[%s7637_s11 + $0xa0] sm:$0xff] %v3326_v37  ;;  %v3341_v16 = vadd.f32 %v3340_v1, %v3326_v37  ;;  %v3356_v36 = vmul.f32 %v3326_v37, %v3326_v37  ;;  %v3319_v5 = vadd.f32 %v5765_v4, %v3070_v54  ;;  %v5728_v63 = vadd.f32 %v5727_v51, %v5726_v3  ;;  %v5767_v48 = vpop.f32.mrf.mxu1 }
 0x1a9   : > { %v5729_v41 = vpop.f32.mrf.mxu0  ;;  %v5768_v32 = vadd.f32 %v5767_v48, %v5766_v19 }
 0x1aa   : > { %v3363_v45 = vadd.f32 %v3362_v47, %v3356_v36  ;;  %v3327_v55 = vadd.f32 %v7642_v18, %v3319_v5  ;;  %v3071_v8 = vadd.f32 %v5728_v63, %v2818_v31  ;;  %v5769_v2 = vpop.f32.mrf.mxu1 }
 0x1ab   : > { %v5730_v22 = vpop.f32.mrf.mxu0 }
 0x1ac   : > { %3335 = vst [vmem:[%s7637_s11 + $0xa8] sm:$0xff] %v3327_v55  ;;  %v3342_v24 = vadd.f32 %v3341_v16, %v3327_v55  ;;  %v3357_v34 = vmul.f32 %v3327_v55, %v3327_v55  ;;  %v3320_v27 = vadd.f32 %v5768_v32, %v3071_v8  ;;  %v5731_v43 = vadd.f32 %v5730_v22, %v5729_v41  ;;  %v5770_v57 = vpop.f32.mrf.mxu1 }
 0x1ad   : > { %v5771_v20 = vadd.f32 %v5770_v57, %v5769_v2  ;;  %v5788_v26 = vpop.f32.mrf.mxu0 }
 0x1ae   : > { %v3364_v11 = vadd.f32 %v3363_v45, %v3357_v34  ;;  %v3328_v39 = vadd.f32 %v7642_v18, %v3320_v27  ;;  %v3072_v50 = vadd.f32 %v5731_v43, %v2821_v21  ;;  %v5828_v28 = vpop.f32.mrf.mxu1 }
 0x1af   : > { %v5789_v44 = vpop.f32.mrf.mxu0 }
 0x1b0   : > { %3336 = vst [vmem:[%s7637_s11 + $0xb0] sm:$0xff] %v3328_v39  ;;  %v3343_v42 = vadd.f32 %v3342_v24, %v3328_v39  ;;  %v3358_v7 = vmul.f32 %v3328_v39, %v3328_v39  ;;  %v3321_v12 = vadd.f32 %v5771_v20, %v3072_v50  ;;  %v5829_v53 = vpop.f32.mrf.mxu1  ;;  %v5790_v22 = vadd.f32 %v5789_v44, %v5788_v26 }
 0x1b1   : > { %v5791_v61 = vpop.f32.mrf.mxu0  ;;  %v5830_v24 = vadd.f32 %v5829_v53, %v5828_v28  ;;  %v7851_v53 = vld [vmem:[%s7894_s3] ss:$0 sm:$0xff] }
 0x1b2   : > { %v3365_v49 = vadd.f32 %v3364_v11, %v3358_v7  ;;  %v3329_v0 = vadd.f32 %v7642_v18, %v3321_v12  ;;  %v5831_v52 = vpop.f32.mrf.mxu1 }
 0x1b3   : > { %v5792_v60 = vpop.f32.mrf.mxu0  ;;  %v3826_v57 = vadd.f32 %v5830_v24, %v5790_v22 }
 0x1b4   : > { %3337 = vst [vmem:[%s7637_s11 + $0xb8] sm:$0xff] %v3329_v0  ;;  %v3344_v9 = vadd.f32 %v3343_v42, %v3329_v0  ;;  %v3359_v25 = vmul.f32 %v3329_v0, %v3329_v0  ;;  %v5832_v35 = vpop.f32.mrf.mxu1  ;;  %v5793_v11 = vadd.f32 %v5792_v60, %v5791_v61 }
 0x1b5   : > { %v5794_v40 = vpop.f32.mrf.mxu0  ;;  %v5833_v39 = vadd.f32 %v5832_v35, %v5831_v52 }
 0x1b6   : > { %v3345_v46 = vrot.slane %v3344_v9, 4  ;;  %v3366_v38 = vadd.f32 %v3365_v49, %v3359_v25  ;;  %v5834_v30 = vpop.f32.mrf.mxu1 }
 0x1b7   : > { %v5795_v6 = vpop.f32.mrf.mxu0 }
 0x1b8   : > { %v3346_v23 = vadd.f32 %v3345_v46, %v3344_v9  ;;  %v3367_v56 = vrot.slane %v3366_v38, 4  ;;  %v5835_v1 = vpop.f32.mrf.mxu1  ;;  %v5796_v0 = vadd.f32 %v5795_v6, %v5794_v40  ;;  %v3829_v46 = vadd.f32 %v5833_v39, %v5793_v11 }
 0x1b9   : > { %v5797_v59 = vpop.f32.mrf.mxu0  ;;  %v5836_v9 = vadd.f32 %v5835_v1, %v5834_v30 }
 0x1ba   : > { %v3347_v17 = vrot.slane %v3346_v23, 2  ;;  %v3368_v13 = vadd.f32 %v3367_v56, %v3366_v38  ;;  %v5837_v29 = vpop.f32.mrf.mxu1 }
 0x1bb   : > { %v5798_v14 = vpop.f32.mrf.mxu0 }
 0x1bc   : > { %v3348_v33 = vadd.f32 %v3347_v17, %v3346_v23  ;;  %v3369_v18 = vrot.slane %v3368_v13, 2  ;;  %v5838_v37 = vpop.f32.mrf.mxu1  ;;  %v3834_v23 = vadd.f32 %v5836_v9, %v5796_v0  ;;  %v5799_v56 = vadd.f32 %v5798_v14, %v5797_v59 }
 0x1bd   : > { %v5800_v19 = vpop.f32.mrf.mxu0  ;;  %v5839_v30 = vadd.f32 %v5838_v37, %v5837_v29 }
 0x1be   : > { %v3349_v3 = vrot.slane %v3348_v33, 1  ;;  %v3370_v47 = vadd.f32 %v3369_v18, %v3368_v13  ;;  %v5840_v31 = vpop.f32.mrf.mxu1 }
 0x1bf   : > { %v5801_v51 = vpop.f32.mrf.mxu0  ;;  %v3837_v22 = vadd.f32 %v5839_v30, %v5799_v56 }
 0x1c0   : > { %v3350_v54 = vadd.f32 %v3349_v3, %v3348_v33  ;;  %v3371_v4 = vrot.slane %v3370_v47, 1  ;;  %v5841_v16 = vpop.f32.mrf.mxu1 }
 0x1c1   : > { %v7824_v5 = vpop.f32.mrf.mxu0 }
 0x1c2   : > { %v7819_v62 = vadd.f32 %v3350_v54, %v7760_v58  ;;  %v3372_v10 = vadd.f32 %v3371_v4, %v3370_v47  ;;  %v7826_v63 = vpop.f32.mrf.mxu1  ;;  %v5802_v54 = vadd.f32 %v5801_v51, %v5800_v19  ;;  %v5842_v4 = vadd.f32 %v5841_v16, %v5840_v31 }
 0x1c3   : > { %v7828_v48 = vpop.f32.mrf.mxu0 }
 0x1c4   : > { %v7822_v36 = vadd.f32 %v3372_v10, %v7762_v15  ;;  %v7830_v41 = vpop.f32.mrf.mxu1  ;;  %v5805_v19 = vadd.f32 %v7828_v48, %v7824_v5 }
 0x1c5   : > { %v7832_v45 = vpop.f32.mrf.mxu0  ;;  %v5845_v31 = vadd.f32 %v7830_v41, %v7826_v63 }
 0x1c6   : > { %v7834_v55 = vpop.f32.mrf.mxu1 }
 0x1c7   : > { %v7836_v58 = vpop.f32.mrf.mxu0  ;;  %v3845_v48 = vadd.f32 %v5845_v31, %v5805_v19 }
 0x1c8   : > { %v7838_v8 = vpop.f32.mrf.mxu1 }
 0x1c9   : > { %v7840_v32 = vpop.f32.mrf.mxu0  ;;  %v5848_v0 = vadd.f32 %v7838_v8, %v7834_v55 }
 0x1ca   : > { %v7842_v15 = vpop.f32.mrf.mxu1 }
 0x1cb   : > { %v7844_v2 = vpop.f32.mrf.mxu0 }
 0x1cc   : > { %v7846_v21 = vpop.f32.mrf.mxu1  ;;  %v5811_v55 = vadd.f32 %v7844_v2, %v7840_v32 }
 0x1cd   : > { %v5851_v8 = vadd.f32 %v7846_v21, %v7842_v15 }
 0x1cf   : > { %v3853_v2 = vadd.f32 %v5851_v8, %v5811_v55 }
 0x1d3   : > { %v5868_v34 = vpop.f32.mrf.mxu0 }
 0x1d5   : > { %v5869_v43 = vpop.f32.mrf.mxu0 }
 0x1d6   : > { %v5870_v50 = vadd.f32 %v5869_v43, %v5868_v34 }
 0x1d7   : > { %v5871_v42 = vpop.f32.mrf.mxu0 }
 0x1d8   : > { %v4097_v7 = vadd.f32 %v5870_v50, %v3826_v57  ;;  %v3842_v57 = vadd.f32 %v5842_v4, %v5802_v54 }
 0x1d9   : > { %v5908_v27 = vpop.f32.mrf.mxu1  ;;  %v5872_v25 = vpop.f32.mrf.mxu0 }
 0x1da   : > { %v5873_v26 = vadd.f32 %v5872_v25, %v5871_v42 }
 0x1db   : > { %v5909_v20 = vpop.f32.mrf.mxu1 }
 0x1dc   : > { %v5910_v12 = vadd.f32 %v5909_v20, %v5908_v27  ;;  %v4098_v52 = vadd.f32 %v5873_v26, %v3829_v46 }
 0x1dd   : > { %v5911_v49 = vpop.f32.mrf.mxu1  ;;  %v5874_v44 = vpop.f32.mrf.mxu0 }
 0x1de   : > { %v4346_v38 = vadd.f32 %v5910_v12, %v4097_v7 }
 0x1df   : > { %v5912_v28 = vpop.f32.mrf.mxu1  ;;  %v5875_v40 = vpop.f32.mrf.mxu0 }
 0x1e0   : > { %v4354_v61 = vadd.f32 %v7851_v53, %v4346_v38  ;;  %v5913_v60 = vadd.f32 %v5912_v28, %v5911_v49  ;;  %v5876_v17 = vadd.f32 %v5875_v40, %v5874_v44  ;;  %v5808_v49 = vadd.f32 %v7836_v58, %v7832_v45 }
 0x1e1   : > { %v5914_v35 = vpop.f32.mrf.mxu1  ;;  %v5877_v1 = vpop.f32.mrf.mxu0 }
 0x1e2   : > { %4362 = vst [vmem:[%s7637_s11 + $0xc0] sm:$0xff] %v4354_v61  ;;  %v4347_v6 = vadd.f32 %v5913_v60, %v4098_v52  ;;  %v4099_v18 = vadd.f32 %v5876_v17, %v3834_v23  ;;  %v3850_v52 = vadd.f32 %v5848_v0, %v5808_v49  ;;  %v4384_v60 = vmul.f32 %v4354_v61, %v4354_v61 }
 0x1e3   : > { %v5915_v13 = vpop.f32.mrf.mxu1  ;;  %v5878_v10 = vpop.f32.mrf.mxu0 }
 0x1e4   : > { %v4355_v33 = vadd.f32 %v7851_v53, %v4347_v6  ;;  %v5916_v3 = vadd.f32 %v5915_v13, %v5914_v35  ;;  %v5879_v34 = vadd.f32 %v5878_v10, %v5877_v1 }
 0x1e5   : > { %v5917_v47 = vpop.f32.mrf.mxu1  ;;  %v5880_v29 = vpop.f32.mrf.mxu0 }
 0x1e6   : > { %4363 = vst [vmem:[%s7637_s11 + $0xc8] sm:$0xff] %v4355_v33  ;;  %v4348_v24 = vadd.f32 %v5916_v3, %v4099_v18  ;;  %v4100_v37 = vadd.f32 %v5879_v34, %v3837_v22  ;;  %v4385_v25 = vmul.f32 %v4355_v33, %v4355_v33  ;;  %v4370_v45 = vadd.f32 %v4355_v33, %v4354_v61 }
 0x1e7   : > { %v5918_v59 = vpop.f32.mrf.mxu1  ;;  %v5881_v11 = vpop.f32.mrf.mxu0 }
 0x1e8   : > { %v4356_v14 = vadd.f32 %v7851_v53, %v4348_v24  ;;  %v5919_v27 = vadd.f32 %v5918_v59, %v5917_v47  ;;  %v5882_v16 = vadd.f32 %v5881_v11, %v5880_v29  ;;  %v4392_v30 = vadd.f32 %v4385_v25, %v4384_v60 }
 0x1e9   : > { %v5920_v43 = vpop.f32.mrf.mxu1  ;;  %v5883_v50 = vpop.f32.mrf.mxu0 }
 0x1ea   : > { %4364 = vst [vmem:[%s7637_s11 + $0xd0] sm:$0xff] %v4356_v14  ;;  %v4349_v51 = vadd.f32 %v5919_v27, %v4100_v37  ;;  %v4101_v42 = vadd.f32 %v5882_v16, %v3842_v57  ;;  %v4386_v58 = vmul.f32 %v4356_v14, %v4356_v14  ;;  %v4371_v6 = vadd.f32 %v4370_v45, %v4356_v14 }
 0x1eb   : > { %v5921_v39 = vpop.f32.mrf.mxu1  ;;  %v5884_v5 = vpop.f32.mrf.mxu0 }
 0x1ec   : > { %v4357_v20 = vadd.f32 %v7851_v53, %v4349_v51  ;;  %v5922_v7 = vadd.f32 %v5921_v39, %v5920_v43  ;;  %v5885_v41 = vadd.f32 %v5884_v5, %v5883_v50  ;;  %v4393_v3 = vadd.f32 %v4392_v30, %v4386_v58 }
 0x1ed   : > { %v5923_v12 = vpop.f32.mrf.mxu1  ;;  %v5886_v46 = vpop.f32.mrf.mxu0 }
 0x1ee   : > { %4365 = vst [vmem:[%s7637_s11 + $0xd8] sm:$0xff] %v4357_v20  ;;  %v4350_v63 = vadd.f32 %v5922_v7, %v4101_v42  ;;  %v4102_v26 = vadd.f32 %v5885_v41, %v3845_v48  ;;  %v4387_v17 = vmul.f32 %v4357_v20, %v4357_v20  ;;  %v4372_v47 = vadd.f32 %v4371_v6, %v4357_v20 }
 0x1ef   : > { %v5924_v9 = vpop.f32.mrf.mxu1  ;;  %v5887_v35 = vpop.f32.mrf.mxu0 }
 0x1f0   : > { %v4358_v38 = vadd.f32 %v7851_v53, %v4350_v63  ;;  %v5925_v28 = vadd.f32 %v5924_v9, %v5923_v12  ;;  %v5888_v40 = vadd.f32 %v5887_v35, %v5886_v46  ;;  %v4394_v10 = vadd.f32 %v4393_v3, %v4387_v17 }
 0x1f1   : > { %v5926_v44 = vpop.f32.mrf.mxu1  ;;  %v5889_v13 = vpop.f32.mrf.mxu0 }
 0x1f2   : > { %4366 = vst [vmem:[%s7637_s11 + $0xe0] sm:$0xff] %v4358_v38  ;;  %v4351_v23 = vadd.f32 %v5925_v28, %v4102_v26  ;;  %v4103_v61 = vadd.f32 %v5888_v40, %v3850_v52  ;;  %v4388_v15 = vmul.f32 %v4358_v38, %v4358_v38  ;;  %v4373_v22 = vadd.f32 %v4372_v47, %v4358_v38 }
 0x1f3   : > { %v5927_v56 = vpop.f32.mrf.mxu1  ;;  %v5890_v32 = vpop.f32.mrf.mxu0 }
 0x1f4   : > { %v4359_v1 = vadd.f32 %v7851_v53, %v4351_v23  ;;  %v5928_v33 = vadd.f32 %v5927_v56, %v5926_v44  ;;  %v5891_v54 = vadd.f32 %v5890_v32, %v5889_v13  ;;  %v4395_v14 = vadd.f32 %v4394_v10, %v4388_v15 }
 0x1f5   : > { %v5929_v18 = vpop.f32.mrf.mxu1 }
 0x1f6   : > { %4367 = vst [vmem:[%s7637_s11 + $0xe8] sm:$0xff] %v4359_v1  ;;  %v4352_v21 = vadd.f32 %v5928_v33, %v4103_v61  ;;  %v4389_v24 = vmul.f32 %v4359_v1, %v4359_v1  ;;  %v4104_v59 = vadd.f32 %v5891_v54, %v3853_v2  ;;  %v4374_v37 = vadd.f32 %v4373_v22, %v4359_v1 }
 0x1f7   : > { %v5930_v4 = vpop.f32.mrf.mxu1 }
 0x1f8   : > { %v4360_v34 = vadd.f32 %v7851_v53, %v4352_v21  ;;  %v5931_v29 = vadd.f32 %v5930_v4, %v5929_v18  ;;  %v4396_v57 = vadd.f32 %v4395_v14, %v4389_v24 }
 0x1fa   : > { %4368 = vst [vmem:[%s7637_s11 + $0xf0] sm:$0xff] %v4360_v34  ;;  %v4390_v27 = vmul.f32 %v4360_v34, %v4360_v34  ;;  %v4353_v43 = vadd.f32 %v5931_v29, %v4104_v59  ;;  %v4375_v11 = vadd.f32 %v4374_v37, %v4360_v34 }
 0x1fc   : > { %v4361_v19 = vadd.f32 %v7851_v53, %v4353_v43  ;;  %v4397_v31 = vadd.f32 %v4396_v57, %v4390_v27 }
 0x1fe   : > { %4369 = vst [vmem:[%s7637_s11 + $0xf8] sm:$0xff] %v4361_v19  ;;  %v4376_v51 = vadd.f32 %v4375_v11, %v4361_v19  ;;  %v4391_v16 = vmul.f32 %v4361_v19, %v4361_v19 }
 0x200   : > { %v4377_v39 = vrot.slane %v4376_v51, 4  ;;  %v4398_v50 = vadd.f32 %v4397_v31, %v4391_v16 }
 0x202   : > { %v4378_v20 = vadd.f32 %v4377_v39, %v4376_v51  ;;  %v4399_v42 = vrot.slane %v4398_v50, 4 }
 0x204   : > { %v4379_v7 = vrot.slane %v4378_v20, 2  ;;  %v4400_v12 = vadd.f32 %v4399_v42, %v4398_v50 }
 0x206   : > { %v4380_v49 = vadd.f32 %v4379_v7, %v4378_v20  ;;  %v4401_v0 = vrot.slane %v4400_v12, 2 }
 0x208   : > { %v4381_v5 = vrot.slane %v4380_v49, 1  ;;  %v4402_v48 = vadd.f32 %v4401_v0, %v4400_v12 }
 0x20a   : > { %v4382_v63 = vadd.f32 %v4381_v5, %v4380_v49  ;;  %v4403_v41 = vrot.slane %v4402_v48, 1 }
 0x20c   : > { %v4383_v53 = vadd.f32 %v4382_v63, %v7819_v62  ;;  %v4404_v9 = vadd.f32 %v4403_v41, %v4402_v48 }
 0x20e   : > { %v4405_v25 = vadd.f32 %v4404_v9, %v7822_v36  ;;  %4406 = vst [vmem:[%s266_s20] sm:$0x1] %v4383_v53 }
 0x210   : > { %4407 = vst [vmem:[%s266_s20 + $0x1] sm:$0x1] %v4405_v25 }
 0x211 PF: > { %s16_s18 = sadd.s32 1, %s6331_s18  }
 0x212   : > { %p13_p6 = scmp.ge.s32.totalorder %s16_s18, 4  }
 0x214   :  { %15 = sbr.rel (!%p13_p6) target bundleno = 1 (0x1), region = 84 }

</bundles_post_ra>
